<compile_context>
chip_gen: v7x
topology: tpu7x:2x2x1
jax: 0.10.0
libtpu: 0.0.40
codegen_flags: <defaults>
</compile_context>

<pallas_src>
import math

import jax
import jax.numpy as jnp
from jax.experimental import pallas as pl
from jax.experimental.pallas import tpu as pltpu

HIDDEN = 1024
N_CLASSES = 2
HEAD_PAD = 128          # classifier head padded to a full lane width
EPS = 1e-5
NEG_INF = -1e30         # padding bias for the unused head lanes


def _dann_sd_kernel(x_ref,
                    w1_ref, b1_ref, g1_ref, be1_ref,
                    w2_ref, b2_ref, g2_ref, be2_ref,
                    w3_ref, b3_ref,
                    out_ref):
    B = x_ref.shape[0]
    inv_b = 1.0 / B

    def bn_fold(h, g, be):
        # One-pass batch statistics (biased variance, PyTorch train-mode BN),
        # folded into a single per-feature scale/shift.
        s1 = jnp.sum(h, axis=0, keepdims=True)
        s2 = jnp.sum(h * h, axis=0, keepdims=True)
        mu = s1 * inv_b
        var = jnp.maximum(s2 * inv_b - mu * mu, 0.0)
        scale = g * jax.lax.rsqrt(var + EPS)          # EUP rsqrt
        shift = be - mu * scale
        return h * scale + shift

    # ---- fc1: Linear (bf16 MXU operands, f32 accum) -> ReLU -> BN (f32) ----
    x = x_ref[...].astype(jnp.bfloat16)
    h = jnp.dot(x, w1_ref[...], preferred_element_type=jnp.float32) + b1_ref[...]
    h = jnp.maximum(h, 0.0)
    h = bn_fold(h, g1_ref[...], be1_ref[...])

    # ---- fc2: Linear -> ReLU -> BN ----
    h = jnp.dot(h.astype(jnp.bfloat16), w2_ref[...],
                preferred_element_type=jnp.float32) + b2_ref[...]
    h = jnp.maximum(h, 0.0)
    h = bn_fold(h, g2_ref[...], be2_ref[...])

    # ---- fc4 (head padded to 128 lanes) + log_softmax over the 2 real classes ----
    logits = jnp.dot(h.astype(jnp.bfloat16), w3_ref[...],
                     preferred_element_type=jnp.float32) + b3_ref[...]
    # Padded lanes carry bias -1e30: they never win the max and exp() underflows
    # to 0, so the logsumexp is exactly over the 2 real classes.
    m = jnp.max(logits, axis=1, keepdims=True)
    lse = jnp.log(jnp.sum(jnp.exp(logits - m), axis=1, keepdims=True)) + m
    out_ref[...] = logits - lse


def dann_source_discriminator(x, params):
    """x: (B, n_input) float32. params: dict from init_params (bf16 weights)."""
    B = x.shape[0]
    operands = (
        x,
        params["w1"], params["b1"], params["g1"], params["be1"],
        params["w2"], params["b2"], params["g2"], params["be2"],
        params["w3"], params["b3"],
    )
    # Small batch / hidden=1024: everything fits in VMEM, so use full-array
    # blocks and a single kernel invocation (no grid).
    # TODO(synk): for large B (esp. v7x's 64 MiB VMEM), tile the batch axis with
    # a grid, split BN into a two-pass stats-then-normalize scheme, mark the
    # batch axis "parallel" for megacore, and pipeline the w2 fetch.
    full = lambda a: pl.BlockSpec(a.shape, lambda: (0,) * a.ndim,
                                  memory_space=pltpu.VMEM)
    out_pad = pl.pallas_call(
        _dann_sd_kernel,
        out_shape=jax.ShapeDtypeStruct((B, HEAD_PAD), jnp.float32),
        in_specs=[full(a) for a in operands],
        out_specs=pl.BlockSpec((B, HEAD_PAD), lambda: (0, 0),
                               memory_space=pltpu.VMEM),
    )(*operands)
    return out_pad[:, :N_CLASSES]


def init_params(key, n_input):
    """PyTorch-style init. Linear weights stored transposed (in, out), in bf16."""
    ks = jax.random.split(key, 6)

    def linear(kw, kb, fan_in, fan_out):
        bound = 1.0 / math.sqrt(fan_in)
        w = jax.random.uniform(kw, (fan_in, fan_out), jnp.float32, -bound, bound)
        b = jax.random.uniform(kb, (1, fan_out), jnp.float32, -bound, bound)
        return w, b

    w1, b1 = linear(ks[0], ks[1], n_input, HIDDEN)
    w2, b2 = linear(ks[2], ks[3], HIDDEN, HIDDEN)
    w3, b3 = linear(ks[4], ks[5], HIDDEN, N_CLASSES)

    # Pad the 2-wide classifier head to 128 lanes (lane-dense matmul + store).
    w3_pad = jnp.zeros((HIDDEN, HEAD_PAD), jnp.float32).at[:, :N_CLASSES].set(w3)
    b3_pad = jnp.full((1, HEAD_PAD), NEG_INF, jnp.float32).at[:, :N_CLASSES].set(b3)

    return {
        # MXU operands stored in bf16 (halves HBM weight traffic).
        "w1": w1.astype(jnp.bfloat16),
        "w2": w2.astype(jnp.bfloat16),
        "w3": w3_pad.astype(jnp.bfloat16),
        # Biases / BN affine stay f32 (elementwise path stays f32).
        "b1": b1, "b2": b2, "b3": b3_pad,
        "g1": jnp.ones((1, HIDDEN), jnp.float32), "be1": jnp.zeros((1, HIDDEN), jnp.float32),
        "g2": jnp.ones((1, HIDDEN), jnp.float32), "be2": jnp.zeros((1, HIDDEN), jnp.float32),
    }


def _reference(x, p):
    """Pure-JAX reference with the same bf16-operand matmuls / f32 BN math."""
    def mm(a, w):
        return jnp.dot(a.astype(jnp.bfloat16), w, preferred_element_type=jnp.float32)

    def bn(h):
        mu = jnp.mean(h, axis=0, keepdims=True)
        var = jnp.mean((h - mu) ** 2, axis=0, keepdims=True)   # biased variance
        return (h - mu) / jnp.sqrt(var + EPS)

    h = bn(jnp.maximum(mm(x, p["w1"]) + p["b1"], 0.0)) * p["g1"] + p["be1"]
    h = bn(jnp.maximum(mm(h, p["w2"]) + p["b2"], 0.0)) * p["g2"] + p["be2"]
    logits = mm(h, p["w3"])[:, :N_CLASSES] + p["b3"][:, :N_CLASSES]
    return jax.nn.log_softmax(logits, axis=1)


if __name__ == "__main__":
    B, N_INPUT = 8, 32
    key = jax.random.PRNGKey(0)
    kx, kp = jax.random.split(key)
    x = jax.random.normal(kx, (B, N_INPUT), dtype=jnp.float32)
    params = init_params(kp, N_INPUT)

    out = dann_source_discriminator(x, params)
    out = jax.block_until_ready(out)

    ref = _reference(x, params)
    assert out.shape == (B, N_CLASSES)
    assert bool(jnp.all(jnp.isfinite(out))), "non-finite output"
    assert jnp.allclose(out, ref, atol=5e-3, rtol=5e-3), "mismatch vs reference"
    print("KERNEL_OK")
</pallas_src>

<mosaic_0001>
module attributes {stable_mosaic.version = 11 : i64} {
  func.func @_dann_sd_kernel(%arg0: memref<8x32xf32, #tpu.memory_space<vmem>>, %arg1: memref<32x1024xbf16, #tpu.memory_space<vmem>>, %arg2: memref<1x1024xf32, #tpu.memory_space<vmem>>, %arg3: memref<1x1024xf32, #tpu.memory_space<vmem>>, %arg4: memref<1x1024xf32, #tpu.memory_space<vmem>>, %arg5: memref<1024x1024xbf16, #tpu.memory_space<vmem>>, %arg6: memref<1x1024xf32, #tpu.memory_space<vmem>>, %arg7: memref<1x1024xf32, #tpu.memory_space<vmem>>, %arg8: memref<1x1024xf32, #tpu.memory_space<vmem>>, %arg9: memref<1024x128xbf16, #tpu.memory_space<vmem>>, %arg10: memref<1x128xf32, #tpu.memory_space<vmem>>, %arg11: memref<8x128xf32, #tpu.memory_space<vmem>>) attributes {dimension_semantics = [], scalar_prefetch = 0 : i64, scratch_operands = 0 : i64, tpu.core_type = #tpu.core_type<tc>} {
    %c0 = arith.constant 0 : index
    %c0_0 = arith.constant 0 : index
    %0 = vector.load %arg0[%c0, %c0_0] : memref<8x32xf32, #tpu.memory_space<vmem>>, vector<8x32xf32>
    %1 = arith.truncf %0 : vector<8x32xf32> to vector<8x32xbf16>
    %c0_1 = arith.constant 0 : index
    %c0_2 = arith.constant 0 : index
    %2 = vector.load %arg1[%c0_1, %c0_2] : memref<32x1024xbf16, #tpu.memory_space<vmem>>, vector<32x1024xbf16>
    %cst = arith.constant dense<0.000000e+00> : vector<8x1024xf32>
    %3 = tpu.matmul %1, %2, %cst {dimension_numbers = #tpu.dot_dimension_numbers<[1], [0], [0], [1], [0, 0, 1, 1], [], []>} : vector<8x32xbf16>, vector<32x1024xbf16>, vector<8x1024xf32> -> vector<8x1024xf32>
    %c0_3 = arith.constant 0 : index
    %c0_4 = arith.constant 0 : index
    %4 = vector.load %arg2[%c0_3, %c0_4] : memref<1x1024xf32, #tpu.memory_space<vmem>>, vector<1x1024xf32>
    %5 = vector.broadcast %4 : vector<1x1024xf32> to vector<8x1024xf32>
    %6 = arith.addf %3, %5 : vector<8x1024xf32>
    %cst_5 = arith.constant 0.000000e+00 : f32
    %7 = vector.broadcast %cst_5 : f32 to vector<8x1024xf32>
    %8 = arith.maximumf %6, %7 : vector<8x1024xf32>
    %c0_6 = arith.constant 0 : index
    %c0_7 = arith.constant 0 : index
    %9 = vector.load %arg3[%c0_6, %c0_7] : memref<1x1024xf32, #tpu.memory_space<vmem>>, vector<1x1024xf32>
    %c0_8 = arith.constant 0 : index
    %c0_9 = arith.constant 0 : index
    %10 = vector.load %arg4[%c0_8, %c0_9] : memref<1x1024xf32, #tpu.memory_space<vmem>>, vector<1x1024xf32>
    %cst_10 = arith.constant dense<0.000000e+00> : vector<1024xf32>
    %11 = vector.multi_reduction <add>, %8, %cst_10 [0] : vector<8x1024xf32> to vector<1024xf32>
    %12 = vector.shape_cast %11 : vector<1024xf32> to vector<1x1024xf32>
    %13 = arith.mulf %8, %8 : vector<8x1024xf32>
    %cst_11 = arith.constant dense<0.000000e+00> : vector<1024xf32>
    %14 = vector.multi_reduction <add>, %13, %cst_11 [0] : vector<8x1024xf32> to vector<1024xf32>
    %15 = vector.shape_cast %14 : vector<1024xf32> to vector<1x1024xf32>
    %cst_12 = arith.constant 1.250000e-01 : f32
    %16 = vector.broadcast %cst_12 : f32 to vector<1x1024xf32>
    %17 = arith.mulf %12, %16 : vector<1x1024xf32>
    %cst_13 = arith.constant 1.250000e-01 : f32
    %18 = vector.broadcast %cst_13 : f32 to vector<1x1024xf32>
    %19 = arith.mulf %15, %18 : vector<1x1024xf32>
    %20 = arith.mulf %17, %17 : vector<1x1024xf32>
    %21 = arith.subf %19, %20 : vector<1x1024xf32>
    %cst_14 = arith.constant 0.000000e+00 : f32
    %22 = vector.broadcast %cst_14 : f32 to vector<1x1024xf32>
    %23 = arith.maximumf %21, %22 : vector<1x1024xf32>
    %cst_15 = arith.constant 9.99999974E-6 : f32
    %24 = vector.broadcast %cst_15 : f32 to vector<1x1024xf32>
    %25 = arith.addf %23, %24 : vector<1x1024xf32>
    %26 = math.rsqrt %25 : vector<1x1024xf32>
    %27 = arith.mulf %9, %26 : vector<1x1024xf32>
    %28 = arith.mulf %17, %27 : vector<1x1024xf32>
    %29 = arith.subf %10, %28 : vector<1x1024xf32>
    %30 = vector.broadcast %27 : vector<1x1024xf32> to vector<8x1024xf32>
    %31 = arith.mulf %8, %30 : vector<8x1024xf32>
    %32 = vector.broadcast %29 : vector<1x1024xf32> to vector<8x1024xf32>
    %33 = arith.addf %31, %32 : vector<8x1024xf32>
    %34 = arith.truncf %33 : vector<8x1024xf32> to vector<8x1024xbf16>
    %c0_16 = arith.constant 0 : index
    %c0_17 = arith.constant 0 : index
    %35 = vector.load %arg5[%c0_16, %c0_17] : memref<1024x1024xbf16, #tpu.memory_space<vmem>>, vector<1024x1024xbf16>
    %cst_18 = arith.constant dense<0.000000e+00> : vector<8x1024xf32>
    %36 = tpu.matmul %34, %35, %cst_18 {dimension_numbers = #tpu.dot_dimension_numbers<[1], [0], [0], [1], [0, 0, 1, 1], [], []>} : vector<8x1024xbf16>, vector<1024x1024xbf16>, vector<8x1024xf32> -> vector<8x1024xf32>
    %c0_19 = arith.constant 0 : index
    %c0_20 = arith.constant 0 : index
    %37 = vector.load %arg6[%c0_19, %c0_20] : memref<1x1024xf32, #tpu.memory_space<vmem>>, vector<1x1024xf32>
    %38 = vector.broadcast %37 : vector<1x1024xf32> to vector<8x1024xf32>
    %39 = arith.addf %36, %38 : vector<8x1024xf32>
    %cst_21 = arith.constant 0.000000e+00 : f32
    %40 = vector.broadcast %cst_21 : f32 to vector<8x1024xf32>
    %41 = arith.maximumf %39, %40 : vector<8x1024xf32>
    %c0_22 = arith.constant 0 : index
    %c0_23 = arith.constant 0 : index
    %42 = vector.load %arg7[%c0_22, %c0_23] : memref<1x1024xf32, #tpu.memory_space<vmem>>, vector<1x1024xf32>
    %c0_24 = arith.constant 0 : index
    %c0_25 = arith.constant 0 : index
    %43 = vector.load %arg8[%c0_24, %c0_25] : memref<1x1024xf32, #tpu.memory_space<vmem>>, vector<1x1024xf32>
    %cst_26 = arith.constant dense<0.000000e+00> : vector<1024xf32>
    %44 = vector.multi_reduction <add>, %41, %cst_26 [0] : vector<8x1024xf32> to vector<1024xf32>
    %45 = vector.shape_cast %44 : vector<1024xf32> to vector<1x1024xf32>
    %46 = arith.mulf %41, %41 : vector<8x1024xf32>
    %cst_27 = arith.constant dense<0.000000e+00> : vector<1024xf32>
    %47 = vector.multi_reduction <add>, %46, %cst_27 [0] : vector<8x1024xf32> to vector<1024xf32>
    %48 = vector.shape_cast %47 : vector<1024xf32> to vector<1x1024xf32>
    %cst_28 = arith.constant 1.250000e-01 : f32
    %49 = vector.broadcast %cst_28 : f32 to vector<1x1024xf32>
    %50 = arith.mulf %45, %49 : vector<1x1024xf32>
    %cst_29 = arith.constant 1.250000e-01 : f32
    %51 = vector.broadcast %cst_29 : f32 to vector<1x1024xf32>
    %52 = arith.mulf %48, %51 : vector<1x1024xf32>
    %53 = arith.mulf %50, %50 : vector<1x1024xf32>
    %54 = arith.subf %52, %53 : vector<1x1024xf32>
    %cst_30 = arith.constant 0.000000e+00 : f32
    %55 = vector.broadcast %cst_30 : f32 to vector<1x1024xf32>
    %56 = arith.maximumf %54, %55 : vector<1x1024xf32>
    %cst_31 = arith.constant 9.99999974E-6 : f32
    %57 = vector.broadcast %cst_31 : f32 to vector<1x1024xf32>
    %58 = arith.addf %56, %57 : vector<1x1024xf32>
    %59 = math.rsqrt %58 : vector<1x1024xf32>
    %60 = arith.mulf %42, %59 : vector<1x1024xf32>
    %61 = arith.mulf %50, %60 : vector<1x1024xf32>
    %62 = arith.subf %43, %61 : vector<1x1024xf32>
    %63 = vector.broadcast %60 : vector<1x1024xf32> to vector<8x1024xf32>
    %64 = arith.mulf %41, %63 : vector<8x1024xf32>
    %65 = vector.broadcast %62 : vector<1x1024xf32> to vector<8x1024xf32>
    %66 = arith.addf %64, %65 : vector<8x1024xf32>
    %67 = arith.truncf %66 : vector<8x1024xf32> to vector<8x1024xbf16>
    %c0_32 = arith.constant 0 : index
    %c0_33 = arith.constant 0 : index
    %68 = vector.load %arg9[%c0_32, %c0_33] : memref<1024x128xbf16, #tpu.memory_space<vmem>>, vector<1024x128xbf16>
    %cst_34 = arith.constant dense<0.000000e+00> : vector<8x128xf32>
    %69 = tpu.matmul %67, %68, %cst_34 {dimension_numbers = #tpu.dot_dimension_numbers<[1], [0], [0], [1], [0, 0, 1, 1], [], []>} : vector<8x1024xbf16>, vector<1024x128xbf16>, vector<8x128xf32> -> vector<8x128xf32>
    %c0_35 = arith.constant 0 : index
    %c0_36 = arith.constant 0 : index
    %70 = vector.load %arg10[%c0_35, %c0_36] : memref<1x128xf32, #tpu.memory_space<vmem>>, vector<1x128xf32>
    %71 = vector.broadcast %70 : vector<1x128xf32> to vector<8x128xf32>
    %72 = arith.addf %69, %71 : vector<8x128xf32>
    %cst_37 = arith.constant dense<0xFF800000> : vector<8xf32>
    %73 = vector.multi_reduction <maximumf>, %72, %cst_37 [1] : vector<8x128xf32> to vector<8xf32>
    %74 = vector.shape_cast %73 : vector<8xf32> to vector<8x1xf32>
    %75 = vector.broadcast %74 : vector<8x1xf32> to vector<8x128xf32>
    %76 = arith.subf %72, %75 : vector<8x128xf32>
    %77 = math.exp %76 : vector<8x128xf32>
    %cst_38 = arith.constant dense<0.000000e+00> : vector<8xf32>
    %78 = vector.multi_reduction <add>, %77, %cst_38 [1] : vector<8x128xf32> to vector<8xf32>
    %79 = vector.shape_cast %78 : vector<8xf32> to vector<8x1xf32>
    %80 = math.log %79 : vector<8x1xf32>
    %81 = arith.addf %80, %74 : vector<8x1xf32>
    %82 = vector.broadcast %81 : vector<8x1xf32> to vector<8x128xf32>
    %83 = arith.subf %72, %82 : vector<8x128xf32>
    %c0_39 = arith.constant 0 : index
    %c0_40 = arith.constant 0 : index
    %84 = vector.load %arg11[%c0_39, %c0_40] : memref<8x128xf32, #tpu.memory_space<vmem>>, vector<8x128xf32>
    tpu.vector_store %arg11[%c0_39, %c0_40], %83 {strides = array<i32>} : memref<8x128xf32, #tpu.memory_space<vmem>>, vector<8x128xf32>,
    return
  }
}

</mosaic_0001>

<bundles_post_ra>
// kernel: tpu_custom_call.1
= control target key start
LH: loop header
LB: loop body
LE: loop exit
PB: predicated region body
PF: predicated region fallthrough
CT: control target
= control target key end

     0   :  { %16 = vsyncpa [#allocation3], 0  ;;  %s7708_s0 = inlined_call_operand.hbm [shape: f32[8,32], index: 0, kind: input, shape index: {}]   ;;  %s7709_s1 = inlined_call_operand.hbm [shape: bf16[32,1024], index: 1, kind: input, shape index: {}]   ;;  %s7710_s2 = inlined_call_operand.hbm [shape: f32[1,1024], index: 2, kind: input, shape index: {}]   ;;  %s7711_s3 = inlined_call_operand.hbm [shape: f32[1,1024], index: 3, kind: input, shape index: {}]   ;;  %s7712_s4 = inlined_call_operand.hbm [shape: f32[1,1024], index: 4, kind: input, shape index: {}]   ;;  %s7713_s5 = inlined_call_operand.hbm [shape: bf16[1024,1024], index: 5, kind: input, shape index: {}]   ;;  %s7714_s6 = inlined_call_operand.hbm [shape: f32[1,1024], index: 6, kind: input, shape index: {}]   ;;  %s7715_s7 = inlined_call_operand.hbm [shape: f32[1,1024], index: 7, kind: input, shape index: {}]   ;;  %s7716_s8 = inlined_call_operand.hbm [shape: f32[1,1024], index: 8, kind: input, shape index: {}]   ;;  %s7717_s9 = inlined_call_operand.hbm [shape: bf16[1024,128], index: 9, kind: input, shape index: {}]   ;;  %s7718_s10 = inlined_call_operand.hbm [shape: f32[1,128], index: 10, kind: input, shape index: {}]   ;;  %s7719_s11 = inlined_call_operand.hbm [shape: f32[8,128], index: 11, kind: output, shape index: {}]  }
   0x1   :  { %17 = vsyncpa [#allocation6], 0 }
   0x2   :  { %18 = vsyncpa [#allocation9], 0 }
   0x3   :  { %19 = vsyncpa [#allocation12], 0 }
   0x4   :  { %20 = vsyncpa [#allocation15], 0 }
   0x5   :  { %21 = vsyncpa [#allocation18], 0 }
   0x6   :  { %22 = vsyncpa [#allocation4], 0  ;;  %s6903_s17 = smov [#allocation5]   ;;  %s6625_s21 = scalar_lea.hbm %s7709_s1, 2048 }
   0x7   :  { %s38_s18 = sshll.u32 %s6903_s17, 4  ;;  %p6626_p0 = scmp.ne.s32.totalorder %s7709_s1, %s6625_s21  ;;  %s39_s18 = int_to_ptr.vmem [resolvable:$true] %s38_s18 }
   0x8   :  { %p6629_p1 = scmp.lt.u32.totalorder %s6625_s21, %s7709_s1 }
   0xa   :  { %p6631_p2 = pnand %p6629_p1, %p6626_p0 }
   0xc   :  { %6634 = shalt.err (!%p6631_p2)
}
   0xd   :  { %s6635_s26 = scalar_lea.vmem %s39_s18, 2048  ;;  %p6640_p4 = scmp.lt.s32.totalorder %s39_s18, %s39_s18 }
   0xe   :  { %p6636_p3 = scmp.ne.s32.totalorder %s39_s18, %s6635_s26  ;;  %p6641_p5 = scmp.lt.s32.totalorder %s6635_s26, %s6635_s26 }
  0x10   :  { %p6642_p6 = por %p6641_p5, %p6640_p4 }
  0x12   :  { %p6643_p7 = pnand %p6642_p6, %p6636_p3 }
  0x14   :  { %6646 = shalt.err (!%p6643_p7)
}
  0x15   :  { %s6904_s27 = smov 512   ;;  %s6905_s28 = smov 32  }
  0x16   :  { %44 = dma.hbm_to_vmem [thread:$0]  %s7709_s1, 2048, %s39_s18, [#allocation6], %s6904_s27, %s6904_s27, %s6905_s28  }
  0x17   :  { %s6906_s12 = smov [#allocation8]   ;;  %s6907_s14 = smov [#allocation11]  }
  0x18   :  { %s61_s13 = sshll.u32 %s6906_s12, 4  ;;  %s80_s15 = sshll.u32 %s6907_s14, 4  ;;  %s62_s13 = int_to_ptr.vmem [resolvable:$true] %s61_s13  ;;  %s81_s15 = int_to_ptr.vmem [resolvable:$true] %s80_s15 }
  0x19   :  { %s6647_s19 = scalar_lea.hbm %s7711_s3, 128 }
  0x1a   :  { %p6648_p8 = scmp.ne.s32.totalorder %s7711_s3, %s6647_s19  ;;  %p6651_p9 = scmp.lt.u32.totalorder %s6647_s19, %s7711_s3 }
  0x1c   :  { %p6653_p10 = pnand %p6651_p9, %p6648_p8 }
  0x1e   :  { %6656 = shalt.err (!%p6653_p10)
}
  0x1f   :  { %s6657_s1 = scalar_lea.vmem %s62_s13, 128  ;;  %p6662_p12 = scmp.lt.s32.totalorder %s62_s13, %s62_s13 }
  0x20   :  { %p6658_p11 = scmp.ne.s32.totalorder %s62_s13, %s6657_s1  ;;  %p6663_p13 = scmp.lt.s32.totalorder %s6657_s1, %s6657_s1 }
  0x22   :  { %p6664_p0 = por %p6663_p13, %p6662_p12 }
  0x24   :  { %p6665_p1 = pnand %p6664_p0, %p6658_p11 }
  0x26   :  { %6668 = shalt.err (!%p6665_p1)
}
  0x27   :  { %64 = dma.hbm_to_vmem [thread:$0]  %s7711_s3, 128, %s62_s13, [#allocation9]  }
  0x28   :  { %s6669_s29 = scalar_lea.hbm %s7713_s5, 65536 }
  0x29   :  { %p6670_p2 = scmp.ne.s32.totalorder %s7713_s5, %s6669_s29  ;;  %p6673_p3 = scmp.lt.u32.totalorder %s6669_s29, %s7713_s5 }
  0x2b   :  { %p6675_p4 = pnand %p6673_p3, %p6670_p2 }
  0x2d   :  { %6678 = shalt.err (!%p6675_p4)
}
  0x2e   :  { %s6679_s17 = scalar_lea.vmem %s81_s15, 65536  ;;  %p6684_p6 = scmp.lt.s32.totalorder %s81_s15, %s81_s15 }
  0x2f   :  { %p6680_p5 = scmp.ne.s32.totalorder %s81_s15, %s6679_s17  ;;  %p6685_p7 = scmp.lt.s32.totalorder %s6679_s17, %s6679_s17 }
  0x31   :  { %p6686_p8 = por %p6685_p7, %p6684_p6 }
  0x33   :  { %p6687_p9 = pnand %p6686_p8, %p6680_p5 }
  0x35   :  { %6690 = shalt.err (!%p6687_p9)
}
  0x36   :  { %86 = dma.hbm_to_vmem [thread:$0]  %s7713_s5, 65536, %s81_s15, [#allocation12], %s6904_s27, %s6904_s27, %s6905_s28  }
  0x37   :  { %s6908_s19 = smov [#allocation14]   ;;  %s6909_s21 = smov [#allocation17]  }
  0x38   :  { %s103_s20 = sshll.u32 %s6908_s19, 4  ;;  %s122_s22 = sshll.u32 %s6909_s21, 4  ;;  %s104_s20 = int_to_ptr.vmem [resolvable:$true] %s103_s20  ;;  %s123_s22 = int_to_ptr.vmem [resolvable:$true] %s122_s22 }
  0x39   :  { %s6691_s18 = scalar_lea.hbm %s7715_s7, 128 }
  0x3a   :  { %p6692_p10 = scmp.ne.s32.totalorder %s7715_s7, %s6691_s18  ;;  %p6695_p11 = scmp.lt.u32.totalorder %s6691_s18, %s7715_s7 }
  0x3c   :  { %p6697_p12 = pnand %p6695_p11, %p6692_p10 }
  0x3e   :  { %6700 = shalt.err (!%p6697_p12)
}
  0x3f   :  { %s6701_s5 = scalar_lea.vmem %s104_s20, 128  ;;  %p6706_p0 = scmp.lt.s32.totalorder %s104_s20, %s104_s20 }
  0x40   :  { %p6702_p13 = scmp.ne.s32.totalorder %s104_s20, %s6701_s5  ;;  %p6707_p1 = scmp.lt.s32.totalorder %s6701_s5, %s6701_s5 }
  0x42   :  { %p6708_p2 = por %p6707_p1, %p6706_p0 }
  0x44   :  { %p6709_p3 = pnand %p6708_p2, %p6702_p13 }
  0x46   :  { %6712 = shalt.err (!%p6709_p3)
}
  0x47   :  { %106 = dma.hbm_to_vmem [thread:$0]  %s7715_s7, 128, %s104_s20, [#allocation15]  }
  0x48   :  { %s6713_s12 = scalar_lea.hbm %s7717_s9, 8192 }
  0x49   :  { %p6714_p4 = scmp.ne.s32.totalorder %s7717_s9, %s6713_s12  ;;  %p6717_p5 = scmp.lt.u32.totalorder %s6713_s12, %s7717_s9 }
  0x4b   :  { %p6719_p6 = pnand %p6717_p5, %p6714_p4 }
  0x4d   :  { %6722 = shalt.err (!%p6719_p6)
}
  0x4e   :  { %s6723_s13 = scalar_lea.vmem %s123_s22, 8192  ;;  %p6728_p8 = scmp.lt.s32.totalorder %s123_s22, %s123_s22 }
  0x4f   :  { %p6724_p7 = scmp.ne.s32.totalorder %s123_s22, %s6723_s13  ;;  %p6729_p9 = scmp.lt.s32.totalorder %s6723_s13, %s6723_s13 }
  0x51   :  { %p6730_p10 = por %p6729_p9, %p6728_p8 }
  0x53   :  { %p6731_p11 = pnand %p6730_p10, %p6724_p7 }
  0x55   :  { %6734 = shalt.err (!%p6731_p11)
}
  0x56   :  { %s6910_s7 = smov 64   ;;  %s6911_s19 = smov 4  }
  0x57   :  { %128 = dma.hbm_to_vmem [thread:$0]  %s7717_s9, 8192, %s123_s22, [#allocation18], %s6910_s7, %s6910_s7, %s6911_s19  }
  0x58   :  { %s6912_s23 = smov [#allocation2]   ;;  %s6913_s18 = smov [#allocation7]  }
  0x59   :  { %s29_s1 = sshll.u32 %s6912_s23, 4  ;;  %s51_s24 = sshll.u32 %s6913_s18, 4  ;;  %s30_s1 = int_to_ptr.vmem [resolvable:$true] %s29_s1  ;;  %s52_s24 = int_to_ptr.vmem [resolvable:$true] %s51_s24 }
  0x5a   :  { %s6735_s29 = scalar_lea.hbm %s7708_s0, 128 }
  0x5b   :  { %p6736_p12 = scmp.ne.s32.totalorder %s7708_s0, %s6735_s29  ;;  %p6739_p13 = scmp.lt.u32.totalorder %s6735_s29, %s7708_s0 }
  0x5d   :  { %p6741_p0 = pnand %p6739_p13, %p6736_p12 }
  0x5f   :  { %6744 = shalt.err (!%p6741_p0)
}
  0x60   :  { %s6745_s9 = scalar_lea.vmem %s30_s1, 128  ;;  %p6750_p2 = scmp.lt.s32.totalorder %s30_s1, %s30_s1 }
  0x61   :  { %p6746_p1 = scmp.ne.s32.totalorder %s30_s1, %s6745_s9  ;;  %p6751_p3 = scmp.lt.s32.totalorder %s6745_s9, %s6745_s9 }
  0x63   :  { %p6752_p4 = por %p6751_p3, %p6750_p2 }
  0x65   :  { %p6753_p5 = pnand %p6752_p4, %p6746_p1 }
  0x67   :  { %6756 = shalt.err (!%p6753_p5)
}
  0x68   :  { %32 = dma.hbm_to_vmem [thread:$0]  %s7708_s0, 128, %s30_s1, [#allocation3]  }
  0x69   :  { %s6757_s16 = scalar_lea.hbm %s7710_s2, 128 }
  0x6a   :  { %p6758_p6 = scmp.ne.s32.totalorder %s7710_s2, %s6757_s16  ;;  %p6761_p7 = scmp.lt.u32.totalorder %s6757_s16, %s7710_s2 }
  0x6c   :  { %p6763_p8 = pnand %p6761_p7, %p6758_p6 }
  0x6e   :  { %6766 = shalt.err (!%p6763_p8)
}
  0x6f   :  { %s6767_s19 = scalar_lea.vmem %s52_s24, 128  ;;  %p6772_p10 = scmp.lt.s32.totalorder %s52_s24, %s52_s24 }
  0x70   :  { %p6768_p9 = scmp.ne.s32.totalorder %s52_s24, %s6767_s19  ;;  %p6773_p11 = scmp.lt.s32.totalorder %s6767_s19, %s6767_s19 }
  0x72   :  { %p6774_p12 = por %p6773_p11, %p6772_p10 }
  0x74   :  { %p6775_p13 = pnand %p6774_p12, %p6768_p9 }
  0x76   :  { %6778 = shalt.err (!%p6775_p13)
}
  0x77   :  { %54 = dma.hbm_to_vmem [thread:$0]  %s7710_s2, 128, %s52_s24, [#allocation6]  }
  0x78   :  { %s6914_s21 = smov [#allocation10]   ;;  %s6915_s1 = smov [#allocation13]  }
  0x79   :  { %s71_s23 = sshll.u32 %s6914_s21, 4  ;;  %s93_s18 = sshll.u32 %s6915_s1, 4  ;;  %s72_s23 = int_to_ptr.vmem [resolvable:$true] %s71_s23  ;;  %s94_s18 = int_to_ptr.vmem [resolvable:$true] %s93_s18 }
  0x7a   :  { %s6779_s29 = scalar_lea.hbm %s7712_s4, 128 }
  0x7b   :  { %p6780_p0 = scmp.ne.s32.totalorder %s7712_s4, %s6779_s29  ;;  %p6783_p1 = scmp.lt.u32.totalorder %s6779_s29, %s7712_s4 }
  0x7d   :  { %p6785_p2 = pnand %p6783_p1, %p6780_p0 }
  0x7f   :  { %6788 = shalt.err (!%p6785_p2)
}
  0x80   :  { %s6789_s2 = scalar_lea.vmem %s72_s23, 128  ;;  %p6794_p4 = scmp.lt.s32.totalorder %s72_s23, %s72_s23 }
  0x81   :  { %p6790_p3 = scmp.ne.s32.totalorder %s72_s23, %s6789_s2  ;;  %p6795_p5 = scmp.lt.s32.totalorder %s6789_s2, %s6789_s2 }
  0x83   :  { %p6796_p6 = por %p6795_p5, %p6794_p4 }
  0x85   :  { %p6797_p7 = pnand %p6796_p6, %p6790_p3 }
  0x87   :  { %6800 = shalt.err (!%p6797_p7)
}
  0x88   :  { %74 = dma.hbm_to_vmem [thread:$0]  %s7712_s4, 128, %s72_s23, [#allocation9]  }
  0x89   :  { %s6801_s12 = scalar_lea.hbm %s7714_s6, 128 }
  0x8a   :  { %p6802_p8 = scmp.ne.s32.totalorder %s7714_s6, %s6801_s12  ;;  %p6805_p9 = scmp.lt.u32.totalorder %s6801_s12, %s7714_s6 }
  0x8c   :  { %p6807_p10 = pnand %p6805_p9, %p6802_p8 }
  0x8e   :  { %6810 = shalt.err (!%p6807_p10)
}
  0x8f   :  { %s6811_s13 = scalar_lea.vmem %s94_s18, 128  ;;  %p6816_p12 = scmp.lt.s32.totalorder %s94_s18, %s94_s18 }
  0x90   :  { %p6812_p11 = scmp.ne.s32.totalorder %s94_s18, %s6811_s13  ;;  %p6817_p13 = scmp.lt.s32.totalorder %s6811_s13, %s6811_s13 }
  0x92   :  { %p6818_p0 = por %p6817_p13, %p6816_p12 }
  0x94   :  { %p6819_p1 = pnand %p6818_p0, %p6812_p11 }
  0x96   :  { %6822 = shalt.err (!%p6819_p1)
}
  0x97   :  { %96 = dma.hbm_to_vmem [thread:$0]  %s7714_s6, 128, %s94_s18, [#allocation12]  }
  0x98   :  { %s6916_s19 = smov [#allocation16]   ;;  %s6917_s20 = smov [#allocation19]  }
  0x99   :  { %s113_s0 = sshll.u32 %s6916_s19, 4  ;;  %s135_s21 = sshll.u32 %s6917_s20, 4  ;;  %s114_s0 = int_to_ptr.vmem [resolvable:$true] %s113_s0  ;;  %s136_s21 = int_to_ptr.vmem [resolvable:$true] %s135_s21 }
  0x9a   :  { %s6823_s25 = scalar_lea.hbm %s7716_s8, 128 }
  0x9b   :  { %p6824_p2 = scmp.ne.s32.totalorder %s7716_s8, %s6823_s25  ;;  %p6827_p3 = scmp.lt.u32.totalorder %s6823_s25, %s7716_s8 }
  0x9d   :  { %p6829_p4 = pnand %p6827_p3, %p6824_p2 }
  0x9f   :  { %6832 = shalt.err (!%p6829_p4)
}
  0xa0   :  { %s6833_s6 = scalar_lea.vmem %s114_s0, 128  ;;  %p6838_p6 = scmp.lt.s32.totalorder %s114_s0, %s114_s0 }
  0xa1   :  { %p6834_p5 = scmp.ne.s32.totalorder %s114_s0, %s6833_s6  ;;  %p6839_p7 = scmp.lt.s32.totalorder %s6833_s6, %s6833_s6 }
  0xa3   :  { %p6840_p8 = por %p6839_p7, %p6838_p6 }
  0xa5   :  { %p6841_p9 = pnand %p6840_p8, %p6834_p5 }
  0xa7   :  { %6844 = shalt.err (!%p6841_p9)
}
  0xa8   :  { %116 = dma.hbm_to_vmem [thread:$0]  %s7716_s8, 128, %s114_s0, [#allocation15]  }
  0xa9   :  { %s6845_s24 = scalar_lea.hbm %s7718_s10, 16 }
  0xaa   :  { %p6846_p10 = scmp.ne.s32.totalorder %s7718_s10, %s6845_s24  ;;  %p6849_p11 = scmp.lt.u32.totalorder %s6845_s24, %s7718_s10 }
  0xac   :  { %p6851_p12 = pnand %p6849_p11, %p6846_p10 }
  0xae   :  { %6854 = shalt.err (!%p6851_p12)
}
  0xaf   :  { %s6855_s14 = scalar_lea.vmem %s136_s21, 16  ;;  %s6859_s16 = scalar_lea.vmem %s136_s21, 32 }
  0xb0   :  { %p6856_p13 = scmp.ne.s32.totalorder %s136_s21, %s6855_s14  ;;  %p6860_p0 = scmp.lt.s32.totalorder %s136_s21, %s136_s21 }
  0xb1   :  { %p6861_p1 = scmp.lt.s32.totalorder %s6859_s16, %s6855_s14 }
  0xb3   :  { %p6862_p2 = por %p6861_p1, %p6860_p0 }
  0xb5   :  { %p6863_p3 = pnand %p6862_p2, %p6856_p13 }
  0xb7   :  { %6866 = shalt.err (!%p6863_p3)
}
  0xb8   :  { %138 = dma.hbm_to_vmem [thread:$0]  %s7718_s10, 16, %s136_s21, [#allocation18]  }
  0xb9   :  { %6889 = dma.done.wait [#allocation3], 128  }
  0xba   :  { %6890 = vsyncadd [#allocation3], 4294967168 }
  0xbb   :  { %6891 = dma.done.wait [#allocation6], 2176  }
  0xbc   :  { %6892 = vsyncadd [#allocation6], 4294965120 }
  0xbd   :  { %6893 = dma.done.wait [#allocation9], 256  }
  0xbe   :  { %6894 = vsyncadd [#allocation9], 4294967040 }
  0xbf   :  { %6895 = dma.done.wait [#allocation12], 65664  }
  0xc0   :  { %6896 = vsyncadd [#allocation12], 4294901632 }
  0xc1   :  { %6897 = dma.done.wait [#allocation15], 256  }
  0xc2   :  { %6898 = vsyncadd [#allocation15], 4294967040 }
  0xc3   :  { %6899 = dma.done.wait [#allocation18], 8208  }
  0xc4   :  { %6900 = vsyncadd [#allocation18], 4294959088  ;;  %v6918_v0 = vmov 0   ;;  %v175_v1 = vld [vmem:[#allocation5] sm:$0xff]  ;;  %v176_v3 = vld [vmem:[#allocation5 + $0x8] sm:$0xff]  ;;  %vm313_vm0 = vcmask 261120  }
  0xc5   :  { %349 = vmatprep.mubr.bf16.mxu0 %v6918_v0  ;;  %390 = vmatprep.mubr.bf16.mxu1 %v6918_v0  ;;  %v179_v2 = vld [vmem:[#allocation5 + $0x20] sm:$0xff]  ;;  %v180_v5 = vld [vmem:[#allocation5 + $0x28] sm:$0xff]  ;;  %v177_v15 = vld [vmem:[#allocation5 + $0x10] sm:$0xff]  ;;  %s6920_s10 = smov [#allocation20]  }
  0xc6   :  { %v5767_v4 = vcombine.high %v175_v1, %v179_v2  ;;  %v5766_v6 = vcombine.low %v175_v1, %v179_v2  ;;  %v183_v7 = vld [vmem:[#allocation5 + $0x40] sm:$0xff]  ;;  %v5769_v9 = vcombine.high %v176_v3, %v180_v5  ;;  %v5768_v10 = vcombine.low %v176_v3, %v180_v5  ;;  %v184_v12 = vld [vmem:[#allocation5 + $0x48] sm:$0xff]  ;;  %v181_v16 = vld [vmem:[#allocation5 + $0x30] sm:$0xff]  ;;  %s5752_s3 = sshll.u32 %s6920_s10, 4  ;;  %s5753_s3 = int_to_ptr.vmem [resolvable:$true] %s5752_s3 }
  0xc7   :  { %v187_v8 = vld [vmem:[#allocation5 + $0x60] sm:$0xff]  ;;  %v188_v13 = vld [vmem:[#allocation5 + $0x68] sm:$0xff]  ;;  %v178_v17 = vld [vmem:[#allocation5 + $0x18] sm:$0xff]  ;;  %v5771_v23 = vcombine.high %v177_v15, %v181_v16  ;;  %v5770_v29 = vcombine.low %v177_v15, %v181_v16  ;;  %s6867_s13 = scalar_lea.vmem %s5753_s3, 128  ;;  %p6872_p5 = scmp.lt.s32.totalorder %s5753_s3, %s5753_s3 }
  0xc8   :  { %v5775_v11 = vcombine.high %v183_v7, %v187_v8  ;;  %317 = vmatprep.subr.bf16.mxu0 %v5767_v4  ;;  %v5777_v14 = vcombine.high %v184_v12, %v188_v13  ;;  %358 = vmatprep.subr.bf16.mxu1 %v5769_v9  ;;  %v5774_v18 = vcombine.low %v183_v7, %v187_v8  ;;  %v173_v19 = vld [vmem:[#allocation2] sm:$0xff]  ;;  %v185_v21 = vld [vmem:[#allocation5 + $0x50] sm:$0xff]  ;;  %v884_v37 = vld [vmem:[#allocation11 + $0x8] sm:$0xff]  ;;  %p6868_p4 = scmp.ne.s32.totalorder %s5753_s3, %s6867_s13  ;;  %p6873_p6 = scmp.lt.s32.totalorder %s6867_s13, %s6867_s13 }
  0xc9   :  { %318 = vmatpush1.bf16.msra.mxu0 %v5766_v6  ;;  %v182_v20 = vld [vmem:[#allocation5 + $0x38] sm:$0xff]  ;;  %359 = vmatpush1.bf16.msra.mxu1 %v5768_v10  ;;  %v5776_v22 = vcombine.low %v184_v12, %v188_v13  ;;  %v189_v24 = vld [vmem:[#allocation5 + $0x70] sm:$0xff]  ;;  %v174_v28 = vpack.c.bf16 %v173_v19, %v173_v19  ;;  %v888_v39 = vld [vmem:[#allocation11 + $0x28] sm:$0xff] }
  0xca   :  { %319 = vmatprep.subr.bf16.mxu0 %v5775_v11  ;;  %v186_v25 = vld [vmem:[#allocation5 + $0x58] sm:$0xff]  ;;  %360 = vmatprep.subr.bf16.mxu1 %v5777_v14  ;;  %v5773_v27 = vcombine.high %v178_v17, %v182_v20  ;;  %v5772_v30 = vcombine.low %v178_v17, %v182_v20  ;;  %v5779_v31 = vcombine.high %v185_v21, %v189_v24  ;;  %v892_v45 = vld [vmem:[#allocation11 + $0x48] sm:$0xff]  ;;  %p6874_p7 = por %p6873_p6, %p6872_p5 }
  0xcb   :  { %v190_v26 = vld [vmem:[#allocation5 + $0x78] sm:$0xff]  ;;  %v5778_v33 = vcombine.low %v185_v21, %v189_v24  ;;  %v5788_v41 = vcombine.low %v884_v37, %v888_v39  ;;  %v5789_v42 = vcombine.high %v884_v37, %v888_v39  ;;  %v896_v47 = vld [vmem:[#allocation11 + $0x68] sm:$0xff] }
  0xcc   :  { %v5781_v32 = vcombine.high %v186_v25, %v190_v26  ;;  %v5780_v34 = vcombine.low %v186_v25, %v190_v26  ;;  %v883_v35 = vld [vmem:[#allocation11] sm:$0xff]  ;;  %v5796_v49 = vcombine.low %v892_v45, %v896_v47  ;;  %v5797_v50 = vcombine.high %v892_v45, %v896_v47  ;;  %v900_v53 = vld [vmem:[#allocation11 + $0x88] sm:$0xff]  ;;  %p6875_p8 = pnand %p6874_p7, %p6868_p4 }
  0xcd   :  { %320 = vmatpush1.bf16.msra.mxu0 %v5774_v18  ;;  %361 = vmatpush1.bf16.msra.mxu1 %v5776_v22  ;;  %v887_v36 = vld [vmem:[#allocation11 + $0x20] sm:$0xff]  ;;  %v904_v55 = vld [vmem:[#allocation11 + $0xa8] sm:$0xff] }
  0xce   :  { %399 = vmatprep.subr.bf16.mxu0 %v5771_v23  ;;  %440 = vmatprep.subr.bf16.mxu1 %v5773_v27  ;;  %v5787_v38 = vcombine.high %v883_v35, %v887_v36  ;;  %v5786_v40 = vcombine.low %v883_v35, %v887_v36  ;;  %v891_v43 = vld [vmem:[#allocation11 + $0x40] sm:$0xff]  ;;  %v5804_v57 = vcombine.low %v900_v53, %v904_v55  ;;  %v908_v61 = vld [vmem:[#allocation11 + $0xc8] sm:$0xff] }
  0xcf   :  { %v895_v44 = vld [vmem:[#allocation11 + $0x60] sm:$0xff]  ;;  %v5805_v58 = vcombine.high %v900_v53, %v904_v55  ;;  %v912_v63 = vld [vmem:[#allocation11 + $0xe8] sm:$0xff] }
  0xd0   :  { %5782 = vmatmul.mubr.msk.bf16.vlgmr.msra.gmra.mrb[0].mxu0 %vm313_vm0, %v174_v28  ;;  %5783 = vmatmul.mubr.msk.bf16.vlgmr.msra.gmra.mrb[0].mxu1 %vm313_vm0, %v174_v28  ;;  %v5795_v46 = vcombine.high %v891_v43, %v895_v44  ;;  %v5794_v48 = vcombine.low %v891_v43, %v895_v44  ;;  %v899_v51 = vld [vmem:[#allocation11 + $0x80] sm:$0xff]  ;;  %v5812_v1 = vcombine.low %v908_v61, %v912_v63  ;;  %v916_v5 = vld [vmem:[#allocation11 + $0x108] sm:$0xff] }
  0xd1   :  { %400 = vmatpush1.bf16.msra.mxu0 %v5770_v29  ;;  %441 = vmatpush1.bf16.msra.mxu1 %v5772_v30  ;;  %v903_v52 = vld [vmem:[#allocation11 + $0xa0] sm:$0xff]  ;;  %v5813_v2 = vcombine.high %v908_v61, %v912_v63  ;;  %v920_v7 = vld [vmem:[#allocation11 + $0x128] sm:$0xff] }
  0xd2   :  { %401 = vmatprep.subr.bf16.mxu0 %v5779_v31  ;;  %442 = vmatprep.subr.bf16.mxu1 %v5781_v32  ;;  %v5803_v54 = vcombine.high %v899_v51, %v903_v52  ;;  %v5802_v56 = vcombine.low %v899_v51, %v903_v52  ;;  %v907_v59 = vld [vmem:[#allocation11 + $0xc0] sm:$0xff]  ;;  %v5820_v9 = vcombine.low %v916_v5, %v920_v7  ;;  %v924_v13 = vld [vmem:[#allocation11 + $0x148] sm:$0xff] }
  0xd3   :  { %431 = vmatprep.mubr.bf16.mxu0 %v6918_v0  ;;  %472 = vmatprep.mubr.bf16.mxu1 %v6918_v0  ;;  %v911_v60 = vld [vmem:[#allocation11 + $0xe0] sm:$0xff]  ;;  %v5821_v10 = vcombine.high %v916_v5, %v920_v7  ;;  %v928_v15 = vld [vmem:[#allocation11 + $0x168] sm:$0xff] }
  0xd4   :  { %v5811_v62 = vcombine.high %v907_v59, %v911_v60  ;;  %v5810_v0 = vcombine.low %v907_v59, %v911_v60  ;;  %v915_v3 = vld [vmem:[#allocation11 + $0x100] sm:$0xff]  ;;  %v5828_v17 = vcombine.low %v924_v13, %v928_v15  ;;  %v5829_v18 = vcombine.high %v924_v13, %v928_v15  ;;  %v932_v21 = vld [vmem:[#allocation11 + $0x188] sm:$0xff] }
  0xd5   :  { %402 = vmatpush1.bf16.msra.mxu0 %v5778_v33  ;;  %443 = vmatpush1.bf16.msra.mxu1 %v5780_v34  ;;  %v919_v4 = vld [vmem:[#allocation11 + $0x120] sm:$0xff]  ;;  %v936_v23 = vld [vmem:[#allocation11 + $0x1a8] sm:$0xff] }
  0xd6   :  { %3997 = vmatprep.subr.bf16.mxu0 %v5787_v38  ;;  %4161 = vmatprep.subr.bf16.mxu1 %v5789_v42  ;;  %v5819_v6 = vcombine.high %v915_v3, %v919_v4  ;;  %v5818_v8 = vcombine.low %v915_v3, %v919_v4  ;;  %v923_v11 = vld [vmem:[#allocation11 + $0x140] sm:$0xff]  ;;  %v5836_v25 = vcombine.low %v932_v21, %v936_v23  ;;  %v940_v29 = vld [vmem:[#allocation11 + $0x1c8] sm:$0xff] }
  0xd7   :  { %v927_v12 = vld [vmem:[#allocation11 + $0x160] sm:$0xff]  ;;  %v5837_v26 = vcombine.high %v932_v21, %v936_v23  ;;  %v944_v31 = vld [vmem:[#allocation11 + $0x1e8] sm:$0xff] }
  0xd8   :  { %5784 = vmatmul.mubr.msk.bf16.vlgmr.msra.gmra.mrb[4].mxu0 %vm313_vm0, %v174_v28  ;;  %5785 = vmatmul.mubr.msk.bf16.vlgmr.msra.gmra.mrb[4].mxu1 %vm313_vm0, %v174_v28  ;;  %v5827_v14 = vcombine.high %v923_v11, %v927_v12  ;;  %v5826_v16 = vcombine.low %v923_v11, %v927_v12  ;;  %v931_v19 = vld [vmem:[#allocation11 + $0x180] sm:$0xff]  ;;  %v5844_v33 = vcombine.low %v940_v29, %v944_v31  ;;  %v948_v37 = vld [vmem:[#allocation11 + $0x208] sm:$0xff] }
  0xd9   :  { %3998 = vmatpush1.bf16.msra.mxu0 %v5786_v40  ;;  %4162 = vmatpush1.bf16.msra.mxu1 %v5788_v41  ;;  %v935_v20 = vld [vmem:[#allocation11 + $0x1a0] sm:$0xff]  ;;  %v5845_v34 = vcombine.high %v940_v29, %v944_v31  ;;  %v952_v39 = vld [vmem:[#allocation11 + $0x228] sm:$0xff] }
  0xda   :  { %3999 = vmatprep.subr.bf16.mxu0 %v5795_v46  ;;  %4163 = vmatprep.subr.bf16.mxu1 %v5797_v50  ;;  %v5835_v22 = vcombine.high %v931_v19, %v935_v20  ;;  %v5834_v24 = vcombine.low %v931_v19, %v935_v20  ;;  %v939_v27 = vld [vmem:[#allocation11 + $0x1c0] sm:$0xff]  ;;  %v5852_v41 = vcombine.low %v948_v37, %v952_v39  ;;  %v956_v45 = vld [vmem:[#allocation11 + $0x248] sm:$0xff] }
  0xdb   :  { %v943_v28 = vld [vmem:[#allocation11 + $0x1e0] sm:$0xff]  ;;  %v5853_v42 = vcombine.high %v948_v37, %v952_v39  ;;  %v960_v47 = vld [vmem:[#allocation11 + $0x268] sm:$0xff] }
  0xdc   :  { %v5843_v30 = vcombine.high %v939_v27, %v943_v28  ;;  %v5842_v32 = vcombine.low %v939_v27, %v943_v28  ;;  %v947_v35 = vld [vmem:[#allocation11 + $0x200] sm:$0xff]  ;;  %v5861_v50 = vcombine.high %v956_v45, %v960_v47  ;;  %v964_v53 = vld [vmem:[#allocation11 + $0x288] sm:$0xff] }
  0xdd   :  { %4000 = vmatpush1.bf16.msra.mxu0 %v5794_v48  ;;  %4164 = vmatpush1.bf16.msra.mxu1 %v5796_v49  ;;  %v951_v36 = vld [vmem:[#allocation11 + $0x220] sm:$0xff]  ;;  %v5860_v49 = vcombine.low %v956_v45, %v960_v47  ;;  %v968_v55 = vld [vmem:[#allocation11 + $0x2a8] sm:$0xff] }
  0xde   :  { %4001 = vmatprep.subr.bf16.mxu0 %v5803_v54  ;;  %4165 = vmatprep.subr.bf16.mxu1 %v5805_v58  ;;  %v5851_v38 = vcombine.high %v947_v35, %v951_v36  ;;  %v5850_v40 = vcombine.low %v947_v35, %v951_v36  ;;  %v955_v43 = vld [vmem:[#allocation11 + $0x240] sm:$0xff]  ;;  %v5869_v58 = vcombine.high %v964_v53, %v968_v55  ;;  %v972_v61 = vld [vmem:[#allocation11 + $0x2c8] sm:$0xff] }
  0xdf   :  { %v959_v44 = vld [vmem:[#allocation11 + $0x260] sm:$0xff]  ;;  %v976_v63 = vld [vmem:[#allocation11 + $0x2e8] sm:$0xff] }
  0xe0   :  { %v5859_v46 = vcombine.high %v955_v43, %v959_v44  ;;  %v5858_v48 = vcombine.low %v955_v43, %v959_v44  ;;  %v963_v51 = vld [vmem:[#allocation11 + $0x280] sm:$0xff]  ;;  %v980_v5 = vld [vmem:[#allocation11 + $0x308] sm:$0xff]  ;;  %v193_v43 = vlaneseq }
  0xe1   :  { %4002 = vmatpush1.bf16.msra.mxu0 %v5802_v56  ;;  %4166 = vmatpush1.bf16.msra.mxu1 %v5804_v57  ;;  %v967_v52 = vld [vmem:[#allocation11 + $0x2a0] sm:$0xff]  ;;  %v5868_v57 = vcombine.low %v964_v53, %v968_v55  ;;  %v984_v7 = vld [vmem:[#allocation11 + $0x328] sm:$0xff] }
  0xe2   :  { %4003 = vmatprep.subr.bf16.mxu0 %v5811_v62  ;;  %4167 = vmatprep.subr.bf16.mxu1 %v5813_v2  ;;  %v5867_v54 = vcombine.high %v963_v51, %v967_v52  ;;  %v5866_v56 = vcombine.low %v963_v51, %v967_v52  ;;  %v971_v59 = vld [vmem:[#allocation11 + $0x2c0] sm:$0xff]  ;;  %v5877_v2 = vcombine.high %v972_v61, %v976_v63  ;;  %v988_v13 = vld [vmem:[#allocation11 + $0x348] sm:$0xff]  ;;  %v7139_v44 = vshrl.u32 %v193_v43, 7 }
  0xe3   :  { %v975_v60 = vld [vmem:[#allocation11 + $0x2e0] sm:$0xff]  ;;  %v992_v15 = vld [vmem:[#allocation11 + $0x368] sm:$0xff] }
  0xe4   :  { %v5875_v62 = vcombine.high %v971_v59, %v975_v60  ;;  %v979_v3 = vld [vmem:[#allocation11 + $0x300] sm:$0xff]  ;;  %v996_v21 = vld [vmem:[#allocation11 + $0x388] sm:$0xff]  ;;  %v7142_v45 = vsub.s32 0, %v7139_v44  ;;  %v7147_v47 = vsub.s32 2, %v7139_v44  ;;  %v7167_v55 = vsub.s32 6, %v7139_v44 }
  0xe5   :  { %4004 = vmatpush1.bf16.msra.mxu0 %v5810_v0  ;;  %4168 = vmatpush1.bf16.msra.mxu1 %v5812_v1  ;;  %v5874_v0 = vcombine.low %v971_v59, %v975_v60  ;;  %v5876_v1 = vcombine.low %v972_v61, %v976_v63  ;;  %v983_v4 = vld [vmem:[#allocation11 + $0x320] sm:$0xff]  ;;  %v1000_v23 = vld [vmem:[#allocation11 + $0x3a8] sm:$0xff]  ;;  %v6919_v60 = vmov 1966171168  }
  0xe6   :  { %4005 = vmatprep.subr.bf16.mxu0 %v5819_v6  ;;  %4169 = vmatprep.subr.bf16.mxu1 %v5821_v10  ;;  %v5883_v6 = vcombine.high %v979_v3, %v983_v4  ;;  %v5885_v10 = vcombine.high %v980_v5, %v984_v7  ;;  %v987_v11 = vld [vmem:[#allocation11 + $0x340] sm:$0xff]  ;;  %v5901_v27 = vcombine.high %v996_v21, %v1000_v23  ;;  %v1004_v28 = vld [vmem:[#allocation11 + $0x3c8] sm:$0xff]  ;;  %v7175_v61 = vunpack.c.l.s4 %v6919_v60 }
  0xe7   :  { %v991_v12 = vld [vmem:[#allocation11 + $0x360] sm:$0xff]  ;;  %v1008_v29 = vld [vmem:[#allocation11 + $0x3e8] sm:$0xff] }
  0xe8   :  { %v995_v19 = vld [vmem:[#allocation11 + $0x380] sm:$0xff]  ;;  %v7127_v37 = vld [vmem:[#allocation11 + $0x408] sm:$0xff] }
  0xe9   :  { %4006 = vmatpush1.bf16.msra.mxu0 %v5818_v8  ;;  %4170 = vmatpush1.bf16.msra.mxu1 %v5820_v9  ;;  %v5882_v8 = vcombine.low %v979_v3, %v983_v4  ;;  %v5884_v9 = vcombine.low %v980_v5, %v984_v7  ;;  %v999_v20 = vld [vmem:[#allocation11 + $0x3a0] sm:$0xff]  ;;  %v7131_v39 = vld [vmem:[#allocation11 + $0x428] sm:$0xff] }
  0xea   :  { %4007 = vmatprep.subr.bf16.mxu0 %v5827_v14  ;;  %4171 = vmatprep.subr.bf16.mxu1 %v5829_v18  ;;  %v5891_v14 = vcombine.high %v987_v11, %v991_v12  ;;  %v5893_v18 = vcombine.high %v988_v13, %v992_v15  ;;  %v7123_v35 = vld [vmem:[#allocation11 + $0x400] sm:$0xff] }
  0xeb   :  { %v7125_v36 = vld [vmem:[#allocation11 + $0x420] sm:$0xff] }
  0xed   :  { %4008 = vmatpush1.bf16.msra.mxu0 %v5826_v16  ;;  %4172 = vmatpush1.bf16.msra.mxu1 %v5828_v17  ;;  %v5890_v16 = vcombine.low %v987_v11, %v991_v12  ;;  %v5892_v17 = vcombine.low %v988_v13, %v992_v15 }
  0xee   :  { %4009 = vmatprep.subr.bf16.mxu0 %v5835_v22  ;;  %4173 = vmatprep.subr.bf16.mxu1 %v5837_v26  ;;  %v5899_v22 = vcombine.high %v995_v19, %v999_v20  ;;  %v5898_v26 = vcombine.low %v995_v19, %v999_v20 }
  0xf1   :  { %4010 = vmatpush1.bf16.msra.mxu0 %v5834_v24  ;;  %4174 = vmatpush1.bf16.msra.mxu1 %v5836_v25  ;;  %v1003_v24 = vld [vmem:[#allocation11 + $0x3c0] sm:$0xff] }
  0xf2   :  { %4011 = vmatprep.subr.bf16.mxu0 %v5843_v30  ;;  %4175 = vmatprep.subr.bf16.mxu1 %v5845_v34  ;;  %v1007_v25 = vld [vmem:[#allocation11 + $0x3e0] sm:$0xff]  ;;  %v5900_v30 = vcombine.low %v996_v21, %v1000_v23  ;;  %v5908_v34 = vcombine.low %v1004_v28, %v1008_v29 }
  0xf3   :  { %v5907_v31 = vcombine.high %v1003_v24, %v1007_v25 }
  0xf5   :  { %4012 = vmatpush1.bf16.msra.mxu0 %v5842_v32  ;;  %4176 = vmatpush1.bf16.msra.mxu1 %v5844_v33  ;;  %v5909_v32 = vcombine.high %v1004_v28, %v1008_v29  ;;  %v5906_v33 = vcombine.low %v1003_v24, %v1007_v25 }
  0xf6   :  { %4013 = vmatprep.subr.bf16.mxu0 %v5851_v38  ;;  %4177 = vmatprep.subr.bf16.mxu1 %v5853_v42  ;;  %v5915_v38 = vcombine.high %v7123_v35, %v7125_v36  ;;  %v5917_v42 = vcombine.high %v7127_v37, %v7131_v39 }
  0xf9   :  { %4014 = vmatpush1.bf16.msra.mxu0 %v5850_v40  ;;  %4178 = vmatpush1.bf16.msra.mxu1 %v5852_v41  ;;  %v5914_v40 = vcombine.low %v7123_v35, %v7125_v36  ;;  %v5916_v41 = vcombine.low %v7127_v37, %v7131_v39 }
  0xfa   :  { %4015 = vmatprep.subr.bf16.mxu0 %v5859_v46  ;;  %4179 = vmatprep.subr.bf16.mxu1 %v5861_v50  ;;  %v7144_v46 = vld [vmem:[#allocation7] sm:$0xff] }
  0xfb   :  { %v196_v50 = vrot.slane %v7144_v46, %v7142_v45  ;;  %v204_v51 = vrot.slane %v7144_v46, %v7147_v47 }
  0xfd   :  { %4016 = vmatpush1.bf16.msra.mxu0 %v5858_v48  ;;  %4180 = vmatpush1.bf16.msra.mxu1 %v5860_v49  ;;  %v7150_v48 = vsub.s32 1, %v7139_v44  ;;  %v7153_v49 = vsub.s32 3, %v7139_v44 }
  0xfe   :  { %4017 = vmatprep.subr.bf16.mxu0 %v5867_v54  ;;  %4181 = vmatprep.subr.bf16.mxu1 %v5869_v58  ;;  %v7164_v54 = vsub.s32 4, %v7139_v44  ;;  %v7173_v58 = vsub.s32 7, %v7139_v44 }
  0xff   :  { %v200_v52 = vrot.slane %v7144_v46, %v7150_v48  ;;  %v208_v53 = vrot.slane %v7144_v46, %v7153_v49 }
 0x101   :  { %4018 = vmatpush1.bf16.msra.mxu0 %v5866_v56  ;;  %4182 = vmatpush1.bf16.msra.mxu1 %v5868_v57  ;;  %v7170_v57 = vsub.s32 5, %v7139_v44 }
 0x102   :  { %4019 = vmatprep.subr.bf16.mxu0 %v5875_v62  ;;  %4183 = vmatprep.subr.bf16.mxu1 %v5877_v2 }
 0x103   :  { %v216_v13 = vrot.slane %v7144_v46, %v7170_v57 }
 0x105   :  { %4020 = vmatpush1.bf16.msra.mxu0 %v5874_v0  ;;  %4184 = vmatpush1.bf16.msra.mxu1 %v5876_v1 }
 0x106   :  { %4021 = vmatprep.subr.bf16.mxu0 %v5883_v6  ;;  %4185 = vmatprep.subr.bf16.mxu1 %v5885_v10 }
 0x109   :  { %4022 = vmatpush1.bf16.msra.mxu0 %v5882_v8  ;;  %4186 = vmatpush1.bf16.msra.mxu1 %v5884_v9  ;;  %v212_v8 = vrot.slane %v7144_v46, %v7164_v54  ;;  %v220_v9 = vrot.slane %v7144_v46, %v7167_v55 }
 0x10a   :  { %4023 = vmatprep.subr.bf16.mxu0 %v5891_v14  ;;  %4187 = vmatprep.subr.bf16.mxu1 %v5893_v18  ;;  %v224_v14 = vrot.slane %v7144_v46, %v7173_v58 }
 0x10d   :  { %4024 = vmatpush1.bf16.msra.mxu0 %v5890_v16  ;;  %4188 = vmatpush1.bf16.msra.mxu1 %v5892_v17  ;;  %v665_v17 = vunpack.c.0.s8 %v7175_v61 }
 0x10e   :  { %4025 = vmatprep.subr.bf16.mxu0 %v5899_v22  ;;  %4189 = vmatprep.subr.bf16.mxu1 %v5901_v27 }
 0x111   :  { %4026 = vmatpush1.bf16.msra.mxu0 %v5898_v26  ;;  %4190 = vmatpush1.bf16.msra.mxu1 %v5900_v30 }
 0x112   :  { %4027 = vmatprep.subr.bf16.mxu0 %v5907_v31  ;;  %4191 = vmatprep.subr.bf16.mxu1 %v5909_v32 }
 0x115   :  { %4028 = vmatpush1.bf16.msra.mxu0 %v5906_v33  ;;  %4192 = vmatpush1.bf16.msra.mxu1 %v5908_v34 }
 0x116   :  { %4038 = vmatprep.subr.bf16.mxu0 %v5915_v38  ;;  %4202 = vmatprep.subr.bf16.mxu1 %v5917_v42 }
 0x1a3   :  { %v351_v56 = vpop.f32.mrb[0].mxu0  ;;  %v392_v62 = vpop.f32.mrb[0].mxu1 }
 0x1a4   :  { %v352_v59 = vadd.f32 %v351_v56, %v196_v50  ;;  %v353_v63 = vpop.f32.mrb[1].mxu0  ;;  %v393_v0 = vadd.f32 %v392_v62, %v204_v51  ;;  %v394_v2 = vpop.f32.mrb[1].mxu1 }
 0x1a5   :  { %v354_v1 = vadd.f32 %v353_v63, %v200_v52  ;;  %v355_v3 = vpop.f32.mrb[2].mxu0  ;;  %v395_v5 = vadd.f32 %v394_v2, %v208_v53  ;;  %v396_v6 = vpop.f32.mrb[2].mxu1 }
 0x1a6   :  { %v7177_v4 = vmax.f32 %v352_v59, 0.0  ;;  %v356_v7 = vpop.f32.mrb[3].mxu0  ;;  %v7183_v10 = vmax.f32 %v393_v0, 0.0  ;;  %v397_v12 = vpop.f32.mrb[3].mxu1 }
 0x1a7   :  { %v7185_v11 = vmax.f32 %v354_v1, 0.0  ;;  %v7195_v18 = vmax.f32 %v395_v5, 0.0 }
 0x1a8   :  { %v491_v15 = vrot.slane %v7177_v4, 4  ;;  %v539_v16 = vmul.f32 %v7177_v4, %v7177_v4  ;;  %v503_v19 = vrot.slane %v7183_v10, 4  ;;  %v541_v20 = vmul.f32 %v7183_v10, %v7183_v10 }
 0x1a9   :  { %v497_v21 = vrot.slane %v7185_v11, 4  ;;  %v540_v22 = vmul.f32 %v7185_v11, %v7185_v11  ;;  %v509_v25 = vrot.slane %v7195_v18, 4  ;;  %v542_v26 = vmul.f32 %v7195_v18, %v7195_v18 }
 0x1aa   :  { %v492_v23 = vadd.f32 %v491_v15, %v7177_v4  ;;  %v547_v24 = vrot.slane %v539_v16, 4  ;;  %v504_v27 = vadd.f32 %v503_v19, %v7183_v10  ;;  %v559_v28 = vrot.slane %v541_v20, 4 }
 0x1ab   :  { %v498_v29 = vadd.f32 %v497_v21, %v7185_v11  ;;  %v553_v30 = vrot.slane %v540_v22, 4  ;;  %v433_v31 = vpop.f32.mrb[4].mxu0  ;;  %v510_v34 = vadd.f32 %v509_v25, %v7195_v18  ;;  %v565_v38 = vrot.slane %v542_v26, 4  ;;  %v474_v42 = vpop.f32.mrb[4].mxu1 }
 0x1ac   :  { %v493_v32 = vrot.slane %v492_v23, 2  ;;  %v548_v33 = vadd.f32 %v547_v24, %v539_v16  ;;  %v435_v43 = vpop.f32.mrb[5].mxu0  ;;  %v505_v50 = vrot.slane %v504_v27, 2  ;;  %v560_v51 = vadd.f32 %v559_v28, %v541_v20  ;;  %v476_v56 = vpop.f32.mrb[5].mxu1 }
 0x1ad   :  { %v499_v52 = vrot.slane %v498_v29, 2  ;;  %v554_v53 = vadd.f32 %v553_v30, %v540_v22  ;;  %v437_v59 = vpop.f32.mrb[6].mxu0  ;;  %v511_v63 = vrot.slane %v510_v34, 2  ;;  %v566_v0 = vadd.f32 %v565_v38, %v542_v26  ;;  %v478_v1 = vpop.f32.mrb[6].mxu1 }
 0x1ae   :  { %v494_v60 = vadd.f32 %v493_v32, %v492_v23  ;;  %v549_v62 = vrot.slane %v548_v33, 2  ;;  %v438_v2 = vpop.f32.mrb[7].mxu0  ;;  %v506_v3 = vadd.f32 %v505_v50, %v504_v27  ;;  %v561_v5 = vrot.slane %v560_v51, 2  ;;  %v479_v12 = vpop.f32.mrb[7].mxu1 }
 0x1af   :  { %v500_v6 = vadd.f32 %v499_v52, %v498_v29  ;;  %v555_v7 = vrot.slane %v554_v53, 2  ;;  %v512_v19 = vadd.f32 %v511_v63, %v510_v34  ;;  %v567_v21 = vrot.slane %v566_v0, 2 }
 0x1b0   :  { %v495_v15 = vrot.slane %v494_v60, 1  ;;  %v550_v16 = vadd.f32 %v549_v62, %v548_v33  ;;  %v507_v20 = vrot.slane %v506_v3, 1  ;;  %v562_v24 = vadd.f32 %v561_v5, %v560_v51 }
 0x1b1   :  { %v501_v22 = vrot.slane %v500_v6, 1  ;;  %v556_v25 = vadd.f32 %v555_v7, %v554_v53  ;;  %v513_v30 = vrot.slane %v512_v19, 1  ;;  %v568_v32 = vadd.f32 %v567_v21, %v566_v0 }
 0x1b2   :  { %v496_v28 = vadd.f32 %v495_v15, %v494_v60  ;;  %v551_v23 = vrot.slane %v550_v16, 1  ;;  %v508_v26 = vadd.f32 %v507_v20, %v506_v3  ;;  %v563_v38 = vrot.slane %v562_v24, 1 }
 0x1b3   :  { %v502_v59 = vadd.f32 %v501_v22, %v500_v6  ;;  %v557_v27 = vrot.slane %v556_v25, 1  ;;  %v514_v52 = vadd.f32 %v513_v30, %v512_v19  ;;  %v569_v1 = vrot.slane %v568_v32, 1 }
 0x1b4   :  { %v552_v50 = vadd.f32 %v551_v23, %v550_v16  ;;  %v7210_v29 = vmul.f32 0.125, %v496_v28  ;;  %v564_v33 = vadd.f32 %v563_v38, %v562_v24  ;;  %v7212_v34 = vmul.f32 0.125, %v508_v26 }
 0x1b5   :  { %v558_v62 = vadd.f32 %v557_v27, %v556_v25  ;;  %v7214_v51 = vmul.f32 0.125, %v502_v59  ;;  %v570_v63 = vadd.f32 %v569_v1, %v568_v32  ;;  %v7218_v0 = vmul.f32 0.125, %v514_v52 }
 0x1b6   :  { %v603_v53 = vmul.f32 0.125, %v552_v50  ;;  %v611_v60 = vmul.f32 %v7210_v29, %v7210_v29  ;;  %v605_v2 = vmul.f32 0.125, %v564_v33  ;;  %v613_v3 = vmul.f32 %v7212_v34, %v7212_v34 }
 0x1b7   :  { %v604_v5 = vmul.f32 0.125, %v558_v62  ;;  %v612_v6 = vmul.f32 %v7214_v51, %v7214_v51  ;;  %v606_v12 = vmul.f32 0.125, %v570_v63  ;;  %v614_v15 = vmul.f32 %v7218_v0, %v7218_v0 }
 0x1b8   :  { %v619_v7 = vsub.f32 %v603_v53, %v611_v60  ;;  %v434_v16 = vadd.f32 %v433_v31, %v212_v8  ;;  %v621_v19 = vsub.f32 %v605_v2, %v613_v3  ;;  %v475_v20 = vadd.f32 %v474_v42, %v220_v9 }
 0x1b9   :  { %v620_v21 = vsub.f32 %v604_v5, %v612_v6  ;;  %v436_v24 = vadd.f32 %v435_v43, %v216_v13  ;;  %v622_v25 = vsub.f32 %v606_v12, %v614_v15  ;;  %v477_v23 = vadd.f32 %v476_v56, %v224_v14 }
 0x1ba   :  { %v627_v22 = vmax.f32 %v619_v7, 0.0  ;;  %v7235_v28 = vmax.f32 %v434_v16, 0.0  ;;  %v629_v30 = vmax.f32 %v621_v19, 0.0  ;;  %v7240_v31 = vmax.f32 %v475_v20, 0.0 }
 0x1bb   :  { %v628_v8 = vmax.f32 %v620_v21, 0.0  ;;  %v7242_v32 = vmax.f32 %v436_v24, 0.0  ;;  %v630_v9 = vmax.f32 %v622_v25, 0.0  ;;  %v7256_v7 = vmax.f32 %v477_v23, 0.0 }
 0x1bc   :  { %v635_v26 = vadd.f32 1e-05, %v627_v22  ;;  %v515_v42 = vrot.slane %v7235_v28, 4  ;;  %v543_v13 = vmul.f32 %v7235_v28, %v7235_v28  ;;  %v637_v43 = vadd.f32 1e-05, %v629_v30 }
 0x1bd   :  { %v636_v38 = vadd.f32 1e-05, %v628_v8  ;;  %v527_v59 = vrot.slane %v7240_v31, 4  ;;  %v545_v46 = vmul.f32 %v7240_v31, %v7240_v31  ;;  %v638_v14 = vadd.f32 1e-05, %v630_v9 }
 0x1be   :  { %6589 = vrsqrt.f32 %v635_v26  ;;  %v516_v56 = vadd.f32 %v515_v42, %v7235_v28  ;;  %v571_v27 = vrot.slane %v543_v13, 4  ;;  %v521_v1 = vrot.slane %v7242_v32, 4 }
 0x1bf   :  { %6591 = vrsqrt.f32 %v637_v43  ;;  %v528_v50 = vadd.f32 %v527_v59, %v7240_v31  ;;  %v583_v52 = vrot.slane %v545_v46, 4  ;;  %v544_v53 = vmul.f32 %v7242_v32, %v7242_v32 }
 0x1c0   :  { %6593 = vrsqrt.f32 %v636_v38  ;;  %v517_v33 = vrot.slane %v516_v56, 2  ;;  %v572_v62 = vadd.f32 %v571_v27, %v543_v13  ;;  %v522_v2 = vadd.f32 %v521_v1, %v7242_v32 }
 0x1c1   :  { %6595 = vrsqrt.f32 %v638_v14  ;;  %v529_v60 = vrot.slane %v528_v50, 2  ;;  %v584_v63 = vadd.f32 %v583_v52, %v545_v46  ;;  %v577_v6 = vrot.slane %v544_v53, 4 }
 0x1c2   :  { %v518_v3 = vadd.f32 %v517_v33, %v516_v56  ;;  %v573_v5 = vrot.slane %v572_v62, 2  ;;  %v7261_v12 = vsub.s32 %v665_v17, %v7139_v44  ;;  %v523_v19 = vrot.slane %v522_v2, 2 }
 0x1c3   :  { %v530_v15 = vadd.f32 %v529_v60, %v528_v50  ;;  %v585_v16 = vrot.slane %v584_v63, 2  ;;  %v578_v24 = vadd.f32 %v577_v6, %v544_v53  ;;  %v533_v22 = vrot.slane %v7256_v7, 4 }
 0x1c4   :  { %v519_v21 = vrot.slane %v518_v3, 1  ;;  %v574_v20 = vadd.f32 %v573_v5, %v572_v62  ;;  %v524_v8 = vadd.f32 %v523_v19, %v522_v2  ;;  %v546_v23 = vmul.f32 %v7256_v7, %v7256_v7 }
 0x1c5   :  { %v531_v25 = vrot.slane %v530_v15, 1  ;;  %v586_v30 = vadd.f32 %v585_v16, %v584_v63  ;;  %v579_v42 = vrot.slane %v578_v24, 2  ;;  %v534_v44 = vadd.f32 %v533_v22, %v7256_v7 }
 0x1c6   :  { %v520_v26 = vadd.f32 %v519_v21, %v518_v3  ;;  %v575_v9 = vrot.slane %v574_v20, 1  ;;  %v525_v13 = vrot.slane %v524_v8, 1  ;;  %v589_v43 = vrot.slane %v546_v23, 4 }
 0x1c7   :  { %v532_v61 = vadd.f32 %v531_v25, %v530_v15  ;;  %v587_v17 = vrot.slane %v586_v30, 1  ;;  %v580_v14 = vadd.f32 %v579_v42, %v578_v24  ;;  %v535_v56 = vrot.slane %v534_v44, 2 }
 0x1c8   :  { %v6590_v38 = vpop.eup %6589  ;;  %v576_v59 = vadd.f32 %v575_v9, %v574_v20  ;;  %v7267_v46 = vmul.f32 0.125, %v520_v26  ;;  %v526_v1 = vadd.f32 %v525_v13, %v524_v8  ;;  %v590_v33 = vadd.f32 %v589_v43, %v546_v23 }
 0x1c9   :  { %v6592_v27 = vpop.eup %6591  ;;  %v588_v50 = vadd.f32 %v587_v17, %v586_v30  ;;  %v7269_v52 = vmul.f32 0.125, %v532_v61  ;;  %v581_v63 = vrot.slane %v580_v14, 1  ;;  %v536_v2 = vadd.f32 %v535_v56, %v534_v44 }
 0x1ca   :  { %v6594_v62 = vpop.eup %6593  ;;  %v607_v53 = vmul.f32 0.125, %v576_v59  ;;  %v615_v60 = vmul.f32 %v7267_v46, %v7267_v46  ;;  %v600_v16 = vmul.f32 0.125, %v526_v1  ;;  %v591_v30 = vrot.slane %v590_v33, 2 }
 0x1cb   :  { %v6596_v3 = vpop.eup %6595  ;;  %v659_v5 = vcombine.low %v6590_v38, %v6594_v62  ;;  %v609_v6 = vmul.f32 0.125, %v588_v50  ;;  %v617_v15 = vmul.f32 %v7269_v52, %v7269_v52  ;;  %v582_v20 = vadd.f32 %v581_v63, %v580_v14 }
 0x1cc   :  { %v660_v19 = vcombine.low %v6592_v27, %v6596_v3  ;;  %v623_v21 = vsub.f32 %v607_v53, %v615_v60  ;;  %v537_v24 = vrot.slane %v536_v2, 1  ;;  %v616_v25 = vmul.f32 %v600_v16, %v600_v16 }
 0x1cd   :  { %v669_v22 = vrot.slane %v659_v5, %v7261_v12  ;;  %v608_v26 = vmul.f32 0.125, %v582_v20  ;;  %v625_v42 = vsub.f32 %v609_v6, %v617_v15  ;;  %v592_v44 = vadd.f32 %v591_v30, %v590_v33 }
 0x1ce   :  { %v676_v8 = vrot.slane %v660_v19, %v7261_v12  ;;  %v631_v23 = vmax.f32 %v623_v21, 0.0  ;;  %v538_v9 = vadd.f32 %v537_v24, %v536_v2 }
 0x1cf   :  { %v624_v17 = vsub.f32 %v608_v26, %v616_v25  ;;  %v593_v43 = vrot.slane %v592_v44, 1  ;;  %v633_v56 = vmax.f32 %v625_v42, 0.0  ;;  %v489_v25 = vld [vmem:[#allocation8] sm:$0xff] }
 0x1d0   :  { %v691_v61 = vcombine.low %v669_v22, %v676_v8  ;;  %v602_v13 = vmul.f32 0.125, %v538_v9  ;;  %v639_v38 = vadd.f32 1e-05, %v631_v23 }
 0x1d1   :  { %v632_v59 = vmax.f32 %v624_v17, 0.0  ;;  %v594_v14 = vadd.f32 %v593_v43, %v592_v44  ;;  %v641_v62 = vadd.f32 1e-05, %v633_v56 }
 0x1d2   :  { %v618_v27 = vmul.f32 %v602_v13, %v602_v13  ;;  %6597 = vrsqrt.f32 %v639_v38  ;;  %v699_v24 = vrot.slane %v691_v61, %v7261_v12 }
 0x1d3   :  { %v640_v50 = vadd.f32 1e-05, %v632_v59  ;;  %v610_v1 = vmul.f32 0.125, %v594_v14 }
 0x1d5   :  { %6599 = vrsqrt.f32 %v640_v50  ;;  %v626_v53 = vsub.f32 %v610_v1, %v618_v27 }
 0x1d6   :  { %6601 = vrsqrt.f32 %v641_v62 }
 0x1d7   :  { %v634_v60 = vmax.f32 %v626_v53, 0.0 }
 0x1d9   :  { %v642_v63 = vadd.f32 1e-05, %v634_v60 }
 0x1db   :  { %6603 = vrsqrt.f32 %v642_v63 }
 0x1dc   :  { %v6598_v33 = vpop.eup %6597 }
 0x1df   :  { %v6600_v2 = vpop.eup %6599 }
 0x1e0   :  { %v661_v3 = vcombine.low %v6598_v33, %v6600_v2  ;;  %v6602_v5 = vpop.eup %6601 }
 0x1e2   :  { %v683_v15 = vrot.slane %v661_v3, %v7261_v12 }
 0x1e5   :  { %v6604_v6 = vpop.eup %6603 }
 0x1e6   :  { %v662_v19 = vcombine.low %v6602_v5, %v6604_v6 }
 0x1e8   :  { %v690_v21 = vrot.slane %v662_v19, %v7261_v12 }
 0x1ea   :  { %v692_v20 = vcombine.low %v683_v15, %v690_v21 }
 0x1ec   :  { %v706_v22 = vrot.slane %v692_v20, %v7261_v12 }
 0x1ee   :  { %v707_v30 = vcombine.low %v699_v24, %v706_v22 }
 0x1f0   :  { %v709_v8 = vmul.f32 %v707_v30, %v489_v25 }
 0x1f2   :  { %v730_v23 = vrot.slane %v709_v8, %v7164_v54  ;;  %v734_v26 = vrot.slane %v709_v8, %v7170_v57  ;;  %v738_v9 = vrot.slane %v709_v8, %v7167_v55  ;;  %v742_v42 = vrot.slane %v709_v8, %v7173_v58 }
 0x1f3   :  { %v714_v44 = vrot.slane %v709_v8, %v7142_v45  ;;  %v718_v17 = vrot.slane %v709_v8, %v7150_v48  ;;  %v722_v43 = vrot.slane %v709_v8, %v7147_v47  ;;  %v726_v61 = vrot.slane %v709_v8, %v7153_v49 }
 0x1f4   :  { %v755_v38 = vmul.f32 %v730_v23, %v7267_v46  ;;  %v756_v59 = vmul.f32 %v734_v26, %v600_v16  ;;  %v757_v56 = vmul.f32 %v738_v9, %v7269_v52  ;;  %v758_v14 = vmul.f32 %v742_v42, %v602_v13 }
 0x1f5   :  { %v825_v27 = vmul.f32 %v742_v42, %v7256_v7  ;;  %v751_v50 = vmul.f32 %v714_v44, %v7210_v29  ;;  %v752_v1 = vmul.f32 %v718_v17, %v7214_v51  ;;  %v753_v62 = vmul.f32 %v722_v43, %v7212_v34 }
 0x1f6   :  { %v769_v53 = vcombine.low %v755_v38, %v756_v59  ;;  %v770_v60 = vcombine.low %v757_v56, %v758_v14  ;;  %v754_v63 = vmul.f32 %v726_v61, %v7218_v0  ;;  %v819_v33 = vmul.f32 %v718_v17, %v7185_v11  ;;  %v1023_v17 = vld [vmem:[#allocation11 + $0x460] sm:$0xff] }
 0x1f7   :  { %v767_v2 = vcombine.low %v751_v50, %v752_v1  ;;  %v818_v46 = vmul.f32 %v714_v44, %v7177_v4  ;;  %v821_v52 = vmul.f32 %v726_v61, %v7195_v18  ;;  %v823_v51 = vmul.f32 %v734_v26, %v7242_v32  ;;  %v490_v4 = vld [vmem:[#allocation10] sm:$0xff]  ;;  %v1024_v61 = vld [vmem:[#allocation11 + $0x468] sm:$0xff]  ;;  %v1027_v1 = vld [vmem:[#allocation11 + $0x480] sm:$0xff] }
 0x1f8   :  { %v791_v16 = vrot.slane %v769_v53, %v7261_v12  ;;  %v798_v7 = vrot.slane %v770_v60, %v7261_v12  ;;  %v768_v29 = vcombine.low %v753_v62, %v754_v63  ;;  %v820_v15 = vmul.f32 %v722_v43, %v7183_v10  ;;  %v1019_v10 = vld [vmem:[#allocation11 + $0x440] sm:$0xff]  ;;  %v1020_v43 = vld [vmem:[#allocation11 + $0x448] sm:$0xff] }
 0x1f9   :  { %v777_v34 = vrot.slane %v767_v2, %v7261_v12  ;;  %v822_v59 = vmul.f32 %v730_v23, %v7235_v28  ;;  %v824_v50 = vmul.f32 %v738_v9, %v7240_v31  ;;  %v5923_v60 = vcombine.high %v1019_v10, %v1023_v17  ;;  %v1028_v2 = vld [vmem:[#allocation11 + $0x488] sm:$0xff] }
 0x1fa   :  { %v800_v13 = vcombine.low %v791_v16, %v798_v7  ;;  %v784_v3 = vrot.slane %v768_v29, %v7261_v12  ;;  %v5925_v63 = vcombine.high %v1020_v43, %v1024_v61  ;;  %v1032_v28 = vld [vmem:[#allocation11 + $0x4a8] sm:$0xff]  ;;  %v5922_v9 = vcombine.low %v1019_v10, %v1023_v17  ;;  %v1035_v16 = vld [vmem:[#allocation11 + $0x4c0] sm:$0xff] }
 0x1fb   :  { %v1039_v7 = vld [vmem:[#allocation11 + $0x4e0] sm:$0xff]  ;;  %v1036_v29 = vld [vmem:[#allocation11 + $0x4c8] sm:$0xff]  ;;  %v5932_v36 = vcombine.low %v1028_v2, %v1032_v28 }
 0x1fc   :  { %v814_v0 = vrot.slane %v800_v13, %v7261_v12  ;;  %v799_v11 = vcombine.low %v777_v34, %v784_v3  ;;  %v5939_v37 = vcombine.high %v1035_v16, %v1039_v7  ;;  %v1044_v34 = vld [vmem:[#allocation11 + $0x508] sm:$0xff]  ;;  %v5938_v3 = vcombine.low %v1035_v16, %v1039_v7  ;;  %v1067_v17 = vld [vmem:[#allocation11 + $0x5c0] sm:$0xff] }
 0x1fd   :  { %v1048_v13 = vld [vmem:[#allocation11 + $0x528] sm:$0xff]  ;;  %v1083_v7 = vld [vmem:[#allocation11 + $0x640] sm:$0xff] }
 0x1fe   :  { %v807_v5 = vrot.slane %v799_v11, %v7261_v12 }
 0x200   :  { %v815_v6 = vcombine.low %v807_v5, %v814_v0  ;;  %v5949_v5 = vcombine.high %v1044_v34, %v1048_v13 }
 0x202   :  { %v817_v18 = vsub.f32 %v490_v4, %v815_v6  ;;  %v1051_v4 = vld [vmem:[#allocation11 + $0x540] sm:$0xff] }
 0x203   :  { %v1055_v6 = vld [vmem:[#allocation11 + $0x560] sm:$0xff] }
 0x204   :  { %v834_v19 = vrot.slane %v817_v18, %v7150_v48  ;;  %v830_v21 = vrot.slane %v817_v18, %v7142_v45  ;;  %v842_v32 = vrot.slane %v817_v18, %v7153_v49  ;;  %v838_v20 = vrot.slane %v817_v18, %v7147_v47 }
 0x205   :  { %v850_v24 = vrot.slane %v817_v18, %v7170_v57  ;;  %v846_v22 = vrot.slane %v817_v18, %v7164_v54  ;;  %v858_v25 = vrot.slane %v817_v18, %v7173_v58  ;;  %v854_v30 = vrot.slane %v817_v18, %v7167_v55  ;;  %v1052_v18 = vld [vmem:[#allocation11 + $0x548] sm:$0xff] }
 0x206   :  { %v868_v8 = vadd.f32 %v834_v19, %v819_v33  ;;  %v867_v26 = vadd.f32 %v830_v21, %v818_v46  ;;  %v870_v42 = vadd.f32 %v842_v32, %v821_v52  ;;  %v7315_v44 = vadd.f32 %v838_v20, %v820_v15  ;;  %v1031_v33 = vld [vmem:[#allocation11 + $0x4a0] sm:$0xff]  ;;  %v1056_v15 = vld [vmem:[#allocation11 + $0x568] sm:$0xff] }
 0x207   :  { %v7317_v38 = vadd.f32 %v850_v24, %v823_v51  ;;  %v7325_v62 = vadd.f32 %v846_v22, %v822_v59  ;;  %v7327_v53 = vadd.f32 %v858_v25, %v825_v27  ;;  %v7331_v23 = vadd.f32 %v854_v30, %v824_v50  ;;  %v1040_v51 = vld [vmem:[#allocation11 + $0x4e8] sm:$0xff]  ;;  %v1059_v24 = vld [vmem:[#allocation11 + $0x580] sm:$0xff] }
 0x208   :  { %v7320_v56 = vpack.c.bf16 %v868_v8, %v868_v8  ;;  %v7322_v14 = vpack.c.bf16 %v867_v26, %v867_v26  ;;  %v7335_v31 = vpack.c.bf16 %v870_v42, %v870_v42  ;;  %v5924_v27 = vcombine.low %v1020_v43, %v1024_v61  ;;  %v1063_v22 = vld [vmem:[#allocation11 + $0x5a0] sm:$0xff]  ;;  %v1060_v25 = vld [vmem:[#allocation11 + $0x588] sm:$0xff] }
 0x209   :  { %v5931_v46 = vcombine.high %v1027_v1, %v1031_v33  ;;  %v5933_v52 = vcombine.high %v1028_v2, %v1032_v28  ;;  %v5930_v35 = vcombine.low %v1027_v1, %v1031_v33  ;;  %v5941_v39 = vcombine.high %v1036_v29, %v1040_v51  ;;  %v1064_v30 = vld [vmem:[#allocation11 + $0x5a8] sm:$0xff]  ;;  %v1071_v43 = vld [vmem:[#allocation11 + $0x5e0] sm:$0xff] }
 0x20a   :  { %4029 = vmatprep.mubr.bf16.mxu0 %v7320_v56  ;;  %4193 = vmatprep.mubr.bf16.mxu1 %v7320_v56  ;;  %v5940_v0 = vcombine.low %v1036_v29, %v1040_v51  ;;  %v5948_v21 = vcombine.low %v1044_v34, %v1048_v13  ;;  %v5955_v32 = vcombine.high %v1051_v4, %v1055_v6  ;;  %v1068_v61 = vld [vmem:[#allocation11 + $0x5c8] sm:$0xff]  ;;  %v1075_v33 = vld [vmem:[#allocation11 + $0x600] sm:$0xff] }
 0x20b   :  { %4030 = vmatmul.mubr.bf16.vlgmr.msra.gmra.mrb[8].mxu0 %v7322_v14  ;;  %4194 = vmatmul.mubr.bf16.vlgmr.msra.gmra.mrb[8].mxu1 %v7322_v14  ;;  %v5957_v20 = vcombine.high %v1052_v18, %v1056_v15  ;;  %v5954_v8 = vcombine.low %v1051_v4, %v1055_v6  ;;  %v5956_v26 = vcombine.low %v1052_v18, %v1056_v15  ;;  %v1072_v59 = vld [vmem:[#allocation11 + $0x5e8] sm:$0xff]  ;;  %v1079_v2 = vld [vmem:[#allocation11 + $0x620] sm:$0xff] }
 0x20c   :  { %4039 = vmatpush1.bf16.msra.mxu0 %v5914_v40  ;;  %4203 = vmatpush1.bf16.msra.mxu1 %v5916_v41  ;;  %v1043_v40 = vld [vmem:[#allocation11 + $0x500] sm:$0xff]  ;;  %v5963_v42 = vcombine.high %v1059_v24, %v1063_v22  ;;  %v5965_v10 = vcombine.high %v1060_v25, %v1064_v30  ;;  %v5962_v50 = vcombine.low %v1059_v24, %v1063_v22  ;;  %v1076_v28 = vld [vmem:[#allocation11 + $0x608] sm:$0xff] }
 0x20d   :  { %4070 = vmatprep.mubr.bf16.mxu0 %v7335_v31  ;;  %4234 = vmatprep.mubr.bf16.mxu1 %v7335_v31  ;;  %v1047_v41 = vld [vmem:[#allocation11 + $0x520] sm:$0xff]  ;;  %v5964_v1 = vcombine.low %v1060_v25, %v1064_v30  ;;  %v1084_v51 = vld [vmem:[#allocation11 + $0x648] sm:$0xff] }
 0x20e   :  { %4040 = vmatprep.subr.bf16.mxu0 %v5923_v60  ;;  %4204 = vmatprep.subr.bf16.mxu1 %v5925_v63  ;;  %v5947_v11 = vcombine.high %v1043_v40, %v1047_v41  ;;  %v5946_v19 = vcombine.low %v1043_v40, %v1047_v41  ;;  %v5971_v60 = vcombine.high %v1067_v17, %v1071_v43  ;;  %v1087_v29 = vld [vmem:[#allocation11 + $0x660] sm:$0xff]  ;;  %v1092_v13 = vld [vmem:[#allocation11 + $0x688] sm:$0xff] }
 0x20f   :  { %v5973_v63 = vcombine.high %v1068_v61, %v1072_v59  ;;  %v1091_v41 = vld [vmem:[#allocation11 + $0x680] sm:$0xff]  ;;  %v1100_v15 = vld [vmem:[#allocation11 + $0x6c8] sm:$0xff] }
 0x210   :  { %4041 = vmatpush1.bf16.msra.mxu0 %v5922_v9  ;;  %4205 = vmatpush1.bf16.msra.mxu1 %v5924_v27  ;;  %v1080_v9 = vld [vmem:[#allocation11 + $0x628] sm:$0xff]  ;;  %v5970_v27 = vcombine.low %v1067_v17, %v1071_v43  ;;  %v1095_v34 = vld [vmem:[#allocation11 + $0x6a0] sm:$0xff] }
 0x211   :  { %4042 = vmatprep.subr.bf16.mxu0 %v5931_v46  ;;  %4206 = vmatprep.subr.bf16.mxu1 %v5933_v52  ;;  %v5972_v46 = vcombine.low %v1068_v61, %v1072_v59  ;;  %v5979_v52 = vcombine.high %v1075_v33, %v1079_v2  ;;  %v5981_v16 = vcombine.high %v1076_v28, %v1080_v9  ;;  %v1099_v6 = vld [vmem:[#allocation11 + $0x6c0] sm:$0xff]  ;;  %v1108_v30 = vld [vmem:[#allocation11 + $0x708] sm:$0xff] }
 0x212   :  { %v1103_v18 = vld [vmem:[#allocation11 + $0x6e0] sm:$0xff]  ;;  %v1116_v59 = vld [vmem:[#allocation11 + $0x748] sm:$0xff] }
 0x213   :  { %v1107_v22 = vld [vmem:[#allocation11 + $0x700] sm:$0xff] }
 0x214   :  { %4043 = vmatpush1.bf16.msra.mxu0 %v5930_v35  ;;  %4207 = vmatpush1.bf16.msra.mxu1 %v5932_v36  ;;  %v1088_v35 = vld [vmem:[#allocation11 + $0x668] sm:$0xff]  ;;  %v5978_v36 = vcombine.low %v1075_v33, %v1079_v2  ;;  %v1111_v25 = vld [vmem:[#allocation11 + $0x720] sm:$0xff] }
 0x215   :  { %4044 = vmatprep.subr.bf16.mxu0 %v5939_v37  ;;  %4208 = vmatprep.subr.bf16.mxu1 %v5941_v39  ;;  %v5980_v37 = vcombine.low %v1076_v28, %v1080_v9  ;;  %v5987_v39 = vcombine.high %v1083_v7, %v1087_v29  ;;  %v5989_v40 = vcombine.high %v1084_v51, %v1088_v35  ;;  %v1115_v43 = vld [vmem:[#allocation11 + $0x740] sm:$0xff]  ;;  %v1124_v9 = vld [vmem:[#allocation11 + $0x788] sm:$0xff] }
 0x216   :  { %v1119_v61 = vld [vmem:[#allocation11 + $0x760] sm:$0xff] }
 0x217   :  { %v1123_v2 = vld [vmem:[#allocation11 + $0x780] sm:$0xff] }
 0x218   :  { %4045 = vmatpush1.bf16.msra.mxu0 %v5938_v3  ;;  %4209 = vmatpush1.bf16.msra.mxu1 %v5940_v0  ;;  %v1096_v3 = vld [vmem:[#allocation11 + $0x6a8] sm:$0xff]  ;;  %v5986_v0 = vcombine.low %v1083_v7, %v1087_v29  ;;  %v1127_v28 = vld [vmem:[#allocation11 + $0x7a0] sm:$0xff] }
 0x219   :  { %4046 = vmatprep.subr.bf16.mxu0 %v5947_v11  ;;  %4210 = vmatprep.subr.bf16.mxu1 %v5949_v5  ;;  %v5988_v11 = vcombine.low %v1084_v51, %v1088_v35  ;;  %v5995_v5 = vcombine.high %v1091_v41, %v1095_v34  ;;  %v5997_v4 = vcombine.high %v1092_v13, %v1096_v3  ;;  %v1131_v29 = vld [vmem:[#allocation11 + $0x7c0] sm:$0xff]  ;;  %v1132_v35 = vld [vmem:[#allocation11 + $0x7c8] sm:$0xff] }
 0x21a   :  { %v1135_v51 = vld [vmem:[#allocation11 + $0x7e0] sm:$0xff] }
 0x21c   :  { %4047 = vmatpush1.bf16.msra.mxu0 %v5946_v19  ;;  %4211 = vmatpush1.bf16.msra.mxu1 %v5948_v21  ;;  %v1104_v19 = vld [vmem:[#allocation11 + $0x6e8] sm:$0xff]  ;;  %v5994_v21 = vcombine.low %v1091_v41, %v1095_v34  ;;  %v1139_v34 = vld [vmem:[#allocation11 + $0x800] sm:$0xff] }
 0x21d   :  { %4048 = vmatprep.subr.bf16.mxu0 %v5955_v32  ;;  %4212 = vmatprep.subr.bf16.mxu1 %v5957_v20  ;;  %v5996_v32 = vcombine.low %v1092_v13, %v1096_v3  ;;  %v6003_v20 = vcombine.high %v1099_v6, %v1103_v18  ;;  %v6005_v24 = vcombine.high %v1100_v15, %v1104_v19  ;;  %v1143_v13 = vld [vmem:[#allocation11 + $0x820] sm:$0xff]  ;;  %v1140_v3 = vld [vmem:[#allocation11 + $0x808] sm:$0xff] }
 0x220   :  { %4049 = vmatpush1.bf16.msra.mxu0 %v5954_v8  ;;  %4213 = vmatpush1.bf16.msra.mxu1 %v5956_v26  ;;  %v1112_v8 = vld [vmem:[#allocation11 + $0x728] sm:$0xff]  ;;  %v6002_v26 = vcombine.low %v1099_v6, %v1103_v18  ;;  %v1147_v18 = vld [vmem:[#allocation11 + $0x840] sm:$0xff] }
 0x221   :  { %4050 = vmatprep.subr.bf16.mxu0 %v5963_v42  ;;  %4214 = vmatprep.subr.bf16.mxu1 %v5965_v10  ;;  %v6004_v42 = vcombine.low %v1100_v15, %v1104_v19  ;;  %v6011_v10 = vcombine.high %v1107_v22, %v1111_v25  ;;  %v6013_v17 = vcombine.high %v1108_v30, %v1112_v8  ;;  %v1151_v15 = vld [vmem:[#allocation11 + $0x860] sm:$0xff]  ;;  %v1148_v19 = vld [vmem:[#allocation11 + $0x848] sm:$0xff] }
 0x224   :  { %4051 = vmatpush1.bf16.msra.mxu0 %v5962_v50  ;;  %4215 = vmatpush1.bf16.msra.mxu1 %v5964_v1  ;;  %v1120_v50 = vld [vmem:[#allocation11 + $0x768] sm:$0xff]  ;;  %v6010_v1 = vcombine.low %v1107_v22, %v1111_v25  ;;  %v7351_v22 = vpack.c.bf16 %v7317_v38, %v7317_v38  ;;  %v6051_v25 = vcombine.high %v1147_v18, %v1151_v15 }
 0x225   :  { %4052 = vmatprep.subr.bf16.mxu0 %v5971_v60  ;;  %4216 = vmatprep.subr.bf16.mxu1 %v5973_v63  ;;  %v6012_v60 = vcombine.low %v1108_v30, %v1112_v8  ;;  %v6019_v63 = vcombine.high %v1115_v43, %v1119_v61  ;;  %v6021_v33 = vcombine.high %v1116_v59, %v1120_v50  ;;  %v1155_v8 = vld [vmem:[#allocation11 + $0x880] sm:$0xff] }
 0x228   :  { %4053 = vmatpush1.bf16.msra.mxu0 %v5970_v27  ;;  %4217 = vmatpush1.bf16.msra.mxu1 %v5972_v46  ;;  %v1128_v27 = vld [vmem:[#allocation11 + $0x7a8] sm:$0xff]  ;;  %v6018_v46 = vcombine.low %v1115_v43, %v1119_v61  ;;  %v1163_v61 = vld [vmem:[#allocation11 + $0x8c0] sm:$0xff] }
 0x229   :  { %4054 = vmatprep.subr.bf16.mxu0 %v5979_v52  ;;  %4218 = vmatprep.subr.bf16.mxu1 %v5981_v16  ;;  %v6020_v52 = vcombine.low %v1116_v59, %v1120_v50  ;;  %v6027_v16 = vcombine.high %v1123_v2, %v1127_v28  ;;  %v6029_v7 = vcombine.high %v1124_v9, %v1128_v27  ;;  %v1167_v59 = vld [vmem:[#allocation11 + $0x8e0] sm:$0xff]  ;;  %v1164_v50 = vld [vmem:[#allocation11 + $0x8c8] sm:$0xff] }
 0x22c   :  { %4055 = vmatpush1.bf16.msra.mxu0 %v5978_v36  ;;  %4219 = vmatpush1.bf16.msra.mxu1 %v5980_v37  ;;  %v1136_v36 = vld [vmem:[#allocation11 + $0x7e8] sm:$0xff]  ;;  %v6026_v37 = vcombine.low %v1123_v2, %v1127_v28  ;;  %v1171_v28 = vld [vmem:[#allocation11 + $0x900] sm:$0xff] }
 0x22d   :  { %4056 = vmatprep.subr.bf16.mxu0 %v5987_v39  ;;  %4220 = vmatprep.subr.bf16.mxu1 %v5989_v40  ;;  %v6028_v39 = vcombine.low %v1124_v9, %v1128_v27  ;;  %v6035_v40 = vcombine.high %v1131_v29, %v1135_v51  ;;  %v6037_v41 = vcombine.high %v1132_v35, %v1136_v36  ;;  %v1175_v9 = vld [vmem:[#allocation11 + $0x920] sm:$0xff]  ;;  %v1172_v27 = vld [vmem:[#allocation11 + $0x908] sm:$0xff] }
 0x230   :  { %4057 = vmatpush1.bf16.msra.mxu0 %v5986_v0  ;;  %4221 = vmatpush1.bf16.msra.mxu1 %v5988_v11  ;;  %v1144_v0 = vld [vmem:[#allocation11 + $0x828] sm:$0xff]  ;;  %v6034_v11 = vcombine.low %v1131_v29, %v1135_v51  ;;  %v1179_v51 = vld [vmem:[#allocation11 + $0x940] sm:$0xff] }
 0x231   :  { %4058 = vmatprep.subr.bf16.mxu0 %v5995_v5  ;;  %4222 = vmatprep.subr.bf16.mxu1 %v5997_v4  ;;  %v6036_v5 = vcombine.low %v1132_v35, %v1136_v36  ;;  %v6043_v4 = vcombine.high %v1139_v34, %v1143_v13  ;;  %v6045_v6 = vcombine.high %v1140_v3, %v1144_v0  ;;  %v1183_v35 = vld [vmem:[#allocation11 + $0x960] sm:$0xff]  ;;  %v1180_v36 = vld [vmem:[#allocation11 + $0x948] sm:$0xff] }
 0x234   :  { %4059 = vmatpush1.bf16.msra.mxu0 %v5994_v21  ;;  %4223 = vmatpush1.bf16.msra.mxu1 %v5996_v32  ;;  %v1152_v21 = vld [vmem:[#allocation11 + $0x868] sm:$0xff]  ;;  %v6042_v32 = vcombine.low %v1139_v34, %v1143_v13  ;;  %v1187_v13 = vld [vmem:[#allocation11 + $0x980] sm:$0xff] }
 0x235   :  { %4060 = vmatprep.subr.bf16.mxu0 %v6003_v20  ;;  %4224 = vmatprep.subr.bf16.mxu1 %v6005_v24  ;;  %v7347_v20 = vpack.c.bf16 %v7315_v44, %v7315_v44  ;;  %v6044_v24 = vcombine.low %v1140_v3, %v1144_v0  ;;  %v6053_v30 = vcombine.high %v1148_v19, %v1152_v21  ;;  %v1191_v3 = vld [vmem:[#allocation11 + $0x9a0] sm:$0xff]  ;;  %v1188_v0 = vld [vmem:[#allocation11 + $0x988] sm:$0xff] }
 0x236   :  { %v6050_v44 = vcombine.low %v1147_v18, %v1151_v15  ;;  %v1195_v15 = vld [vmem:[#allocation11 + $0x9c0] sm:$0xff] }
 0x238   :  { %4061 = vmatpush1.bf16.msra.mxu0 %v6002_v26  ;;  %4225 = vmatpush1.bf16.msra.mxu1 %v6004_v42  ;;  %v1159_v26 = vld [vmem:[#allocation11 + $0x8a0] sm:$0xff]  ;;  %v1156_v42 = vld [vmem:[#allocation11 + $0x888] sm:$0xff] }
 0x239   :  { %4062 = vmatprep.subr.bf16.mxu0 %v6011_v10  ;;  %4226 = vmatprep.subr.bf16.mxu1 %v6013_v17  ;;  %v1160_v10 = vld [vmem:[#allocation11 + $0x8a8] sm:$0xff]  ;;  %v6052_v17 = vcombine.low %v1148_v19, %v1152_v21  ;;  %v6059_v38 = vcombine.high %v1155_v8, %v1159_v26  ;;  %v1199_v19 = vld [vmem:[#allocation11 + $0x9e0] sm:$0xff] }
 0x23a   :  { %v6061_v43 = vcombine.high %v1156_v42, %v1160_v10  ;;  %v1196_v21 = vld [vmem:[#allocation11 + $0x9c8] sm:$0xff] }
 0x23c   :  { %4063 = vmatpush1.bf16.msra.mxu0 %v6010_v1  ;;  %4227 = vmatpush1.bf16.msra.mxu1 %v6012_v60  ;;  %v1168_v1 = vld [vmem:[#allocation11 + $0x8e8] sm:$0xff]  ;;  %v6058_v60 = vcombine.low %v1155_v8, %v1159_v26  ;;  %v1203_v26 = vld [vmem:[#allocation11 + $0xa00] sm:$0xff] }
 0x23d   :  { %4064 = vmatprep.subr.bf16.mxu0 %v6019_v63  ;;  %4228 = vmatprep.subr.bf16.mxu1 %v6021_v33  ;;  %v6060_v63 = vcombine.low %v1156_v42, %v1160_v10  ;;  %v6067_v33 = vcombine.high %v1163_v61, %v1167_v59  ;;  %v6069_v2 = vcombine.high %v1164_v50, %v1168_v1  ;;  %v1207_v42 = vld [vmem:[#allocation11 + $0xa20] sm:$0xff]  ;;  %v1204_v10 = vld [vmem:[#allocation11 + $0xa08] sm:$0xff] }
 0x240   :  { %4065 = vmatpush1.bf16.msra.mxu0 %v6018_v46  ;;  %4229 = vmatpush1.bf16.msra.mxu1 %v6020_v52  ;;  %v1176_v46 = vld [vmem:[#allocation11 + $0x928] sm:$0xff]  ;;  %v6066_v52 = vcombine.low %v1163_v61, %v1167_v59  ;;  %v1211_v59 = vld [vmem:[#allocation11 + $0xa40] sm:$0xff] }
 0x241   :  { %4066 = vmatprep.subr.bf16.mxu0 %v6027_v16  ;;  %4230 = vmatprep.subr.bf16.mxu1 %v6029_v7  ;;  %v6068_v16 = vcombine.low %v1164_v50, %v1168_v1  ;;  %v6075_v7 = vcombine.high %v1171_v28, %v1175_v9  ;;  %v6077_v29 = vcombine.high %v1172_v27, %v1176_v46  ;;  %v1215_v50 = vld [vmem:[#allocation11 + $0xa60] sm:$0xff]  ;;  %v1212_v1 = vld [vmem:[#allocation11 + $0xa48] sm:$0xff] }
 0x244   :  { %4067 = vmatpush1.bf16.msra.mxu0 %v6026_v37  ;;  %4231 = vmatpush1.bf16.msra.mxu1 %v6028_v39  ;;  %v1184_v37 = vld [vmem:[#allocation11 + $0x968] sm:$0xff]  ;;  %v6074_v39 = vcombine.low %v1171_v28, %v1175_v9  ;;  %v1219_v9 = vld [vmem:[#allocation11 + $0xa80] sm:$0xff] }
 0x245   :  { %4068 = vmatprep.subr.bf16.mxu0 %v6035_v40  ;;  %4232 = vmatprep.subr.bf16.mxu1 %v6037_v41  ;;  %v6076_v40 = vcombine.low %v1172_v27, %v1176_v46  ;;  %v6083_v41 = vcombine.high %v1179_v51, %v1183_v35  ;;  %v6085_v34 = vcombine.high %v1180_v36, %v1184_v37  ;;  %v1223_v27 = vld [vmem:[#allocation11 + $0xaa0] sm:$0xff]  ;;  %v1220_v46 = vld [vmem:[#allocation11 + $0xa88] sm:$0xff] }
 0x248   :  { %4069 = vmatpush1.bf16.msra.mxu0 %v6034_v11  ;;  %4233 = vmatpush1.bf16.msra.mxu1 %v6036_v5  ;;  %v1192_v11 = vld [vmem:[#allocation11 + $0x9a8] sm:$0xff]  ;;  %v6082_v5 = vcombine.low %v1179_v51, %v1183_v35  ;;  %v1227_v35 = vld [vmem:[#allocation11 + $0xac0] sm:$0xff] }
 0x249   :  { %4079 = vmatprep.subr.bf16.mxu0 %v6043_v4  ;;  %4243 = vmatprep.subr.bf16.mxu1 %v6045_v6  ;;  %v6084_v4 = vcombine.low %v1180_v36, %v1184_v37  ;;  %v6091_v6 = vcombine.high %v1187_v13, %v1191_v3  ;;  %v6093_v18 = vcombine.high %v1188_v0, %v1192_v11  ;;  %v1231_v36 = vld [vmem:[#allocation11 + $0xae0] sm:$0xff]  ;;  %v1228_v37 = vld [vmem:[#allocation11 + $0xac8] sm:$0xff] }
 0x24b   :  { %4071 = vmatmul.mubr.bf16.vlgmr.msra.gmra.mrb[8].mxu0 %v7347_v20  ;;  %4235 = vmatmul.mubr.bf16.vlgmr.msra.gmra.mrb[8].mxu1 %v7347_v20 }
 0x24c   :  { %4080 = vmatpush1.bf16.msra.mxu0 %v6042_v32  ;;  %4111 = vmatprep.mubr.bf16.mxu0 %v7351_v22  ;;  %v1200_v32 = vld [vmem:[#allocation11 + $0x9e8] sm:$0xff] }
 0x24d   :  { %4244 = vmatpush1.bf16.msra.mxu1 %v6044_v24  ;;  %4275 = vmatprep.mubr.bf16.mxu1 %v7351_v22  ;;  %v6090_v24 = vcombine.low %v1187_v13, %v1191_v3  ;;  %v6101_v8 = vcombine.high %v1196_v21, %v1200_v32  ;;  %v1235_v3 = vld [vmem:[#allocation11 + $0xb00] sm:$0xff] }
 0x24e   :  { %4081 = vmatprep.subr.bf16.mxu0 %v6051_v25  ;;  %4245 = vmatprep.subr.bf16.mxu1 %v6053_v30  ;;  %v6092_v25 = vcombine.low %v1188_v0, %v1192_v11  ;;  %v6099_v30 = vcombine.high %v1195_v15, %v1199_v19  ;;  %v1239_v0 = vld [vmem:[#allocation11 + $0xb20] sm:$0xff]  ;;  %v1236_v11 = vld [vmem:[#allocation11 + $0xb08] sm:$0xff] }
 0x250   :  { %4082 = vmatpush1.bf16.msra.mxu0 %v6050_v44  ;;  %v1208_v44 = vld [vmem:[#allocation11 + $0xa28] sm:$0xff] }
 0x251   :  { %4246 = vmatpush1.bf16.msra.mxu1 %v6052_v17  ;;  %4083 = vmatprep.subr.bf16.mxu0 %v6059_v38  ;;  %v6098_v17 = vcombine.low %v1195_v15, %v1199_v19  ;;  %v6100_v38 = vcombine.low %v1196_v21, %v1200_v32  ;;  %v6109_v61 = vcombine.high %v1204_v10, %v1208_v44  ;;  %v1243_v19 = vld [vmem:[#allocation11 + $0xb40] sm:$0xff]  ;;  %v1244_v32 = vld [vmem:[#allocation11 + $0xb48] sm:$0xff] }
 0x252   :  { %4247 = vmatprep.subr.bf16.mxu1 %v6061_v43  ;;  %v6107_v43 = vcombine.high %v1203_v26, %v1207_v42  ;;  %v1247_v21 = vld [vmem:[#allocation11 + $0xb60] sm:$0xff] }
 0x254   :  { %4084 = vmatpush1.bf16.msra.mxu0 %v6058_v60  ;;  %v1216_v60 = vld [vmem:[#allocation11 + $0xa68] sm:$0xff] }
 0x255   :  { %4248 = vmatpush1.bf16.msra.mxu1 %v6060_v63  ;;  %4085 = vmatprep.subr.bf16.mxu0 %v6067_v33  ;;  %v6106_v63 = vcombine.low %v1203_v26, %v1207_v42  ;;  %v6108_v33 = vcombine.low %v1204_v10, %v1208_v44  ;;  %v6117_v28 = vcombine.high %v1212_v1, %v1216_v60  ;;  %v1251_v42 = vld [vmem:[#allocation11 + $0xb80] sm:$0xff]  ;;  %v1252_v44 = vld [vmem:[#allocation11 + $0xb88] sm:$0xff] }
 0x256   :  { %4249 = vmatprep.subr.bf16.mxu1 %v6069_v2  ;;  %v6115_v2 = vcombine.high %v1211_v59, %v1215_v50  ;;  %v1255_v10 = vld [vmem:[#allocation11 + $0xba0] sm:$0xff] }
 0x258   :  { %4086 = vmatpush1.bf16.msra.mxu0 %v6066_v52  ;;  %v1224_v52 = vld [vmem:[#allocation11 + $0xaa8] sm:$0xff] }
 0x259   :  { %4250 = vmatpush1.bf16.msra.mxu1 %v6068_v16  ;;  %4087 = vmatprep.subr.bf16.mxu0 %v6075_v7  ;;  %v6114_v16 = vcombine.low %v1211_v59, %v1215_v50  ;;  %v6116_v7 = vcombine.low %v1212_v1, %v1216_v60  ;;  %v6125_v51 = vcombine.high %v1220_v46, %v1224_v52  ;;  %v1259_v50 = vld [vmem:[#allocation11 + $0xbc0] sm:$0xff]  ;;  %v1260_v60 = vld [vmem:[#allocation11 + $0xbc8] sm:$0xff] }
 0x25a   :  { %4251 = vmatprep.subr.bf16.mxu1 %v6077_v29  ;;  %v6123_v29 = vcombine.high %v1219_v9, %v1223_v27  ;;  %v1263_v1 = vld [vmem:[#allocation11 + $0xbe0] sm:$0xff] }
 0x25c   :  { %4088 = vmatpush1.bf16.msra.mxu0 %v6074_v39  ;;  %v1232_v39 = vld [vmem:[#allocation11 + $0xae8] sm:$0xff] }
 0x25d   :  { %4252 = vmatpush1.bf16.msra.mxu1 %v6076_v40  ;;  %4089 = vmatprep.subr.bf16.mxu0 %v6083_v41  ;;  %v6122_v40 = vcombine.low %v1219_v9, %v1223_v27  ;;  %v6124_v41 = vcombine.low %v1220_v46, %v1224_v52  ;;  %v6133_v13 = vcombine.high %v1228_v37, %v1232_v39  ;;  %v1267_v27 = vld [vmem:[#allocation11 + $0xc00] sm:$0xff]  ;;  %v1268_v52 = vld [vmem:[#allocation11 + $0xc08] sm:$0xff] }
 0x25e   :  { %4253 = vmatprep.subr.bf16.mxu1 %v6085_v34  ;;  %v6131_v34 = vcombine.high %v1227_v35, %v1231_v36  ;;  %v1271_v46 = vld [vmem:[#allocation11 + $0xc20] sm:$0xff] }
 0x260   :  { %4090 = vmatpush1.bf16.msra.mxu0 %v6082_v5  ;;  %v1240_v5 = vld [vmem:[#allocation11 + $0xb28] sm:$0xff] }
 0x261   :  { %4254 = vmatpush1.bf16.msra.mxu1 %v6084_v4  ;;  %4091 = vmatprep.subr.bf16.mxu0 %v6091_v6  ;;  %v6130_v4 = vcombine.low %v1227_v35, %v1231_v36  ;;  %v6132_v6 = vcombine.low %v1228_v37, %v1232_v39  ;;  %v6141_v15 = vcombine.high %v1236_v11, %v1240_v5  ;;  %v1275_v36 = vld [vmem:[#allocation11 + $0xc40] sm:$0xff] }
 0x262   :  { %4255 = vmatprep.subr.bf16.mxu1 %v6093_v18  ;;  %v6139_v18 = vcombine.high %v1235_v3, %v1239_v0  ;;  %v1279_v37 = vld [vmem:[#allocation11 + $0xc60] sm:$0xff]  ;;  %v6170_v39 = vcombine.low %v1267_v27, %v1271_v46 }
 0x264   :  { %4092 = vmatpush1.bf16.msra.mxu0 %v6090_v24  ;;  %v1248_v24 = vld [vmem:[#allocation11 + $0xb68] sm:$0xff] }
 0x265   :  { %4256 = vmatpush1.bf16.msra.mxu1 %v6092_v25  ;;  %4093 = vmatprep.subr.bf16.mxu0 %v6099_v30  ;;  %v6138_v25 = vcombine.low %v1235_v3, %v1239_v0  ;;  %v6140_v30 = vcombine.low %v1236_v11, %v1240_v5  ;;  %v6149_v26 = vcombine.high %v1244_v32, %v1248_v24  ;;  %v1283_v0 = vld [vmem:[#allocation11 + $0xc80] sm:$0xff] }
 0x266   :  { %4257 = vmatprep.subr.bf16.mxu1 %v6101_v8  ;;  %v6147_v8 = vcombine.high %v1243_v19, %v1247_v21  ;;  %v6179_v3 = vcombine.high %v1275_v36, %v1279_v37  ;;  %v1287_v11 = vld [vmem:[#allocation11 + $0xca0] sm:$0xff]  ;;  %v7364_v5 = vpack.c.bf16 %v7327_v53, %v7327_v53  ;;  %v1292_v53 = vld [vmem:[#allocation11 + $0xcc8] sm:$0xff] }
 0x268   :  { %4094 = vmatpush1.bf16.msra.mxu0 %v6098_v17  ;;  %v1256_v17 = vld [vmem:[#allocation11 + $0xba8] sm:$0xff] }
 0x269   :  { %4258 = vmatpush1.bf16.msra.mxu1 %v6100_v38  ;;  %4095 = vmatprep.subr.bf16.mxu0 %v6107_v43  ;;  %v6146_v38 = vcombine.low %v1243_v19, %v1247_v21  ;;  %v6148_v43 = vcombine.low %v1244_v32, %v1248_v24  ;;  %v6157_v59 = vcombine.high %v1252_v44, %v1256_v17  ;;  %v1291_v32 = vld [vmem:[#allocation11 + $0xcc0] sm:$0xff] }
 0x26a   :  { %4259 = vmatprep.subr.bf16.mxu1 %v6109_v61  ;;  %v6155_v61 = vcombine.high %v1251_v42, %v1255_v10  ;;  %v6187_v19 = vcombine.high %v1283_v0, %v1287_v11  ;;  %v1295_v24 = vld [vmem:[#allocation11 + $0xce0] sm:$0xff] }
 0x26c   :  { %4096 = vmatpush1.bf16.msra.mxu0 %v6106_v63  ;;  %v1264_v63 = vld [vmem:[#allocation11 + $0xbe8] sm:$0xff] }
 0x26d   :  { %4260 = vmatpush1.bf16.msra.mxu1 %v6108_v33  ;;  %4097 = vmatprep.subr.bf16.mxu0 %v6115_v2  ;;  %v6154_v33 = vcombine.low %v1251_v42, %v1255_v10  ;;  %v6156_v2 = vcombine.low %v1252_v44, %v1256_v17  ;;  %v6165_v9 = vcombine.high %v1260_v60, %v1264_v63  ;;  %v1299_v10 = vld [vmem:[#allocation11 + $0xd00] sm:$0xff]  ;;  %v1300_v17 = vld [vmem:[#allocation11 + $0xd08] sm:$0xff] }
 0x26e   :  { %4261 = vmatprep.subr.bf16.mxu1 %v6117_v28  ;;  %v6163_v28 = vcombine.high %v1259_v50, %v1263_v1  ;;  %v1303_v44 = vld [vmem:[#allocation11 + $0xd20] sm:$0xff] }
 0x270   :  { %4098 = vmatpush1.bf16.msra.mxu0 %v6114_v16  ;;  %v1272_v16 = vld [vmem:[#allocation11 + $0xc28] sm:$0xff] }
 0x271   :  { %4262 = vmatpush1.bf16.msra.mxu1 %v6116_v7  ;;  %4099 = vmatprep.subr.bf16.mxu0 %v6123_v29  ;;  %v6162_v7 = vcombine.low %v1259_v50, %v1263_v1  ;;  %v6164_v29 = vcombine.low %v1260_v60, %v1264_v63  ;;  %v6173_v35 = vcombine.high %v1268_v52, %v1272_v16  ;;  %v1307_v1 = vld [vmem:[#allocation11 + $0xd40] sm:$0xff]  ;;  %v1308_v63 = vld [vmem:[#allocation11 + $0xd48] sm:$0xff] }
 0x272   :  { %4263 = vmatprep.subr.bf16.mxu1 %v6125_v51  ;;  %v6171_v51 = vcombine.high %v1267_v27, %v1271_v46  ;;  %v1311_v60 = vld [vmem:[#allocation11 + $0xd60] sm:$0xff] }
 0x273   :  { %v1315_v46 = vld [vmem:[#allocation11 + $0xd80] sm:$0xff] }
 0x274   :  { %4100 = vmatpush1.bf16.msra.mxu0 %v6122_v40  ;;  %v1276_v40 = vld [vmem:[#allocation11 + $0xc48] sm:$0xff] }
 0x275   :  { %4264 = vmatpush1.bf16.msra.mxu1 %v6124_v41  ;;  %4101 = vmatprep.subr.bf16.mxu0 %v6131_v34  ;;  %v1280_v41 = vld [vmem:[#allocation11 + $0xc68] sm:$0xff]  ;;  %v7359_v34 = vpack.c.bf16 %v7325_v62, %v7325_v62  ;;  %v6178_v62 = vcombine.low %v1275_v36, %v1279_v37  ;;  %v1323_v37 = vld [vmem:[#allocation11 + $0xdc0] sm:$0xff] }
 0x276   :  { %4265 = vmatprep.subr.bf16.mxu1 %v6133_v13  ;;  %v6172_v13 = vcombine.low %v1268_v52, %v1272_v16  ;;  %v1319_v52 = vld [vmem:[#allocation11 + $0xda0] sm:$0xff]  ;;  %v1316_v16 = vld [vmem:[#allocation11 + $0xd88] sm:$0xff] }
 0x278   :  { %4102 = vmatpush1.bf16.msra.mxu0 %v6130_v4  ;;  %v6181_v4 = vcombine.high %v1276_v40, %v1280_v41 }
 0x279   :  { %4266 = vmatpush1.bf16.msra.mxu1 %v6132_v6  ;;  %4103 = vmatprep.subr.bf16.mxu0 %v6139_v18  ;;  %v1284_v6 = vld [vmem:[#allocation11 + $0xc88] sm:$0xff] }
 0x27a   :  { %4267 = vmatprep.subr.bf16.mxu1 %v6141_v15  ;;  %v1288_v18 = vld [vmem:[#allocation11 + $0xca8] sm:$0xff]  ;;  %v6180_v15 = vcombine.low %v1276_v40, %v1280_v41 }
 0x27b   :  { %v6189_v21 = vcombine.high %v1284_v6, %v1288_v18  ;;  %v1324_v40 = vld [vmem:[#allocation11 + $0xdc8] sm:$0xff] }
 0x27c   :  { %4104 = vmatpush1.bf16.msra.mxu0 %v6138_v25  ;;  %v1296_v25 = vld [vmem:[#allocation11 + $0xce8] sm:$0xff] }
 0x27d   :  { %4268 = vmatpush1.bf16.msra.mxu1 %v6140_v30  ;;  %4105 = vmatprep.subr.bf16.mxu0 %v6147_v8  ;;  %v6186_v30 = vcombine.low %v1283_v0, %v1287_v11  ;;  %v6188_v8 = vcombine.low %v1284_v6, %v1288_v18  ;;  %v6197_v42 = vcombine.high %v1292_v53, %v1296_v25  ;;  %v1328_v41 = vld [vmem:[#allocation11 + $0xde8] sm:$0xff]  ;;  %v1335_v6 = vld [vmem:[#allocation11 + $0xe20] sm:$0xff] }
 0x27e   :  { %4269 = vmatprep.subr.bf16.mxu1 %v6149_v26  ;;  %v6195_v26 = vcombine.high %v1291_v32, %v1295_v24  ;;  %v6229_v11 = vcombine.high %v1324_v40, %v1328_v41  ;;  %v1332_v18 = vld [vmem:[#allocation11 + $0xe08] sm:$0xff] }
 0x280   :  { %4106 = vmatpush1.bf16.msra.mxu0 %v6146_v38  ;;  %v1304_v38 = vld [vmem:[#allocation11 + $0xd28] sm:$0xff] }
 0x281   :  { %4270 = vmatpush1.bf16.msra.mxu1 %v6148_v43  ;;  %4107 = vmatprep.subr.bf16.mxu0 %v6155_v61  ;;  %v6194_v43 = vcombine.low %v1291_v32, %v1295_v24  ;;  %v6196_v61 = vcombine.low %v1292_v53, %v1296_v25  ;;  %v6205_v50 = vcombine.high %v1300_v17, %v1304_v38  ;;  %v1339_v24 = vld [vmem:[#allocation11 + $0xe40] sm:$0xff]  ;;  %v1340_v25 = vld [vmem:[#allocation11 + $0xe48] sm:$0xff] }
 0x282   :  { %4271 = vmatprep.subr.bf16.mxu1 %v6157_v59  ;;  %v6203_v59 = vcombine.high %v1299_v10, %v1303_v44  ;;  %v1343_v53 = vld [vmem:[#allocation11 + $0xe60] sm:$0xff] }
 0x284   :  { %4108 = vmatpush1.bf16.msra.mxu0 %v6154_v33  ;;  %v1312_v33 = vld [vmem:[#allocation11 + $0xd68] sm:$0xff] }
 0x285   :  { %4272 = vmatpush1.bf16.msra.mxu1 %v6156_v2  ;;  %4109 = vmatprep.subr.bf16.mxu0 %v6163_v28  ;;  %v6202_v2 = vcombine.low %v1299_v10, %v1303_v44  ;;  %v6204_v28 = vcombine.low %v1300_v17, %v1304_v38  ;;  %v6213_v27 = vcombine.high %v1308_v63, %v1312_v33  ;;  %v1347_v44 = vld [vmem:[#allocation11 + $0xe80] sm:$0xff]  ;;  %v1348_v38 = vld [vmem:[#allocation11 + $0xe88] sm:$0xff] }
 0x286   :  { %4273 = vmatprep.subr.bf16.mxu1 %v6165_v9  ;;  %v6211_v9 = vcombine.high %v1307_v1, %v1311_v60  ;;  %v1351_v17 = vld [vmem:[#allocation11 + $0xea0] sm:$0xff] }
 0x288   :  { %4110 = vmatpush1.bf16.msra.mxu0 %v6162_v7  ;;  %v1320_v7 = vld [vmem:[#allocation11 + $0xda8] sm:$0xff] }
 0x289   :  { %4274 = vmatpush1.bf16.msra.mxu1 %v6164_v29  ;;  %4120 = vmatprep.subr.bf16.mxu0 %v6171_v51  ;;  %v6210_v29 = vcombine.low %v1307_v1, %v1311_v60  ;;  %v6212_v51 = vcombine.low %v1308_v63, %v1312_v33  ;;  %v6221_v36 = vcombine.high %v1316_v16, %v1320_v7  ;;  %v1355_v60 = vld [vmem:[#allocation11 + $0xec0] sm:$0xff]  ;;  %v1356_v33 = vld [vmem:[#allocation11 + $0xec8] sm:$0xff] }
 0x28a   :  { %4284 = vmatprep.subr.bf16.mxu1 %v6173_v35  ;;  %v6219_v35 = vcombine.high %v1315_v46, %v1319_v52  ;;  %v1359_v63 = vld [vmem:[#allocation11 + $0xee0] sm:$0xff] }
 0x28b   :  { %4112 = vmatmul.mubr.bf16.vlgmr.msra.gmra.mrb[8].mxu0 %v7359_v34 }
 0x28c   :  { %4276 = vmatmul.mubr.bf16.vlgmr.msra.gmra.mrb[8].mxu1 %v7359_v34  ;;  %4121 = vmatpush1.bf16.msra.mxu0 %v6170_v39  ;;  %v1327_v39 = vld [vmem:[#allocation11 + $0xde0] sm:$0xff] }
 0x28d   :  { %4152 = vmatprep.mubr.bf16.mxu0 %v7364_v5  ;;  %4285 = vmatpush1.bf16.msra.mxu1 %v6172_v13  ;;  %v6218_v13 = vcombine.low %v1315_v46, %v1319_v52  ;;  %v6227_v0 = vcombine.high %v1323_v37, %v1327_v39  ;;  %v1363_v52 = vld [vmem:[#allocation11 + $0xf00] sm:$0xff] }
 0x28e   :  { %4316 = vmatprep.mubr.bf16.mxu1 %v7364_v5  ;;  %4122 = vmatprep.subr.bf16.mxu0 %v6179_v3  ;;  %v6220_v3 = vcombine.low %v1316_v16, %v1320_v7  ;;  %v1367_v16 = vld [vmem:[#allocation11 + $0xf20] sm:$0xff]  ;;  %v1364_v7 = vld [vmem:[#allocation11 + $0xf08] sm:$0xff] }
 0x28f   :  { %4286 = vmatprep.subr.bf16.mxu1 %v6181_v4  ;;  %v1331_v4 = vld [vmem:[#allocation11 + $0xe00] sm:$0xff] }
 0x290   :  { %4123 = vmatpush1.bf16.msra.mxu0 %v6178_v62  ;;  %v1336_v62 = vld [vmem:[#allocation11 + $0xe28] sm:$0xff] }
 0x291   :  { %4287 = vmatpush1.bf16.msra.mxu1 %v6180_v15  ;;  %4124 = vmatprep.subr.bf16.mxu0 %v6187_v19  ;;  %v6226_v15 = vcombine.low %v1323_v37, %v1327_v39  ;;  %v6228_v19 = vcombine.low %v1324_v40, %v1328_v41  ;;  %v6237_v32 = vcombine.high %v1332_v18, %v1336_v62  ;;  %v1371_v39 = vld [vmem:[#allocation11 + $0xf40] sm:$0xff]  ;;  %v1372_v41 = vld [vmem:[#allocation11 + $0xf48] sm:$0xff] }
 0x292   :  { %4288 = vmatprep.subr.bf16.mxu1 %v6189_v21  ;;  %v6235_v21 = vcombine.high %v1331_v4, %v1335_v6  ;;  %v1375_v40 = vld [vmem:[#allocation11 + $0xf60] sm:$0xff] }
 0x294   :  { %4125 = vmatpush1.bf16.msra.mxu0 %v6186_v30  ;;  %v1344_v30 = vld [vmem:[#allocation11 + $0xe68] sm:$0xff] }
 0x295   :  { %4289 = vmatpush1.bf16.msra.mxu1 %v6188_v8  ;;  %4126 = vmatprep.subr.bf16.mxu0 %v6195_v26  ;;  %v6234_v8 = vcombine.low %v1331_v4, %v1335_v6  ;;  %v6236_v26 = vcombine.low %v1332_v18, %v1336_v62  ;;  %v6245_v10 = vcombine.high %v1340_v25, %v1344_v30  ;;  %v1379_v6 = vld [vmem:[#allocation11 + $0xf80] sm:$0xff]  ;;  %v1380_v62 = vld [vmem:[#allocation11 + $0xf88] sm:$0xff] }
 0x296   :  { %4290 = vmatprep.subr.bf16.mxu1 %v6197_v42  ;;  %v6243_v42 = vcombine.high %v1339_v24, %v1343_v53  ;;  %v1383_v18 = vld [vmem:[#allocation11 + $0xfa0] sm:$0xff] }
 0x298   :  { %4127 = vmatpush1.bf16.msra.mxu0 %v6194_v43  ;;  %v1352_v43 = vld [vmem:[#allocation11 + $0xea8] sm:$0xff] }
 0x299   :  { %4291 = vmatpush1.bf16.msra.mxu1 %v6196_v61  ;;  %4128 = vmatprep.subr.bf16.mxu0 %v6203_v59  ;;  %v6242_v61 = vcombine.low %v1339_v24, %v1343_v53  ;;  %v6244_v59 = vcombine.low %v1340_v25, %v1344_v30  ;;  %v6253_v1 = vcombine.high %v1348_v38, %v1352_v43  ;;  %v1387_v53 = vld [vmem:[#allocation11 + $0xfc0] sm:$0xff]  ;;  %v1388_v30 = vld [vmem:[#allocation11 + $0xfc8] sm:$0xff] }
 0x29a   :  { %4292 = vmatprep.subr.bf16.mxu1 %v6205_v50  ;;  %v6251_v50 = vcombine.high %v1347_v44, %v1351_v17  ;;  %v1391_v25 = vld [vmem:[#allocation11 + $0xfe0] sm:$0xff] }
 0x29c   :  { %4129 = vmatpush1.bf16.msra.mxu0 %v6202_v2  ;;  %v1360_v2 = vld [vmem:[#allocation11 + $0xee8] sm:$0xff] }
 0x29d   :  { %4293 = vmatpush1.bf16.msra.mxu1 %v6204_v28  ;;  %4130 = vmatprep.subr.bf16.mxu0 %v6211_v9  ;;  %v6250_v28 = vcombine.low %v1347_v44, %v1351_v17  ;;  %v6252_v9 = vcombine.low %v1348_v38, %v1352_v43  ;;  %v6261_v46 = vcombine.high %v1356_v33, %v1360_v2  ;;  %v885_v17 = vld [vmem:[#allocation11 + $0x10] sm:$0xff]  ;;  %v886_v43 = vld [vmem:[#allocation11 + $0x18] sm:$0xff] }
 0x29e   :  { %4294 = vmatprep.subr.bf16.mxu1 %v6213_v27  ;;  %v6259_v27 = vcombine.high %v1355_v60, %v1359_v63  ;;  %v889_v38 = vld [vmem:[#allocation11 + $0x30] sm:$0xff] }
 0x2a0   :  { %4131 = vmatpush1.bf16.msra.mxu0 %v6210_v29  ;;  %v1368_v29 = vld [vmem:[#allocation11 + $0xf28] sm:$0xff] }
 0x2a1   :  { %4295 = vmatpush1.bf16.msra.mxu1 %v6212_v51  ;;  %4132 = vmatprep.subr.bf16.mxu0 %v6219_v35  ;;  %v6258_v51 = vcombine.low %v1355_v60, %v1359_v63  ;;  %v6260_v35 = vcombine.low %v1356_v33, %v1360_v2  ;;  %v6269_v37 = vcombine.high %v1364_v7, %v1368_v29  ;;  %v893_v63 = vld [vmem:[#allocation11 + $0x50] sm:$0xff] }
 0x2a2   :  { %4296 = vmatprep.subr.bf16.mxu1 %v6221_v36  ;;  %v6267_v36 = vcombine.high %v1363_v52, %v1367_v16  ;;  %v897_v33 = vld [vmem:[#allocation11 + $0x70] sm:$0xff]  ;;  %v5790_v2 = vcombine.low %v885_v17, %v889_v38 }
 0x2a4   :  { %4133 = vmatpush1.bf16.msra.mxu0 %v6218_v13  ;;  %v1376_v13 = vld [vmem:[#allocation11 + $0xf68] sm:$0xff] }
 0x2a5   :  { %4297 = vmatpush1.bf16.msra.mxu1 %v6220_v3  ;;  %4134 = vmatprep.subr.bf16.mxu0 %v6227_v0  ;;  %v6266_v3 = vcombine.low %v1363_v52, %v1367_v16  ;;  %v6268_v0 = vcombine.low %v1364_v7, %v1368_v29  ;;  %v6277_v4 = vcombine.high %v1372_v41, %v1376_v13  ;;  %v901_v16 = vld [vmem:[#allocation11 + $0x90] sm:$0xff] }
 0x2a6   :  { %4298 = vmatprep.subr.bf16.mxu1 %v6229_v11  ;;  %v6275_v11 = vcombine.high %v1371_v39, %v1375_v40  ;;  %v5799_v52 = vcombine.high %v893_v63, %v897_v33  ;;  %v905_v7 = vld [vmem:[#allocation11 + $0xb0] sm:$0xff] }
 0x2a8   :  { %4135 = vmatpush1.bf16.msra.mxu0 %v6226_v15  ;;  %v1384_v15 = vld [vmem:[#allocation11 + $0xfa8] sm:$0xff] }
 0x2a9   :  { %4299 = vmatpush1.bf16.msra.mxu1 %v6228_v19  ;;  %4136 = vmatprep.subr.bf16.mxu0 %v6235_v21  ;;  %v6274_v19 = vcombine.low %v1371_v39, %v1375_v40  ;;  %v6276_v21 = vcombine.low %v1372_v41, %v1376_v13  ;;  %v6285_v24 = vcombine.high %v1380_v62, %v1384_v15  ;;  %v909_v40 = vld [vmem:[#allocation11 + $0xd0] sm:$0xff]  ;;  %v910_v13 = vld [vmem:[#allocation11 + $0xd8] sm:$0xff] }
 0x2aa   :  { %4300 = vmatprep.subr.bf16.mxu1 %v6237_v32  ;;  %v6283_v32 = vcombine.high %v1379_v6, %v1383_v18  ;;  %v913_v41 = vld [vmem:[#allocation11 + $0xf0] sm:$0xff] }
 0x2ac   :  { %4137 = vmatpush1.bf16.msra.mxu0 %v6234_v8  ;;  %v1392_v8 = vld [vmem:[#allocation11 + $0xfe8] sm:$0xff] }
 0x2ad   :  { %4301 = vmatpush1.bf16.msra.mxu1 %v6236_v26  ;;  %4138 = vmatprep.subr.bf16.mxu0 %v6243_v42  ;;  %v6282_v26 = vcombine.low %v1379_v6, %v1383_v18  ;;  %v6284_v42 = vcombine.low %v1380_v62, %v1384_v15  ;;  %v6293_v44 = vcombine.high %v1388_v30, %v1392_v8  ;;  %v917_v18 = vld [vmem:[#allocation11 + $0x110] sm:$0xff]  ;;  %v918_v15 = vld [vmem:[#allocation11 + $0x118] sm:$0xff] }
 0x2ae   :  { %4302 = vmatprep.subr.bf16.mxu1 %v6245_v10  ;;  %v6291_v10 = vcombine.high %v1387_v53, %v1391_v25  ;;  %v921_v62 = vld [vmem:[#allocation11 + $0x130] sm:$0xff] }
 0x2b0   :  { %4139 = vmatpush1.bf16.msra.mxu0 %v6242_v61  ;;  %v890_v61 = vld [vmem:[#allocation11 + $0x38] sm:$0xff] }
 0x2b1   :  { %4303 = vmatpush1.bf16.msra.mxu1 %v6244_v59  ;;  %4140 = vmatprep.subr.bf16.mxu0 %v6251_v50  ;;  %v6290_v59 = vcombine.low %v1387_v53, %v1391_v25  ;;  %v6292_v50 = vcombine.low %v1388_v30, %v1392_v8  ;;  %v5793_v60 = vcombine.high %v886_v43, %v890_v61  ;;  %v925_v53 = vld [vmem:[#allocation11 + $0x150] sm:$0xff]  ;;  %v926_v30 = vld [vmem:[#allocation11 + $0x158] sm:$0xff] }
 0x2b2   :  { %4304 = vmatprep.subr.bf16.mxu1 %v6253_v1  ;;  %v5791_v1 = vcombine.high %v885_v17, %v889_v38  ;;  %v929_v25 = vld [vmem:[#allocation11 + $0x170] sm:$0xff]  ;;  %v930_v8 = vld [vmem:[#allocation11 + $0x178] sm:$0xff] }
 0x2b3   :  { %v933_v17 = vld [vmem:[#allocation11 + $0x190] sm:$0xff] }
 0x2b4   :  { %4141 = vmatpush1.bf16.msra.mxu0 %v6250_v28  ;;  %v894_v28 = vld [vmem:[#allocation11 + $0x58] sm:$0xff]  ;;  %v937_v38 = vld [vmem:[#allocation11 + $0x1b0] sm:$0xff] }
 0x2b5   :  { %4305 = vmatpush1.bf16.msra.mxu1 %v6252_v9  ;;  %4142 = vmatprep.subr.bf16.mxu0 %v6259_v27  ;;  %v898_v9 = vld [vmem:[#allocation11 + $0x78] sm:$0xff]  ;;  %v7371_v27 = vpack.c.bf16 %v7331_v23, %v7331_v23 }
 0x2b6   :  { %4306 = vmatprep.subr.bf16.mxu1 %v6261_v46  ;;  %v5792_v46 = vcombine.low %v886_v43, %v890_v61  ;;  %v5801_v29 = vcombine.high %v894_v28, %v898_v9  ;;  %v5800_v23 = vcombine.low %v894_v28, %v898_v9  ;;  %v934_v43 = vld [vmem:[#allocation11 + $0x198] sm:$0xff]  ;;  %v5838_v9 = vcombine.low %v933_v17, %v937_v38 }
 0x2b7   :  { %v938_v61 = vld [vmem:[#allocation11 + $0x1b8] sm:$0xff] }
 0x2b8   :  { %4143 = vmatpush1.bf16.msra.mxu0 %v6258_v51  ;;  %v902_v51 = vld [vmem:[#allocation11 + $0x98] sm:$0xff] }
 0x2b9   :  { %4307 = vmatpush1.bf16.msra.mxu1 %v6260_v35  ;;  %4144 = vmatprep.subr.bf16.mxu0 %v6267_v36  ;;  %v906_v35 = vld [vmem:[#allocation11 + $0xb8] sm:$0xff]  ;;  %v5798_v36 = vcombine.low %v893_v63, %v897_v33  ;;  %v941_v63 = vld [vmem:[#allocation11 + $0x1d0] sm:$0xff] }
 0x2ba   :  { %4308 = vmatprep.subr.bf16.mxu1 %v6269_v37  ;;  %v5807_v37 = vcombine.high %v901_v16, %v905_v7  ;;  %v5809_v39 = vcombine.high %v902_v51, %v906_v35  ;;  %v945_v33 = vld [vmem:[#allocation11 + $0x1f0] sm:$0xff]  ;;  %v946_v28 = vld [vmem:[#allocation11 + $0x1f8] sm:$0xff] }
 0x2bc   :  { %4145 = vmatpush1.bf16.msra.mxu0 %v6266_v3  ;;  %v914_v3 = vld [vmem:[#allocation11 + $0xf8] sm:$0xff] }
 0x2bd   :  { %4309 = vmatpush1.bf16.msra.mxu1 %v6268_v0  ;;  %4146 = vmatprep.subr.bf16.mxu0 %v6275_v11  ;;  %v5806_v0 = vcombine.low %v901_v16, %v905_v7  ;;  %v5808_v11 = vcombine.low %v902_v51, %v906_v35  ;;  %v5817_v6 = vcombine.high %v910_v13, %v914_v3  ;;  %v949_v7 = vld [vmem:[#allocation11 + $0x210] sm:$0xff]  ;;  %v950_v51 = vld [vmem:[#allocation11 + $0x218] sm:$0xff] }
 0x2be   :  { %4310 = vmatprep.subr.bf16.mxu1 %v6277_v4  ;;  %v5815_v4 = vcombine.high %v909_v40, %v913_v41  ;;  %v954_v35 = vld [vmem:[#allocation11 + $0x238] sm:$0xff] }
 0x2c0   :  { %4147 = vmatpush1.bf16.msra.mxu0 %v6274_v19  ;;  %v922_v19 = vld [vmem:[#allocation11 + $0x138] sm:$0xff] }
 0x2c1   :  { %4311 = vmatpush1.bf16.msra.mxu1 %v6276_v21  ;;  %4148 = vmatprep.subr.bf16.mxu0 %v6283_v32  ;;  %v5816_v21 = vcombine.low %v910_v13, %v914_v3  ;;  %v5823_v32 = vcombine.high %v917_v18, %v921_v62  ;;  %v958_v13 = vld [vmem:[#allocation11 + $0x258] sm:$0xff] }
 0x2c2   :  { %4312 = vmatprep.subr.bf16.mxu1 %v6285_v24  ;;  %v5825_v24 = vcombine.high %v918_v15, %v922_v19  ;;  %v962_v3 = vld [vmem:[#allocation11 + $0x278] sm:$0xff] }
 0x2c4   :  { %4149 = vmatpush1.bf16.msra.mxu0 %v6282_v26  ;;  %v5822_v26 = vcombine.low %v917_v18, %v921_v62  ;;  %v965_v18 = vld [vmem:[#allocation11 + $0x290] sm:$0xff] }
 0x2c5   :  { %4313 = vmatpush1.bf16.msra.mxu1 %v6284_v42  ;;  %4150 = vmatprep.subr.bf16.mxu0 %v6291_v10  ;;  %v5824_v42 = vcombine.low %v918_v15, %v922_v19  ;;  %v5831_v10 = vcombine.high %v925_v53, %v929_v25  ;;  %v969_v62 = vld [vmem:[#allocation11 + $0x2b0] sm:$0xff]  ;;  %v966_v15 = vld [vmem:[#allocation11 + $0x298] sm:$0xff] }
 0x2c6   :  { %4314 = vmatprep.subr.bf16.mxu1 %v6293_v44  ;;  %v5833_v44 = vcombine.high %v926_v30, %v930_v8  ;;  %v970_v19 = vld [vmem:[#allocation11 + $0x2b8] sm:$0xff] }
 0x2c8   :  { %4151 = vmatpush1.bf16.msra.mxu0 %v6290_v59  ;;  %v5830_v59 = vcombine.low %v925_v53, %v929_v25  ;;  %v973_v53 = vld [vmem:[#allocation11 + $0x2d0] sm:$0xff] }
 0x2c9   :  { %4315 = vmatpush1.bf16.msra.mxu1 %v6292_v50  ;;  %4325 = vmatprep.subr.bf16.mxu0 %v5791_v1  ;;  %v5832_v50 = vcombine.low %v926_v30, %v930_v8  ;;  %v5839_v1 = vcombine.high %v933_v17, %v937_v38  ;;  %v977_v25 = vld [vmem:[#allocation11 + $0x2f0] sm:$0xff]  ;;  %v974_v30 = vld [vmem:[#allocation11 + $0x2d8] sm:$0xff] }
 0x2ca   :  { %4489 = vmatprep.subr.bf16.mxu1 %v5793_v60  ;;  %v5841_v60 = vcombine.high %v934_v43, %v938_v61  ;;  %v978_v8 = vld [vmem:[#allocation11 + $0x2f8] sm:$0xff]  ;;  %v981_v17 = vld [vmem:[#allocation11 + $0x310] sm:$0xff] }
 0x2cb   :  { %4153 = vmatmul.mubr.bf16.vlgmr.msra.gmra.mrb[8].mxu0 %v7371_v27  ;;  %v985_v38 = vld [vmem:[#allocation11 + $0x330] sm:$0xff] }
 0x2cc   :  { %4317 = vmatmul.mubr.bf16.vlgmr.msra.gmra.mrb[8].mxu1 %v7371_v27  ;;  %4326 = vmatpush1.bf16.msra.mxu0 %v5790_v2  ;;  %v942_v2 = vld [vmem:[#allocation11 + $0x1d8] sm:$0xff] }
 0x2cd   :  { %4357 = vmatprep.mubr.bf16.mxu0 %v7320_v56  ;;  %4490 = vmatpush1.bf16.msra.mxu1 %v5792_v46  ;;  %v5840_v46 = vcombine.low %v934_v43, %v938_v61  ;;  %v5849_v16 = vcombine.high %v942_v2, %v946_v28  ;;  %v982_v43 = vld [vmem:[#allocation11 + $0x318] sm:$0xff] }
 0x2ce   :  { %4521 = vmatprep.mubr.bf16.mxu1 %v7320_v56  ;;  %4327 = vmatprep.subr.bf16.mxu0 %v5799_v52  ;;  %v5814_v56 = vcombine.low %v909_v40, %v913_v41  ;;  %v5847_v52 = vcombine.high %v941_v63, %v945_v33  ;;  %v957_v40 = vld [vmem:[#allocation11 + $0x250] sm:$0xff]  ;;  %v986_v61 = vld [vmem:[#allocation11 + $0x338] sm:$0xff] }
 0x2cf   :  { %4491 = vmatprep.subr.bf16.mxu1 %v5801_v29  ;;  %v953_v29 = vld [vmem:[#allocation11 + $0x230] sm:$0xff] }
 0x2d0   :  { %4328 = vmatpush1.bf16.msra.mxu0 %v5798_v36  ;;  %v5846_v36 = vcombine.low %v941_v63, %v945_v33  ;;  %v961_v41 = vld [vmem:[#allocation11 + $0x270] sm:$0xff] }
 0x2d1   :  { %4492 = vmatpush1.bf16.msra.mxu1 %v5800_v23  ;;  %4329 = vmatprep.subr.bf16.mxu0 %v5807_v37  ;;  %v5848_v23 = vcombine.low %v942_v2, %v946_v28  ;;  %v5855_v37 = vcombine.high %v949_v7, %v953_v29  ;;  %v989_v63 = vld [vmem:[#allocation11 + $0x350] sm:$0xff]  ;;  %v990_v2 = vld [vmem:[#allocation11 + $0x358] sm:$0xff] }
 0x2d2   :  { %4493 = vmatprep.subr.bf16.mxu1 %v5809_v39  ;;  %v5857_v39 = vcombine.high %v950_v51, %v954_v35  ;;  %v993_v33 = vld [vmem:[#allocation11 + $0x370] sm:$0xff]  ;;  %v994_v28 = vld [vmem:[#allocation11 + $0x378] sm:$0xff] }
 0x2d4   :  { %4330 = vmatpush1.bf16.msra.mxu0 %v5806_v0  ;;  %v5854_v0 = vcombine.low %v949_v7, %v953_v29  ;;  %v997_v7 = vld [vmem:[#allocation11 + $0x390] sm:$0xff] }
 0x2d5   :  { %4494 = vmatpush1.bf16.msra.mxu1 %v5808_v11  ;;  %4331 = vmatprep.subr.bf16.mxu0 %v5815_v4  ;;  %v5856_v11 = vcombine.low %v950_v51, %v954_v35  ;;  %v5863_v4 = vcombine.high %v957_v40, %v961_v41  ;;  %v1001_v29 = vld [vmem:[#allocation11 + $0x3b0] sm:$0xff]  ;;  %v998_v51 = vld [vmem:[#allocation11 + $0x398] sm:$0xff] }
 0x2d6   :  { %4495 = vmatprep.subr.bf16.mxu1 %v5817_v6  ;;  %v5865_v6 = vcombine.high %v958_v13, %v962_v3  ;;  %v1002_v35 = vld [vmem:[#allocation11 + $0x3b8] sm:$0xff] }
 0x2d8   :  { %4332 = vmatpush1.bf16.msra.mxu0 %v5814_v56  ;;  %v5862_v56 = vcombine.low %v957_v40, %v961_v41  ;;  %v1005_v40 = vld [vmem:[#allocation11 + $0x3d0] sm:$0xff] }
 0x2d9   :  { %4496 = vmatpush1.bf16.msra.mxu1 %v5816_v21  ;;  %4333 = vmatprep.subr.bf16.mxu0 %v5823_v32  ;;  %v5864_v21 = vcombine.low %v958_v13, %v962_v3  ;;  %v5871_v32 = vcombine.high %v965_v18, %v969_v62  ;;  %v1009_v41 = vld [vmem:[#allocation11 + $0x3f0] sm:$0xff]  ;;  %v1006_v13 = vld [vmem:[#allocation11 + $0x3d8] sm:$0xff] }
 0x2da   :  { %4497 = vmatprep.subr.bf16.mxu1 %v5825_v24  ;;  %v5873_v24 = vcombine.high %v966_v15, %v970_v19  ;;  %v1010_v3 = vld [vmem:[#allocation11 + $0x3f8] sm:$0xff] }
 0x2dc   :  { %4334 = vmatpush1.bf16.msra.mxu0 %v5822_v26  ;;  %v5870_v26 = vcombine.low %v965_v18, %v969_v62  ;;  %v1013_v18 = vld [vmem:[#allocation11 + $0x410] sm:$0xff] }
 0x2dd   :  { %4498 = vmatpush1.bf16.msra.mxu1 %v5824_v42  ;;  %4335 = vmatprep.subr.bf16.mxu0 %v5831_v10  ;;  %v5872_v42 = vcombine.low %v966_v15, %v970_v19  ;;  %v5879_v10 = vcombine.high %v973_v53, %v977_v25  ;;  %v1017_v62 = vld [vmem:[#allocation11 + $0x430] sm:$0xff]  ;;  %v1014_v15 = vld [vmem:[#allocation11 + $0x418] sm:$0xff] }
 0x2de   :  { %4499 = vmatprep.subr.bf16.mxu1 %v5833_v44  ;;  %v5881_v44 = vcombine.high %v974_v30, %v978_v8  ;;  %v1018_v19 = vld [vmem:[#allocation11 + $0x438] sm:$0xff] }
 0x2e0   :  { %4336 = vmatpush1.bf16.msra.mxu0 %v5830_v59  ;;  %v5878_v59 = vcombine.low %v973_v53, %v977_v25  ;;  %v1021_v53 = vld [vmem:[#allocation11 + $0x450] sm:$0xff] }
 0x2e1   :  { %4500 = vmatpush1.bf16.msra.mxu1 %v5832_v50  ;;  %4337 = vmatprep.subr.bf16.mxu0 %v5839_v1  ;;  %v5880_v50 = vcombine.low %v974_v30, %v978_v8  ;;  %v5887_v1 = vcombine.high %v981_v17, %v985_v38  ;;  %v1025_v25 = vld [vmem:[#allocation11 + $0x470] sm:$0xff]  ;;  %v5918_v30 = vcombine.low %v1013_v18, %v1017_v62  ;;  %v1022_v8 = vld [vmem:[#allocation11 + $0x458] sm:$0xff] }
 0x2e2   :  { %4501 = vmatprep.subr.bf16.mxu1 %v5841_v60  ;;  %v5889_v60 = vcombine.high %v982_v43, %v986_v61 }
 0x2e4   :  { %4338 = vmatpush1.bf16.msra.mxu0 %v5838_v9  ;;  %v5886_v9 = vcombine.low %v981_v17, %v985_v38  ;;  %v1033_v17 = vld [vmem:[#allocation11 + $0x4b0] sm:$0xff] }
 0x2e5   :  { %4502 = vmatpush1.bf16.msra.mxu1 %v5840_v46  ;;  %4339 = vmatprep.subr.bf16.mxu0 %v5847_v52  ;;  %v5888_v46 = vcombine.low %v982_v43, %v986_v61  ;;  %v5895_v52 = vcombine.high %v989_v63, %v993_v33  ;;  %v1030_v43 = vld [vmem:[#allocation11 + $0x498] sm:$0xff] }
 0x2e6   :  { %4503 = vmatprep.subr.bf16.mxu1 %v5849_v16  ;;  %v5897_v16 = vcombine.high %v990_v2, %v994_v28  ;;  %v1034_v61 = vld [vmem:[#allocation11 + $0x4b8] sm:$0xff] }
 0x2e8   :  { %4340 = vmatpush1.bf16.msra.mxu0 %v5846_v36  ;;  %v5894_v36 = vcombine.low %v989_v63, %v993_v33  ;;  %v1037_v63 = vld [vmem:[#allocation11 + $0x4d0] sm:$0xff] }
 0x2e9   :  { %4504 = vmatpush1.bf16.msra.mxu1 %v5848_v23  ;;  %4341 = vmatprep.subr.bf16.mxu0 %v5855_v37  ;;  %v5896_v23 = vcombine.low %v990_v2, %v994_v28  ;;  %v5903_v37 = vcombine.high %v997_v7, %v1001_v29  ;;  %v1041_v33 = vld [vmem:[#allocation11 + $0x4f0] sm:$0xff]  ;;  %v1038_v2 = vld [vmem:[#allocation11 + $0x4d8] sm:$0xff] }
 0x2ea   :  { %4505 = vmatprep.subr.bf16.mxu1 %v5857_v39  ;;  %v5905_v39 = vcombine.high %v998_v51, %v1002_v35  ;;  %v1042_v28 = vld [vmem:[#allocation11 + $0x4f8] sm:$0xff] }
 0x2ec   :  { %4342 = vmatpush1.bf16.msra.mxu0 %v5854_v0  ;;  %v5902_v0 = vcombine.low %v997_v7, %v1001_v29  ;;  %v1049_v7 = vld [vmem:[#allocation11 + $0x530] sm:$0xff]  ;;  %v1046_v29 = vld [vmem:[#allocation11 + $0x518] sm:$0xff] }
 0x2ed   :  { %4506 = vmatpush1.bf16.msra.mxu1 %v5856_v11  ;;  %4343 = vmatprep.subr.bf16.mxu0 %v5863_v4  ;;  %v5904_v11 = vcombine.low %v998_v51, %v1002_v35  ;;  %v5911_v4 = vcombine.high %v1005_v40, %v1009_v41  ;;  %v1050_v51 = vld [vmem:[#allocation11 + $0x538] sm:$0xff]  ;;  %v5944_v35 = vcombine.low %v1038_v2, %v1042_v28 }
 0x2ee   :  { %4507 = vmatprep.subr.bf16.mxu1 %v5865_v6  ;;  %v5913_v6 = vcombine.high %v1006_v13, %v1010_v3 }
 0x2f0   :  { %4344 = vmatpush1.bf16.msra.mxu0 %v5862_v56  ;;  %v5910_v56 = vcombine.low %v1005_v40, %v1009_v41  ;;  %v1054_v40 = vld [vmem:[#allocation11 + $0x558] sm:$0xff] }
 0x2f1   :  { %4508 = vmatpush1.bf16.msra.mxu1 %v5864_v21  ;;  %4345 = vmatprep.subr.bf16.mxu0 %v5871_v32  ;;  %v5912_v21 = vcombine.low %v1006_v13, %v1010_v3  ;;  %v5919_v32 = vcombine.high %v1013_v18, %v1017_v62  ;;  %v1058_v41 = vld [vmem:[#allocation11 + $0x578] sm:$0xff]  ;;  %v5952_v3 = vcombine.low %v1046_v29, %v1050_v51 }
 0x2f2   :  { %4509 = vmatprep.subr.bf16.mxu1 %v5873_v24  ;;  %v5921_v24 = vcombine.high %v1014_v15, %v1018_v19  ;;  %v1062_v18 = vld [vmem:[#allocation11 + $0x598] sm:$0xff] }
 0x2f3   :  { %v1066_v62 = vld [vmem:[#allocation11 + $0x5b8] sm:$0xff] }
 0x2f4   :  { %4346 = vmatpush1.bf16.msra.mxu0 %v5870_v26  ;;  %v1026_v26 = vld [vmem:[#allocation11 + $0x478] sm:$0xff] }
 0x2f5   :  { %4510 = vmatpush1.bf16.msra.mxu1 %v5872_v42  ;;  %4347 = vmatprep.subr.bf16.mxu0 %v5879_v10  ;;  %v5920_v42 = vcombine.low %v1014_v15, %v1018_v19  ;;  %v5927_v10 = vcombine.high %v1021_v53, %v1025_v25  ;;  %v5929_v38 = vcombine.high %v1022_v8, %v1026_v26 }
 0x2f6   :  { %4511 = vmatprep.subr.bf16.mxu1 %v5881_v44  ;;  %v1029_v44 = vld [vmem:[#allocation11 + $0x490] sm:$0xff]  ;;  %v5960_v19 = vcombine.low %v1054_v40, %v1058_v41 }
 0x2f8   :  { %4348 = vmatpush1.bf16.msra.mxu0 %v5878_v59  ;;  %v5926_v59 = vcombine.low %v1021_v53, %v1025_v25  ;;  %v1070_v53 = vld [vmem:[#allocation11 + $0x5d8] sm:$0xff] }
 0x2f9   :  { %4512 = vmatpush1.bf16.msra.mxu1 %v5880_v50  ;;  %4349 = vmatprep.subr.bf16.mxu0 %v5887_v1  ;;  %v5928_v50 = vcombine.low %v1022_v8, %v1026_v26  ;;  %v5935_v1 = vcombine.high %v1029_v44, %v1033_v17  ;;  %v1074_v25 = vld [vmem:[#allocation11 + $0x5f8] sm:$0xff]  ;;  %v5968_v8 = vcombine.low %v1062_v18, %v1066_v62 }
 0x2fa   :  { %4513 = vmatprep.subr.bf16.mxu1 %v5889_v60  ;;  %v5937_v60 = vcombine.high %v1030_v43, %v1034_v61 }
 0x2fc   :  { %4350 = vmatpush1.bf16.msra.mxu0 %v5886_v9  ;;  %v5934_v9 = vcombine.low %v1029_v44, %v1033_v17  ;;  %v1081_v44 = vld [vmem:[#allocation11 + $0x630] sm:$0xff]  ;;  %v1078_v17 = vld [vmem:[#allocation11 + $0x618] sm:$0xff] }
 0x2fd   :  { %4514 = vmatpush1.bf16.msra.mxu1 %v5888_v46  ;;  %4351 = vmatprep.subr.bf16.mxu0 %v5895_v52  ;;  %v5943_v46 = vcombine.high %v1037_v63, %v1041_v33  ;;  %v5945_v52 = vcombine.high %v1038_v2, %v1042_v28 }
 0x2fe   :  { %4515 = vmatprep.subr.bf16.mxu1 %v5897_v16  ;;  %v1045_v16 = vld [vmem:[#allocation11 + $0x510] sm:$0xff] }
 0x2ff   :  { %v5950_v13 = vcombine.low %v1045_v16, %v1049_v7 }
 0x300   :  { %4352 = vmatpush1.bf16.msra.mxu0 %v5894_v36  ;;  %v5951_v36 = vcombine.high %v1045_v16, %v1049_v7  ;;  %v1094_v16 = vld [vmem:[#allocation11 + $0x698] sm:$0xff] }
 0x301   :  { %4516 = vmatpush1.bf16.msra.mxu1 %v5896_v23  ;;  %4353 = vmatprep.subr.bf16.mxu0 %v5903_v37  ;;  %v5953_v23 = vcombine.high %v1046_v29, %v1050_v51  ;;  %v1053_v37 = vld [vmem:[#allocation11 + $0x550] sm:$0xff]  ;;  %v1098_v7 = vld [vmem:[#allocation11 + $0x6b8] sm:$0xff] }
 0x302   :  { %4517 = vmatprep.subr.bf16.mxu1 %v5905_v39  ;;  %v1057_v39 = vld [vmem:[#allocation11 + $0x570] sm:$0xff] }
 0x303   :  { %v5958_v15 = vcombine.low %v1053_v37, %v1057_v39 }
 0x304   :  { %4354 = vmatpush1.bf16.msra.mxu0 %v5902_v0  ;;  %v5959_v0 = vcombine.high %v1053_v37, %v1057_v39  ;;  %v1102_v37 = vld [vmem:[#allocation11 + $0x6d8] sm:$0xff] }
 0x305   :  { %4518 = vmatpush1.bf16.msra.mxu1 %v5904_v11  ;;  %4355 = vmatprep.subr.bf16.mxu0 %v5911_v4  ;;  %v5961_v11 = vcombine.high %v1054_v40, %v1058_v41  ;;  %v1061_v4 = vld [vmem:[#allocation11 + $0x590] sm:$0xff]  ;;  %v1106_v39 = vld [vmem:[#allocation11 + $0x6f8] sm:$0xff]  ;;  %v6000_v41 = vcombine.low %v1094_v16, %v1098_v7 }
 0x306   :  { %4519 = vmatprep.subr.bf16.mxu1 %v5913_v6  ;;  %v1065_v6 = vld [vmem:[#allocation11 + $0x5b0] sm:$0xff] }
 0x308   :  { %4356 = vmatpush1.bf16.msra.mxu0 %v5910_v56  ;;  %v5967_v56 = vcombine.high %v1061_v4, %v1065_v6 }
 0x309   :  { %4520 = vmatpush1.bf16.msra.mxu1 %v5912_v21  ;;  %4366 = vmatprep.subr.bf16.mxu0 %v5919_v32  ;;  %v5969_v21 = vcombine.high %v1062_v18, %v1066_v62  ;;  %v1069_v32 = vld [vmem:[#allocation11 + $0x5d0] sm:$0xff]  ;;  %v6008_v62 = vcombine.low %v1102_v37, %v1106_v39 }
 0x30a   :  { %4530 = vmatprep.subr.bf16.mxu1 %v5921_v24  ;;  %v1073_v24 = vld [vmem:[#allocation11 + $0x5f0] sm:$0xff] }
 0x30b   :  { %4358 = vmatmul.mubr.bf16.vlgmr.msra.gmra.mrb[12].mxu0 %v7322_v14  ;;  %v5975_v26 = vcombine.high %v1069_v32, %v1073_v24 }
 0x30c   :  { %4522 = vmatmul.mubr.bf16.vlgmr.msra.gmra.mrb[12].mxu1 %v7322_v14  ;;  %4367 = vmatpush1.bf16.msra.mxu0 %v5918_v30  ;;  %v5936_v14 = vcombine.low %v1030_v43, %v1034_v61  ;;  %v5966_v30 = vcombine.low %v1061_v4, %v1065_v6  ;;  %v5974_v43 = vcombine.low %v1069_v32, %v1073_v24  ;;  %v1110_v4 = vld [vmem:[#allocation11 + $0x718] sm:$0xff] }
 0x30d   :  { %4398 = vmatprep.mubr.bf16.mxu0 %v7335_v31  ;;  %4531 = vmatpush1.bf16.msra.mxu1 %v5920_v42  ;;  %v5977_v42 = vcombine.high %v1070_v53, %v1074_v25  ;;  %v5976_v61 = vcombine.low %v1070_v53, %v1074_v25  ;;  %v1114_v6 = vld [vmem:[#allocation11 + $0x738] sm:$0xff] }
 0x30e   :  { %4562 = vmatprep.mubr.bf16.mxu1 %v7335_v31  ;;  %4368 = vmatprep.subr.bf16.mxu0 %v5927_v10  ;;  %v5942_v31 = vcombine.low %v1037_v63, %v1041_v33  ;;  %v1077_v10 = vld [vmem:[#allocation11 + $0x610] sm:$0xff]  ;;  %v1086_v63 = vld [vmem:[#allocation11 + $0x658] sm:$0xff]  ;;  %v6016_v25 = vcombine.low %v1110_v4, %v1114_v6 }
 0x30f   :  { %4532 = vmatprep.subr.bf16.mxu1 %v5929_v38  ;;  %v1082_v38 = vld [vmem:[#allocation11 + $0x638] sm:$0xff]  ;;  %v5982_v2 = vcombine.low %v1077_v10, %v1081_v44 }
 0x310   :  { %4369 = vmatpush1.bf16.msra.mxu0 %v5926_v59  ;;  %v5983_v59 = vcombine.high %v1077_v10, %v1081_v44  ;;  %v1090_v33 = vld [vmem:[#allocation11 + $0x678] sm:$0xff]  ;;  %v5984_v28 = vcombine.low %v1078_v17, %v1082_v38 }
 0x311   :  { %4533 = vmatpush1.bf16.msra.mxu1 %v5928_v50  ;;  %4370 = vmatprep.subr.bf16.mxu0 %v5935_v1  ;;  %v5985_v50 = vcombine.high %v1078_v17, %v1082_v38  ;;  %v1085_v1 = vld [vmem:[#allocation11 + $0x650] sm:$0xff]  ;;  %v5992_v51 = vcombine.low %v1086_v63, %v1090_v33  ;;  %v1118_v32 = vld [vmem:[#allocation11 + $0x758] sm:$0xff] }
 0x312   :  { %4534 = vmatprep.subr.bf16.mxu1 %v5937_v60  ;;  %v1089_v60 = vld [vmem:[#allocation11 + $0x670] sm:$0xff]  ;;  %v1122_v24 = vld [vmem:[#allocation11 + $0x778] sm:$0xff] }
 0x313   :  { %v5990_v29 = vcombine.low %v1085_v1, %v1089_v60  ;;  %v1126_v10 = vld [vmem:[#allocation11 + $0x798] sm:$0xff]  ;;  %v6024_v38 = vcombine.low %v1118_v32, %v1122_v24 }
 0x314   :  { %4371 = vmatpush1.bf16.msra.mxu0 %v5934_v9  ;;  %v5991_v9 = vcombine.high %v1085_v1, %v1089_v60  ;;  %v1130_v44 = vld [vmem:[#allocation11 + $0x7b8] sm:$0xff] }
 0x315   :  { %4535 = vmatpush1.bf16.msra.mxu1 %v5936_v14  ;;  %4372 = vmatprep.subr.bf16.mxu0 %v5943_v46  ;;  %v5993_v14 = vcombine.high %v1086_v63, %v1090_v33  ;;  %v1093_v46 = vld [vmem:[#allocation11 + $0x690] sm:$0xff]  ;;  %v1134_v1 = vld [vmem:[#allocation11 + $0x7d8] sm:$0xff]  ;;  %v6032_v33 = vcombine.low %v1126_v10, %v1130_v44 }
 0x316   :  { %4536 = vmatprep.subr.bf16.mxu1 %v5945_v52  ;;  %v1097_v52 = vld [vmem:[#allocation11 + $0x6b0] sm:$0xff]  ;;  %v1138_v60 = vld [vmem:[#allocation11 + $0x7f8] sm:$0xff] }
 0x317   :  { %v5998_v40 = vcombine.low %v1093_v46, %v1097_v52 }
 0x318   :  { %4373 = vmatpush1.bf16.msra.mxu0 %v5942_v31  ;;  %v5999_v31 = vcombine.high %v1093_v46, %v1097_v52  ;;  %v1142_v46 = vld [vmem:[#allocation11 + $0x818] sm:$0xff] }
 0x319   :  { %4537 = vmatpush1.bf16.msra.mxu1 %v5944_v35  ;;  %4374 = vmatprep.subr.bf16.mxu0 %v5951_v36  ;;  %v6001_v35 = vcombine.high %v1094_v16, %v1098_v7  ;;  %v1101_v36 = vld [vmem:[#allocation11 + $0x6d0] sm:$0xff]  ;;  %v1146_v52 = vld [vmem:[#allocation11 + $0x838] sm:$0xff]  ;;  %v6040_v7 = vcombine.low %v1134_v1, %v1138_v60 }
 0x31a   :  { %4538 = vmatprep.subr.bf16.mxu1 %v5953_v23  ;;  %v1105_v23 = vld [vmem:[#allocation11 + $0x6f0] sm:$0xff] }
 0x31b   :  { %v6006_v18 = vcombine.low %v1101_v36, %v1105_v23 }
 0x31c   :  { %4375 = vmatpush1.bf16.msra.mxu0 %v5950_v13  ;;  %v6007_v13 = vcombine.high %v1101_v36, %v1105_v23  ;;  %v1150_v23 = vld [vmem:[#allocation11 + $0x858] sm:$0xff] }
 0x31d   :  { %4539 = vmatpush1.bf16.msra.mxu1 %v5952_v3  ;;  %4376 = vmatprep.subr.bf16.mxu0 %v5959_v0  ;;  %v6009_v3 = vcombine.high %v1102_v37, %v1106_v39  ;;  %v1109_v0 = vld [vmem:[#allocation11 + $0x710] sm:$0xff]  ;;  %v1154_v37 = vld [vmem:[#allocation11 + $0x878] sm:$0xff]  ;;  %v6048_v39 = vcombine.low %v1142_v46, %v1146_v52 }
 0x31e   :  { %4540 = vmatprep.subr.bf16.mxu1 %v5961_v11  ;;  %v1113_v11 = vld [vmem:[#allocation11 + $0x730] sm:$0xff] }
 0x31f   :  { %v6014_v53 = vcombine.low %v1109_v0, %v1113_v11 }
 0x320   :  { %4377 = vmatpush1.bf16.msra.mxu0 %v5958_v15  ;;  %v6015_v15 = vcombine.high %v1109_v0, %v1113_v11  ;;  %v1158_v0 = vld [vmem:[#allocation11 + $0x898] sm:$0xff] }
 0x321   :  { %4541 = vmatpush1.bf16.msra.mxu1 %v5960_v19  ;;  %4378 = vmatprep.subr.bf16.mxu0 %v5967_v56  ;;  %v6017_v19 = vcombine.high %v1110_v4, %v1114_v6  ;;  %v1117_v56 = vld [vmem:[#allocation11 + $0x750] sm:$0xff]  ;;  %v1162_v11 = vld [vmem:[#allocation11 + $0x8b8] sm:$0xff]  ;;  %v6056_v6 = vcombine.low %v1150_v23, %v1154_v37 }
 0x322   :  { %4542 = vmatprep.subr.bf16.mxu1 %v5969_v21  ;;  %v1121_v21 = vld [vmem:[#allocation11 + $0x770] sm:$0xff] }
 0x323   :  { %v6022_v17 = vcombine.low %v1117_v56, %v1121_v21 }
 0x324   :  { %4379 = vmatpush1.bf16.msra.mxu0 %v5966_v30  ;;  %v6023_v30 = vcombine.high %v1117_v56, %v1121_v21  ;;  %v1166_v56 = vld [vmem:[#allocation11 + $0x8d8] sm:$0xff] }
 0x325   :  { %4543 = vmatpush1.bf16.msra.mxu1 %v5968_v8  ;;  %4380 = vmatprep.subr.bf16.mxu0 %v5975_v26  ;;  %v6025_v8 = vcombine.high %v1118_v32, %v1122_v24  ;;  %v1125_v26 = vld [vmem:[#allocation11 + $0x790] sm:$0xff]  ;;  %v1170_v21 = vld [vmem:[#allocation11 + $0x8f8] sm:$0xff] }
 0x326   :  { %4544 = vmatprep.subr.bf16.mxu1 %v5977_v42  ;;  %v1129_v42 = vld [vmem:[#allocation11 + $0x7b0] sm:$0xff] }
 0x327   :  { %v6030_v63 = vcombine.low %v1125_v26, %v1129_v42 }
 0x328   :  { %4381 = vmatpush1.bf16.msra.mxu0 %v5974_v43  ;;  %v6031_v43 = vcombine.high %v1125_v26, %v1129_v42  ;;  %v1178_v26 = vld [vmem:[#allocation11 + $0x938] sm:$0xff]  ;;  %v6072_v42 = vcombine.low %v1166_v56, %v1170_v21 }
 0x329   :  { %4545 = vmatpush1.bf16.msra.mxu1 %v5976_v61  ;;  %4382 = vmatprep.subr.bf16.mxu0 %v5983_v59  ;;  %v6033_v61 = vcombine.high %v1126_v10, %v1130_v44  ;;  %v1133_v59 = vld [vmem:[#allocation11 + $0x7d0] sm:$0xff] }
 0x32a   :  { %4546 = vmatprep.subr.bf16.mxu1 %v5985_v50  ;;  %v1137_v50 = vld [vmem:[#allocation11 + $0x7f0] sm:$0xff] }
 0x32b   :  { %v6038_v16 = vcombine.low %v1133_v59, %v1137_v50 }
 0x32c   :  { %4383 = vmatpush1.bf16.msra.mxu0 %v5982_v2  ;;  %v6039_v2 = vcombine.high %v1133_v59, %v1137_v50 }
 0x32d   :  { %4547 = vmatpush1.bf16.msra.mxu1 %v5984_v28  ;;  %4384 = vmatprep.subr.bf16.mxu0 %v5991_v9  ;;  %v6041_v28 = vcombine.high %v1134_v1, %v1138_v60  ;;  %v1141_v9 = vld [vmem:[#allocation11 + $0x810] sm:$0xff] }
 0x32e   :  { %4548 = vmatprep.subr.bf16.mxu1 %v5993_v14  ;;  %v1145_v14 = vld [vmem:[#allocation11 + $0x830] sm:$0xff] }
 0x32f   :  { %v6046_v36 = vcombine.low %v1141_v9, %v1145_v14 }
 0x330   :  { %4385 = vmatpush1.bf16.msra.mxu0 %v5990_v29  ;;  %v6047_v29 = vcombine.high %v1141_v9, %v1145_v14 }
 0x331   :  { %4549 = vmatpush1.bf16.msra.mxu1 %v5992_v51  ;;  %4386 = vmatprep.subr.bf16.mxu0 %v5999_v31  ;;  %v6049_v51 = vcombine.high %v1142_v46, %v1146_v52  ;;  %v1149_v31 = vld [vmem:[#allocation11 + $0x850] sm:$0xff] }
 0x332   :  { %4550 = vmatprep.subr.bf16.mxu1 %v6001_v35  ;;  %v1153_v35 = vld [vmem:[#allocation11 + $0x870] sm:$0xff] }
 0x333   :  { %v6054_v4 = vcombine.low %v1149_v31, %v1153_v35 }
 0x334   :  { %4387 = vmatpush1.bf16.msra.mxu0 %v5998_v40  ;;  %v6055_v40 = vcombine.high %v1149_v31, %v1153_v35 }
 0x335   :  { %4551 = vmatpush1.bf16.msra.mxu1 %v6000_v41  ;;  %4388 = vmatprep.subr.bf16.mxu0 %v6007_v13  ;;  %v1157_v41 = vld [vmem:[#allocation11 + $0x890] sm:$0xff] }
 0x336   :  { %4552 = vmatprep.subr.bf16.mxu1 %v6009_v3  ;;  %v1161_v13 = vld [vmem:[#allocation11 + $0x8b0] sm:$0xff]  ;;  %v6057_v3 = vcombine.high %v1150_v23, %v1154_v37 }
 0x337   :  { %v6062_v32 = vcombine.low %v1157_v41, %v1161_v13  ;;  %v1205_v37 = vld [vmem:[#allocation11 + $0xa10] sm:$0xff] }
 0x338   :  { %4389 = vmatpush1.bf16.msra.mxu0 %v6006_v18  ;;  %v6063_v18 = vcombine.high %v1157_v41, %v1161_v13  ;;  %v1210_v41 = vld [vmem:[#allocation11 + $0xa38] sm:$0xff] }
 0x339   :  { %4553 = vmatpush1.bf16.msra.mxu1 %v6008_v62  ;;  %4390 = vmatprep.subr.bf16.mxu0 %v6015_v15  ;;  %v6065_v62 = vcombine.high %v1158_v0, %v1162_v11  ;;  %v1165_v15 = vld [vmem:[#allocation11 + $0x8d0] sm:$0xff] }
 0x33a   :  { %4554 = vmatprep.subr.bf16.mxu1 %v6017_v19  ;;  %v1169_v19 = vld [vmem:[#allocation11 + $0x8f0] sm:$0xff] }
 0x33b   :  { %v6071_v24 = vcombine.high %v1165_v15, %v1169_v19 }
 0x33c   :  { %4391 = vmatpush1.bf16.msra.mxu0 %v6014_v53  ;;  %v6073_v53 = vcombine.high %v1166_v56, %v1170_v21 }
 0x33d   :  { %4555 = vmatpush1.bf16.msra.mxu1 %v6016_v25  ;;  %4392 = vmatprep.subr.bf16.mxu0 %v6023_v30  ;;  %v1173_v25 = vld [vmem:[#allocation11 + $0x910] sm:$0xff] }
 0x33e   :  { %4556 = vmatprep.subr.bf16.mxu1 %v6025_v8  ;;  %v1177_v30 = vld [vmem:[#allocation11 + $0x930] sm:$0xff]  ;;  %v1174_v8 = vld [vmem:[#allocation11 + $0x918] sm:$0xff] }
 0x33f   :  { %v6079_v10 = vcombine.high %v1173_v25, %v1177_v30  ;;  %v6081_v44 = vcombine.high %v1174_v8, %v1178_v26  ;;  %v6078_v59 = vcombine.low %v1173_v25, %v1177_v30  ;;  %v6080_v50 = vcombine.low %v1174_v8, %v1178_v26 }
 0x340   :  { %4393 = vmatpush1.bf16.msra.mxu0 %v6022_v17  ;;  %v1181_v17 = vld [vmem:[#allocation11 + $0x950] sm:$0xff] }
 0x341   :  { %4557 = vmatpush1.bf16.msra.mxu1 %v6024_v38  ;;  %4394 = vmatprep.subr.bf16.mxu0 %v6031_v43  ;;  %v1185_v38 = vld [vmem:[#allocation11 + $0x970] sm:$0xff]  ;;  %v1182_v43 = vld [vmem:[#allocation11 + $0x958] sm:$0xff] }
 0x342   :  { %4558 = vmatprep.subr.bf16.mxu1 %v6033_v61  ;;  %v1186_v61 = vld [vmem:[#allocation11 + $0x978] sm:$0xff]  ;;  %v6087_v1 = vcombine.high %v1181_v17, %v1185_v38  ;;  %v6086_v9 = vcombine.low %v1181_v17, %v1185_v38 }
 0x343   :  { %v6089_v60 = vcombine.high %v1182_v43, %v1186_v61  ;;  %v6088_v14 = vcombine.low %v1182_v43, %v1186_v61 }
 0x344   :  { %4395 = vmatpush1.bf16.msra.mxu0 %v6030_v63  ;;  %v1189_v63 = vld [vmem:[#allocation11 + $0x990] sm:$0xff] }
 0x345   :  { %4559 = vmatpush1.bf16.msra.mxu1 %v6032_v33  ;;  %4396 = vmatprep.subr.bf16.mxu0 %v6039_v2  ;;  %v1193_v33 = vld [vmem:[#allocation11 + $0x9b0] sm:$0xff]  ;;  %v1190_v2 = vld [vmem:[#allocation11 + $0x998] sm:$0xff] }
 0x346   :  { %4560 = vmatprep.subr.bf16.mxu1 %v6041_v28  ;;  %v1194_v28 = vld [vmem:[#allocation11 + $0x9b8] sm:$0xff]  ;;  %v6095_v46 = vcombine.high %v1189_v63, %v1193_v33  ;;  %v6094_v31 = vcombine.low %v1189_v63, %v1193_v33 }
 0x347   :  { %v6097_v52 = vcombine.high %v1190_v2, %v1194_v28  ;;  %v6096_v35 = vcombine.low %v1190_v2, %v1194_v28 }
 0x348   :  { %4397 = vmatpush1.bf16.msra.mxu0 %v6038_v16  ;;  %v1197_v16 = vld [vmem:[#allocation11 + $0x9d0] sm:$0xff] }
 0x349   :  { %4561 = vmatpush1.bf16.msra.mxu1 %v6040_v7  ;;  %4407 = vmatprep.subr.bf16.mxu0 %v6047_v29  ;;  %v1201_v7 = vld [vmem:[#allocation11 + $0x9f0] sm:$0xff]  ;;  %v1198_v29 = vld [vmem:[#allocation11 + $0x9d8] sm:$0xff] }
 0x34a   :  { %4571 = vmatprep.subr.bf16.mxu1 %v6049_v51  ;;  %v1202_v51 = vld [vmem:[#allocation11 + $0x9f8] sm:$0xff]  ;;  %v6102_v13 = vcombine.low %v1197_v16, %v1201_v7 }
 0x34b   :  { %4399 = vmatmul.mubr.bf16.vlgmr.msra.gmra.mrb[12].mxu0 %v7347_v20  ;;  %v6105_v23 = vcombine.high %v1198_v29, %v1202_v51 }
 0x34c   :  { %4563 = vmatmul.mubr.bf16.vlgmr.msra.gmra.mrb[12].mxu1 %v7347_v20  ;;  %4408 = vmatpush1.bf16.msra.mxu0 %v6046_v36  ;;  %v6064_v20 = vcombine.low %v1158_v0, %v1162_v11  ;;  %v6103_v36 = vcombine.high %v1197_v16, %v1201_v7 }
 0x34d   :  { %4439 = vmatprep.mubr.bf16.mxu0 %v7351_v22  ;;  %4572 = vmatpush1.bf16.msra.mxu1 %v6048_v39  ;;  %v1209_v39 = vld [vmem:[#allocation11 + $0xa30] sm:$0xff] }
 0x34e   :  { %4603 = vmatprep.mubr.bf16.mxu1 %v7351_v22  ;;  %4409 = vmatprep.subr.bf16.mxu0 %v6055_v40  ;;  %v6070_v22 = vcombine.low %v1165_v15, %v1169_v19  ;;  %v1206_v40 = vld [vmem:[#allocation11 + $0xa18] sm:$0xff]  ;;  %v6111_v0 = vcombine.high %v1205_v37, %v1209_v39  ;;  %v6110_v15 = vcombine.low %v1205_v37, %v1209_v39 }
 0x34f   :  { %4573 = vmatprep.subr.bf16.mxu1 %v6057_v3  ;;  %v6104_v3 = vcombine.low %v1198_v29, %v1202_v51  ;;  %v6113_v11 = vcombine.high %v1206_v40, %v1210_v41  ;;  %v6112_v19 = vcombine.low %v1206_v40, %v1210_v41 }
 0x350   :  { %4410 = vmatpush1.bf16.msra.mxu0 %v6054_v4  ;;  %v1213_v4 = vld [vmem:[#allocation11 + $0xa50] sm:$0xff] }
 0x351   :  { %4574 = vmatpush1.bf16.msra.mxu1 %v6056_v6  ;;  %4411 = vmatprep.subr.bf16.mxu0 %v6063_v18  ;;  %v1217_v6 = vld [vmem:[#allocation11 + $0xa70] sm:$0xff]  ;;  %v1214_v18 = vld [vmem:[#allocation11 + $0xa58] sm:$0xff] }
 0x352   :  { %4575 = vmatprep.subr.bf16.mxu1 %v6065_v62  ;;  %v1218_v62 = vld [vmem:[#allocation11 + $0xa78] sm:$0xff]  ;;  %v6119_v56 = vcombine.high %v1213_v4, %v1217_v6  ;;  %v6118_v25 = vcombine.low %v1213_v4, %v1217_v6 }
 0x353   :  { %v6121_v21 = vcombine.high %v1214_v18, %v1218_v62  ;;  %v6120_v30 = vcombine.low %v1214_v18, %v1218_v62 }
 0x354   :  { %4412 = vmatpush1.bf16.msra.mxu0 %v6062_v32  ;;  %v1221_v32 = vld [vmem:[#allocation11 + $0xa90] sm:$0xff] }
 0x355   :  { %4576 = vmatpush1.bf16.msra.mxu1 %v6064_v20  ;;  %4413 = vmatprep.subr.bf16.mxu0 %v6071_v24  ;;  %v1225_v20 = vld [vmem:[#allocation11 + $0xab0] sm:$0xff]  ;;  %v1222_v24 = vld [vmem:[#allocation11 + $0xa98] sm:$0xff] }
 0x356   :  { %4577 = vmatprep.subr.bf16.mxu1 %v6073_v53  ;;  %v1226_v53 = vld [vmem:[#allocation11 + $0xab8] sm:$0xff]  ;;  %v6127_v8 = vcombine.high %v1221_v32, %v1225_v20  ;;  %v6126_v17 = vcombine.low %v1221_v32, %v1225_v20 }
 0x357   :  { %v6129_v26 = vcombine.high %v1222_v24, %v1226_v53  ;;  %v6128_v38 = vcombine.low %v1222_v24, %v1226_v53 }
 0x358   :  { %4414 = vmatpush1.bf16.msra.mxu0 %v6070_v22  ;;  %v1229_v22 = vld [vmem:[#allocation11 + $0xad0] sm:$0xff] }
 0x359   :  { %4578 = vmatpush1.bf16.msra.mxu1 %v6072_v42  ;;  %4415 = vmatprep.subr.bf16.mxu0 %v6079_v10  ;;  %v1233_v42 = vld [vmem:[#allocation11 + $0xaf0] sm:$0xff]  ;;  %v1230_v10 = vld [vmem:[#allocation11 + $0xad8] sm:$0xff] }
 0x35a   :  { %4579 = vmatprep.subr.bf16.mxu1 %v6081_v44  ;;  %v1234_v44 = vld [vmem:[#allocation11 + $0xaf8] sm:$0xff]  ;;  %v6135_v43 = vcombine.high %v1229_v22, %v1233_v42  ;;  %v6134_v63 = vcombine.low %v1229_v22, %v1233_v42 }
 0x35b   :  { %v6137_v61 = vcombine.high %v1230_v10, %v1234_v44  ;;  %v6136_v33 = vcombine.low %v1230_v10, %v1234_v44  ;;  %v1282_v22 = vld [vmem:[#allocation11 + $0xc78] sm:$0xff]  ;;  %v1285_v44 = vld [vmem:[#allocation11 + $0xc90] sm:$0xff] }
 0x35c   :  { %4416 = vmatpush1.bf16.msra.mxu0 %v6078_v59  ;;  %v1237_v59 = vld [vmem:[#allocation11 + $0xb10] sm:$0xff] }
 0x35d   :  { %4580 = vmatpush1.bf16.msra.mxu1 %v6080_v50  ;;  %4417 = vmatprep.subr.bf16.mxu0 %v6087_v1  ;;  %v1241_v50 = vld [vmem:[#allocation11 + $0xb30] sm:$0xff]  ;;  %v1238_v1 = vld [vmem:[#allocation11 + $0xb18] sm:$0xff] }
 0x35e   :  { %4581 = vmatprep.subr.bf16.mxu1 %v6089_v60  ;;  %v1242_v60 = vld [vmem:[#allocation11 + $0xb38] sm:$0xff]  ;;  %v6143_v2 = vcombine.high %v1237_v59, %v1241_v50  ;;  %v6142_v16 = vcombine.low %v1237_v59, %v1241_v50 }
 0x35f   :  { %v6145_v28 = vcombine.high %v1238_v1, %v1242_v60  ;;  %v6144_v7 = vcombine.low %v1238_v1, %v1242_v60 }
 0x360   :  { %4418 = vmatpush1.bf16.msra.mxu0 %v6086_v9  ;;  %v1245_v9 = vld [vmem:[#allocation11 + $0xb50] sm:$0xff] }
 0x361   :  { %4582 = vmatpush1.bf16.msra.mxu1 %v6088_v14  ;;  %4419 = vmatprep.subr.bf16.mxu0 %v6095_v46  ;;  %v1249_v14 = vld [vmem:[#allocation11 + $0xb70] sm:$0xff]  ;;  %v1246_v46 = vld [vmem:[#allocation11 + $0xb58] sm:$0xff] }
 0x362   :  { %4583 = vmatprep.subr.bf16.mxu1 %v6097_v52  ;;  %v1250_v52 = vld [vmem:[#allocation11 + $0xb78] sm:$0xff]  ;;  %v6151_v29 = vcombine.high %v1245_v9, %v1249_v14  ;;  %v6150_v37 = vcombine.low %v1245_v9, %v1249_v14 }
 0x363   :  { %v6153_v51 = vcombine.high %v1246_v46, %v1250_v52  ;;  %v6152_v39 = vcombine.low %v1246_v46, %v1250_v52  ;;  %v1301_v52 = vld [vmem:[#allocation11 + $0xd10] sm:$0xff] }
 0x364   :  { %4420 = vmatpush1.bf16.msra.mxu0 %v6094_v31  ;;  %v1253_v31 = vld [vmem:[#allocation11 + $0xb90] sm:$0xff] }
 0x365   :  { %4584 = vmatpush1.bf16.msra.mxu1 %v6096_v35  ;;  %4421 = vmatprep.subr.bf16.mxu0 %v6103_v36  ;;  %v1257_v35 = vld [vmem:[#allocation11 + $0xbb0] sm:$0xff]  ;;  %v1254_v36 = vld [vmem:[#allocation11 + $0xb98] sm:$0xff] }
 0x366   :  { %4585 = vmatprep.subr.bf16.mxu1 %v6105_v23  ;;  %v1258_v23 = vld [vmem:[#allocation11 + $0xbb8] sm:$0xff]  ;;  %v6159_v40 = vcombine.high %v1253_v31, %v1257_v35  ;;  %v6158_v4 = vcombine.low %v1253_v31, %v1257_v35 }
 0x367   :  { %v6161_v41 = vcombine.high %v1254_v36, %v1258_v23  ;;  %v6160_v6 = vcombine.low %v1254_v36, %v1258_v23  ;;  %v7389_v36 = vld [vmem:[#allocation13] sm:$0xff]  ;;  %v7391_v23 = vld [vmem:[#allocation11 + $0xd50] sm:$0xff] }
 0x368   :  { %4422 = vmatpush1.bf16.msra.mxu0 %v6102_v13  ;;  %v1261_v13 = vld [vmem:[#allocation11 + $0xbd0] sm:$0xff] }
 0x369   :  { %4586 = vmatpush1.bf16.msra.mxu1 %v6104_v3  ;;  %4423 = vmatprep.subr.bf16.mxu0 %v6111_v0  ;;  %v1265_v3 = vld [vmem:[#allocation11 + $0xbf0] sm:$0xff]  ;;  %v1262_v0 = vld [vmem:[#allocation11 + $0xbd8] sm:$0xff] }
 0x36a   :  { %4587 = vmatprep.subr.bf16.mxu1 %v6113_v11  ;;  %v1266_v11 = vld [vmem:[#allocation11 + $0xbf8] sm:$0xff]  ;;  %v6167_v18 = vcombine.high %v1261_v13, %v1265_v3  ;;  %v6166_v32 = vcombine.low %v1261_v13, %v1265_v3  ;;  %v7401_v3 = vld [vmem:[#allocation11 + $0xdb0] sm:$0xff] }
 0x36b   :  { %v6169_v62 = vcombine.high %v1262_v0, %v1266_v11  ;;  %v6168_v20 = vcombine.low %v1262_v0, %v1266_v11  ;;  %v7403_v0 = vld [vmem:[#allocation11 + $0xd98] sm:$0xff] }
 0x36c   :  { %4424 = vmatpush1.bf16.msra.mxu0 %v6110_v15  ;;  %v1269_v15 = vld [vmem:[#allocation11 + $0xc10] sm:$0xff]  ;;  %v7405_v11 = vld [vmem:[#allocation11 + $0xdb8] sm:$0xff] }
 0x36d   :  { %4588 = vmatpush1.bf16.msra.mxu1 %v6112_v19  ;;  %4425 = vmatprep.subr.bf16.mxu0 %v6119_v56  ;;  %v1273_v19 = vld [vmem:[#allocation11 + $0xc30] sm:$0xff]  ;;  %v1270_v56 = vld [vmem:[#allocation11 + $0xc18] sm:$0xff] }
 0x36e   :  { %4589 = vmatprep.subr.bf16.mxu1 %v6121_v21  ;;  %v1274_v21 = vld [vmem:[#allocation11 + $0xc38] sm:$0xff]  ;;  %v6175_v24 = vcombine.high %v1269_v15, %v1273_v19 }
 0x36f   :  { %v6177_v53 = vcombine.high %v1270_v56, %v1274_v21  ;;  %v6176_v42 = vcombine.low %v1270_v56, %v1274_v21  ;;  %v1408_v56 = vrot.slane %v7389_v36, %v7147_v47  ;;  %v1404_v21 = vrot.slane %v7389_v36, %v7150_v48 }
 0x370   :  { %4426 = vmatpush1.bf16.msra.mxu0 %v6118_v25  ;;  %v1277_v25 = vld [vmem:[#allocation11 + $0xc50] sm:$0xff] }
 0x371   :  { %4590 = vmatpush1.bf16.msra.mxu1 %v6120_v30  ;;  %4427 = vmatprep.subr.bf16.mxu0 %v6127_v8  ;;  %v1281_v30 = vld [vmem:[#allocation11 + $0xc70] sm:$0xff]  ;;  %v6174_v8 = vcombine.low %v1269_v15, %v1273_v19  ;;  %v7413_v15 = vld [vmem:[#allocation11 + $0xdd8] sm:$0xff]  ;;  %v1400_v19 = vrot.slane %v7389_v36, %v7142_v45 }
 0x372   :  { %4591 = vmatprep.subr.bf16.mxu1 %v6129_v26  ;;  %v1278_v26 = vld [vmem:[#allocation11 + $0xc58] sm:$0xff]  ;;  %v6183_v10 = vcombine.high %v1277_v25, %v1281_v30  ;;  %v6182_v59 = vcombine.low %v1277_v25, %v1281_v30  ;;  %v1412_v25 = vrot.slane %v7389_v36, %v7153_v49 }
 0x373   :  { %v6184_v50 = vcombine.low %v1278_v26, %v1282_v22 }
 0x374   :  { %4428 = vmatpush1.bf16.msra.mxu0 %v6126_v17  ;;  %v1289_v17 = vld [vmem:[#allocation11 + $0xcb0] sm:$0xff] }
 0x375   :  { %4592 = vmatpush1.bf16.msra.mxu1 %v6128_v38  ;;  %4429 = vmatprep.subr.bf16.mxu0 %v6135_v43  ;;  %v6185_v38 = vcombine.high %v1278_v26, %v1282_v22  ;;  %v1286_v43 = vld [vmem:[#allocation11 + $0xc98] sm:$0xff]  ;;  %v6191_v1 = vcombine.high %v1285_v44, %v1289_v17  ;;  %v6190_v9 = vcombine.low %v1285_v44, %v1289_v17 }
 0x376   :  { %4593 = vmatprep.subr.bf16.mxu1 %v6137_v61  ;;  %v1290_v61 = vld [vmem:[#allocation11 + $0xcb8] sm:$0xff]  ;;  %v6224_v17 = vcombine.low %v7403_v0, %v7405_v11 }
 0x377   :  { %v6193_v60 = vcombine.high %v1286_v43, %v1290_v61  ;;  %v7437_v22 = vld [vmem:[#allocation11 + $0xe18] sm:$0xff] }
 0x378   :  { %4430 = vmatpush1.bf16.msra.mxu0 %v6134_v63  ;;  %v1293_v63 = vld [vmem:[#allocation11 + $0xcd0] sm:$0xff] }
 0x379   :  { %4594 = vmatpush1.bf16.msra.mxu1 %v6136_v33  ;;  %4431 = vmatprep.subr.bf16.mxu0 %v6143_v2  ;;  %v1297_v33 = vld [vmem:[#allocation11 + $0xcf0] sm:$0xff]  ;;  %v1294_v2 = vld [vmem:[#allocation11 + $0xcd8] sm:$0xff] }
 0x37a   :  { %4595 = vmatprep.subr.bf16.mxu1 %v6145_v28  ;;  %v1298_v28 = vld [vmem:[#allocation11 + $0xcf8] sm:$0xff]  ;;  %v6199_v14 = vcombine.high %v1293_v63, %v1297_v33 }
 0x37b   :  { %v6201_v46 = vcombine.high %v1294_v2, %v1298_v28 }
 0x37c   :  { %4432 = vmatpush1.bf16.msra.mxu0 %v6142_v16  ;;  %v1305_v16 = vld [vmem:[#allocation11 + $0xd30] sm:$0xff] }
 0x37d   :  { %4596 = vmatpush1.bf16.msra.mxu1 %v6144_v7  ;;  %4433 = vmatprep.subr.bf16.mxu0 %v6151_v29  ;;  %v1302_v7 = vld [vmem:[#allocation11 + $0xd18] sm:$0xff]  ;;  %v6207_v31 = vcombine.high %v1301_v52, %v1305_v16  ;;  %v6206_v13 = vcombine.low %v1301_v52, %v1305_v16 }
 0x37e   :  { %4597 = vmatprep.subr.bf16.mxu1 %v6153_v51  ;;  %v1306_v29 = vld [vmem:[#allocation11 + $0xd38] sm:$0xff]  ;;  %v6200_v51 = vcombine.low %v1294_v2, %v1298_v28  ;;  %v7465_v2 = vld [vmem:[#allocation11 + $0xeb0] sm:$0xff] }
 0x37f   :  { %v6209_v35 = vcombine.high %v1302_v7, %v1306_v29  ;;  %v7475_v52 = vld [vmem:[#allocation11 + $0xe98] sm:$0xff] }
 0x380   :  { %4434 = vmatpush1.bf16.msra.mxu0 %v6150_v37  ;;  %v7393_v37 = vld [vmem:[#allocation11 + $0xd70] sm:$0xff]  ;;  %v7477_v16 = vld [vmem:[#allocation11 + $0xeb8] sm:$0xff] }
 0x381   :  { %4598 = vmatpush1.bf16.msra.mxu1 %v6152_v39  ;;  %4435 = vmatprep.subr.bf16.mxu0 %v6159_v40  ;;  %v7395_v39 = vld [vmem:[#allocation11 + $0xd58] sm:$0xff]  ;;  %v6214_v30 = vcombine.low %v7391_v23, %v7393_v37 }
 0x382   :  { %4599 = vmatprep.subr.bf16.mxu1 %v6161_v41  ;;  %v7397_v40 = vld [vmem:[#allocation11 + $0xd78] sm:$0xff]  ;;  %v7399_v41 = vld [vmem:[#allocation11 + $0xd90] sm:$0xff] }
 0x383   :  { %v6223_v26 = vcombine.high %v7399_v41, %v7401_v3  ;;  %v6222_v44 = vcombine.low %v7399_v41, %v7401_v3 }
 0x384   :  { %4436 = vmatpush1.bf16.msra.mxu0 %v6158_v4  ;;  %v6208_v4 = vcombine.low %v1302_v7, %v1306_v29 }
 0x385   :  { %4600 = vmatpush1.bf16.msra.mxu1 %v6160_v6  ;;  %4437 = vmatprep.subr.bf16.mxu0 %v6167_v18  ;;  %v6215_v6 = vcombine.high %v7391_v23, %v7393_v37  ;;  %v7409_v18 = vld [vmem:[#allocation11 + $0xdd0] sm:$0xff] }
 0x386   :  { %4601 = vmatprep.subr.bf16.mxu1 %v6169_v62  ;;  %v7411_v62 = vld [vmem:[#allocation11 + $0xdf0] sm:$0xff] }
 0x387   :  { %v7485_v23 = vld [vmem:[#allocation11 + $0xed0] sm:$0xff] }
 0x388   :  { %4438 = vmatpush1.bf16.msra.mxu0 %v6166_v32  ;;  %v6217_v32 = vcombine.high %v7395_v39, %v7397_v40  ;;  %v7487_v37 = vld [vmem:[#allocation11 + $0xef0] sm:$0xff] }
 0x389   :  { %4602 = vmatpush1.bf16.msra.mxu1 %v6168_v20  ;;  %4448 = vmatprep.subr.bf16.mxu0 %v6175_v24  ;;  %v7423_v20 = vld [vmem:[#allocation11 + $0xdf8] sm:$0xff]  ;;  %v7425_v24 = vld [vmem:[#allocation11 + $0xe10] sm:$0xff] }
 0x38a   :  { %4612 = vmatprep.subr.bf16.mxu1 %v6177_v53  ;;  %v7427_v53 = vld [vmem:[#allocation11 + $0xe30] sm:$0xff] }
 0x38b   :  { %4440 = vmatmul.mubr.bf16.vlgmr.msra.gmra.mrb[12].mxu0 %v7359_v34 }
 0x38c   :  { %4604 = vmatmul.mubr.bf16.vlgmr.msra.gmra.mrb[12].mxu1 %v7359_v34  ;;  %4449 = vmatpush1.bf16.msra.mxu0 %v6174_v8  ;;  %v6192_v34 = vcombine.low %v1286_v43, %v1290_v61  ;;  %v6216_v8 = vcombine.low %v7395_v39, %v7397_v40  ;;  %v6231_v43 = vcombine.high %v7409_v18, %v7411_v62  ;;  %v7451_v61 = vld [vmem:[#allocation11 + $0xe70] sm:$0xff] }
 0x38d   :  { %4480 = vmatprep.mubr.bf16.mxu0 %v7364_v5  ;;  %4613 = vmatpush1.bf16.msra.mxu1 %v6176_v42  ;;  %v7439_v42 = vld [vmem:[#allocation11 + $0xe38] sm:$0xff] }
 0x38e   :  { %4644 = vmatprep.mubr.bf16.mxu1 %v7364_v5  ;;  %4450 = vmatprep.subr.bf16.mxu0 %v6183_v10  ;;  %v6198_v5 = vcombine.low %v1293_v63, %v1297_v33  ;;  %v7441_v10 = vld [vmem:[#allocation11 + $0xe50] sm:$0xff]  ;;  %v6233_v63 = vcombine.high %v7413_v15, %v7423_v20 }
 0x38f   :  { %4614 = vmatprep.subr.bf16.mxu1 %v6185_v38  ;;  %v6225_v38 = vcombine.high %v7403_v0, %v7405_v11  ;;  %v7463_v33 = vld [vmem:[#allocation11 + $0xe90] sm:$0xff] }
 0x390   :  { %4451 = vmatpush1.bf16.msra.mxu0 %v6182_v59  ;;  %v7453_v59 = vld [vmem:[#allocation11 + $0xe58] sm:$0xff] }
 0x391   :  { %4615 = vmatpush1.bf16.msra.mxu1 %v6184_v50  ;;  %4452 = vmatprep.subr.bf16.mxu0 %v6191_v1  ;;  %v7455_v50 = vld [vmem:[#allocation11 + $0xe78] sm:$0xff]  ;;  %v6230_v1 = vcombine.low %v7409_v18, %v7411_v62 }
 0x392   :  { %4616 = vmatprep.subr.bf16.mxu1 %v6193_v60  ;;  %v6232_v60 = vcombine.low %v7413_v15, %v7423_v20 }
 0x394   :  { %4453 = vmatpush1.bf16.msra.mxu0 %v6190_v9 }
 0x395   :  { %4617 = vmatpush1.bf16.msra.mxu1 %v6192_v34  ;;  %4454 = vmatprep.subr.bf16.mxu0 %v6199_v14  ;;  %v6239_v34 = vcombine.high %v7425_v24, %v7427_v53 }
 0x396   :  { %4618 = vmatprep.subr.bf16.mxu1 %v6201_v46  ;;  %v6241_v46 = vcombine.high %v7437_v22, %v7439_v42 }
 0x398   :  { %4455 = vmatpush1.bf16.msra.mxu0 %v6198_v5 }
 0x399   :  { %4619 = vmatpush1.bf16.msra.mxu1 %v6200_v51  ;;  %4456 = vmatprep.subr.bf16.mxu0 %v6207_v31 }
 0x39a   :  { %4620 = vmatprep.subr.bf16.mxu1 %v6209_v35 }
 0x39c   :  { %4457 = vmatpush1.bf16.msra.mxu0 %v6206_v13 }
 0x39d   :  { %4621 = vmatpush1.bf16.msra.mxu1 %v6208_v4  ;;  %4458 = vmatprep.subr.bf16.mxu0 %v6215_v6  ;;  %v7493_v6 = vld [vmem:[#allocation11 + $0xed8] sm:$0xff] }
 0x39e   :  { %v4154_v28 = vpop.f32.mrb[8].mxu0  ;;  %4622 = vmatprep.subr.bf16.mxu1 %v6217_v32 }
 0x39f   :  { %v6451_v7 = vadd.f32 %v4154_v28, %v1400_v19  ;;  %v4318_v29 = vpop.f32.mrb[8].mxu1  ;;  %v4156_v5 = vpop.f32.mrb[9].mxu0  ;;  %v7495_v19 = vld [vmem:[#allocation11 + $0xef8] sm:$0xff] }
 0x3a0   :  { %v6453_v39 = vadd.f32 %v4318_v29, %v1408_v56  ;;  %v6452_v40 = vadd.f32 %v4156_v5, %v1404_v21  ;;  %v4320_v41 = vpop.f32.mrb[9].mxu1  ;;  %v4158_v13 = vpop.f32.mrb[10].mxu0  ;;  %4459 = vmatpush1.bf16.msra.mxu0 %v6214_v30 }
 0x3a1   :  { %v7497_v32 = vmax.f32 %v6451_v7, 0.0  ;;  %v6454_v28 = vadd.f32 %v4320_v41, %v1412_v25  ;;  %v4322_v35 = vpop.f32.mrb[10].mxu1  ;;  %4623 = vmatpush1.bf16.msra.mxu1 %v6216_v8  ;;  %v4159_v56 = vpop.f32.mrb[11].mxu0  ;;  %4460 = vmatprep.subr.bf16.mxu0 %v6223_v26 }
 0x3a2   :  { %v7503_v29 = vmax.f32 %v6453_v39, 0.0  ;;  %v7505_v5 = vmax.f32 %v6452_v40, 0.0  ;;  %v4323_v13 = vpop.f32.mrb[11].mxu1  ;;  %4624 = vmatprep.subr.bf16.mxu1 %v6225_v38 }
 0x3a3   :  { %v4663_v8 = vrot.slane %v7497_v32, 4  ;;  %v4711_v26 = vmul.f32 %v7497_v32, %v7497_v32  ;;  %v7514_v35 = vmax.f32 %v6454_v28, 0.0 }
 0x3a4   :  { %v4675_v40 = vrot.slane %v7503_v29, 4  ;;  %v4713_v38 = vmul.f32 %v7503_v29, %v7503_v29  ;;  %v4669_v41 = vrot.slane %v7505_v5, 4  ;;  %v4712_v56 = vmul.f32 %v7505_v5, %v7505_v5  ;;  %4461 = vmatpush1.bf16.msra.mxu0 %v6222_v44 }
 0x3a5   :  { %v4664_v13 = vadd.f32 %v4663_v8, %v7497_v32  ;;  %v4719_v25 = vrot.slane %v4711_v26, 4  ;;  %v4681_v28 = vrot.slane %v7514_v35, 4  ;;  %v4714_v30 = vmul.f32 %v7514_v35, %v7514_v35  ;;  %4625 = vmatpush1.bf16.msra.mxu1 %v6224_v17  ;;  %4462 = vmatprep.subr.bf16.mxu0 %v6231_v43 }
 0x3a6   :  { %v4676_v39 = vadd.f32 %v4675_v40, %v7503_v29  ;;  %v4731_v21 = vrot.slane %v4713_v38, 4  ;;  %v4670_v44 = vadd.f32 %v4669_v41, %v7505_v5  ;;  %v4725_v8 = vrot.slane %v4712_v56, 4  ;;  %4626 = vmatprep.subr.bf16.mxu1 %v6233_v63 }
 0x3a7   :  { %v4665_v7 = vrot.slane %v4664_v13, 2  ;;  %v4720_v4 = vadd.f32 %v4719_v25, %v4711_v26  ;;  %v4682_v51 = vadd.f32 %v4681_v28, %v7514_v35  ;;  %v4737_v3 = vrot.slane %v4714_v30, 4 }
 0x3a8   :  { %v4677_v31 = vrot.slane %v4676_v39, 2  ;;  %v4732_v14 = vadd.f32 %v4731_v21, %v4713_v38  ;;  %v4671_v0 = vrot.slane %v4670_v44, 2  ;;  %v4726_v11 = vadd.f32 %v4725_v8, %v4712_v56  ;;  %4463 = vmatpush1.bf16.msra.mxu0 %v6230_v1 }
 0x3a9   :  { %v4666_v17 = vadd.f32 %v4665_v7, %v4664_v13  ;;  %v4721_v43 = vrot.slane %v4720_v4, 2  ;;  %v4683_v40 = vrot.slane %v4682_v51, 2  ;;  %v4738_v9 = vadd.f32 %v4737_v3, %v4714_v30  ;;  %4627 = vmatpush1.bf16.msra.mxu1 %v6232_v60  ;;  %4464 = vmatprep.subr.bf16.mxu0 %v6239_v34 }
 0x3aa   :  { %v4678_v63 = vadd.f32 %v4677_v31, %v4676_v39  ;;  %v4733_v21 = vrot.slane %v4732_v14, 2  ;;  %v4672_v25 = vadd.f32 %v4671_v0, %v4670_v44  ;;  %v4727_v26 = vrot.slane %v4726_v11, 2  ;;  %4628 = vmatprep.subr.bf16.mxu1 %v6241_v46 }
 0x3ab   :  { %v4667_v18 = vrot.slane %v4666_v17, 1  ;;  %v4722_v62 = vadd.f32 %v4721_v43, %v4720_v4  ;;  %v4684_v1 = vadd.f32 %v4683_v40, %v4682_v51  ;;  %v4739_v3 = vrot.slane %v4738_v9, 2 }
 0x3ac   :  { %v4679_v30 = vrot.slane %v4678_v63, 1  ;;  %v4734_v7 = vadd.f32 %v4733_v21, %v4732_v14  ;;  %v4673_v15 = vrot.slane %v4672_v25, 1  ;;  %v4728_v20 = vadd.f32 %v4727_v26, %v4726_v11 }
 0x3ad   :  { %v7720_v60 = vcombine.low %v7425_v24, %v7427_v53  ;;  %v4668_v34 = vadd.f32 %v4667_v18, %v4666_v17  ;;  %v4723_v31 = vrot.slane %v4722_v62, 1  ;;  %v4685_v39 = vrot.slane %v4684_v1, 1  ;;  %v1365_v18 = vld [vmem:[#allocation11 + $0xf10] sm:$0xff] }
 0x3ae   :  { %v4740_v38 = vadd.f32 %v4739_v3, %v4738_v9  ;;  %v7721_v41 = vcombine.low %v7437_v22, %v7439_v42  ;;  %v7722_v46 = vcombine.high %v7441_v10, %v7451_v61  ;;  %v4680_v51 = vadd.f32 %v4679_v30, %v4678_v63  ;;  %v1366_v30 = vld [vmem:[#allocation11 + $0xf18] sm:$0xff] }
 0x3af   :  { %4465 = vmatpush1.bf16.msra.mxu0 %v7720_v60  ;;  %v4735_v14 = vrot.slane %v4734_v7, 1  ;;  %v4729_v4 = vrot.slane %v4728_v20, 1  ;;  %v7723_v56 = vcombine.high %v7453_v59, %v7455_v50  ;;  %v4674_v24 = vadd.f32 %v4673_v15, %v4672_v25 }
 0x3b0   :  { %4629 = vmatpush1.bf16.msra.mxu1 %v7721_v41  ;;  %4466 = vmatprep.subr.bf16.mxu0 %v7722_v46  ;;  %v4724_v53 = vadd.f32 %v4723_v31, %v4722_v62  ;;  %v7561_v13 = vmul.f32 0.125, %v4668_v34  ;;  %v4686_v9 = vadd.f32 %v4685_v39, %v4684_v1  ;;  %v4741_v28 = vrot.slane %v4740_v38, 1  ;;  %v1369_v62 = vld [vmem:[#allocation11 + $0xf30] sm:$0xff] }
 0x3b1   :  { %4630 = vmatprep.subr.bf16.mxu1 %v7723_v56  ;;  %v4736_v44 = vadd.f32 %v4735_v14, %v4734_v7  ;;  %v7563_v22 = vmul.f32 0.125, %v4680_v51  ;;  %v4730_v42 = vadd.f32 %v4729_v4, %v4728_v20  ;;  %v7724_v8 = vcombine.low %v7441_v10, %v7451_v61  ;;  %v1370_v7 = vld [vmem:[#allocation11 + $0xf38] sm:$0xff]  ;;  %v1373_v4 = vld [vmem:[#allocation11 + $0xf50] sm:$0xff] }
 0x3b2   :  { %v7568_v0 = vmul.f32 0.125, %v4674_v24  ;;  %v4775_v11 = vmul.f32 0.125, %v4724_v53  ;;  %v4783_v17 = vmul.f32 %v7561_v13, %v7561_v13  ;;  %v4742_v43 = vadd.f32 %v4741_v28, %v4740_v38  ;;  %v1377_v56 = vld [vmem:[#allocation11 + $0xf70] sm:$0xff] }
 0x3b3   :  { %4467 = vmatpush1.bf16.msra.mxu0 %v7724_v8  ;;  %v7572_v40 = vmul.f32 0.125, %v4686_v9  ;;  %v7725_v63 = vcombine.low %v7453_v59, %v7455_v50  ;;  %v7726_v21 = vcombine.high %v7463_v33, %v7465_v2  ;;  %v4777_v25 = vmul.f32 0.125, %v4736_v44  ;;  %v1378_v9 = vld [vmem:[#allocation11 + $0xf78] sm:$0xff] }
 0x3b4   :  { %v4785_v10 = vmul.f32 %v7563_v22, %v7563_v22  ;;  %v4776_v61 = vmul.f32 0.125, %v4730_v42  ;;  %v7727_v26 = vcombine.high %v7475_v52, %v7477_v16  ;;  %v4784_v1 = vmul.f32 %v7568_v0, %v7568_v0 }
 0x3b5   :  { %4631 = vmatpush1.bf16.msra.mxu1 %v7725_v63  ;;  %4468 = vmatprep.subr.bf16.mxu0 %v7726_v21  ;;  %v4791_v59 = vsub.f32 %v4775_v11, %v4783_v17  ;;  %v4778_v50 = vmul.f32 0.125, %v4742_v43  ;;  %v4786_v3 = vmul.f32 %v7572_v40, %v7572_v40  ;;  %v7728_v20 = vcombine.low %v7463_v33, %v7465_v2  ;;  %v1385_v11 = vld [vmem:[#allocation11 + $0xfb0] sm:$0xff]  ;;  %v1382_v17 = vld [vmem:[#allocation11 + $0xf98] sm:$0xff] }
 0x3b6   :  { %4632 = vmatprep.subr.bf16.mxu1 %v7727_v26  ;;  %v4793_v15 = vsub.f32 %v4777_v25, %v4785_v10  ;;  %v6262_v60 = vcombine.low %v7485_v23, %v7487_v37  ;;  %v4792_v34 = vsub.f32 %v4776_v61, %v4784_v1  ;;  %v7729_v38 = vcombine.low %v7475_v52, %v7477_v16  ;;  %v1374_v16 = vld [vmem:[#allocation11 + $0xf58] sm:$0xff]  ;;  %v1389_v61 = vld [vmem:[#allocation11 + $0xfd0] sm:$0xff] }
 0x3b7   :  { %4469 = vmatpush1.bf16.msra.mxu0 %v7728_v20  ;;  %v4799_v31 = vmax.f32 %v4791_v59, 0.0  ;;  %v4794_v39 = vsub.f32 %v4778_v50, %v4786_v3  ;;  %v7730_v41 = vcombine.high %v7485_v23, %v7487_v37  ;;  %v6264_v46 = vcombine.low %v7493_v6, %v7495_v19  ;;  %v1386_v43 = vld [vmem:[#allocation11 + $0xfb8] sm:$0xff]  ;;  %v1393_v26 = vld [vmem:[#allocation11 + $0xff0] sm:$0xff] }
 0x3b8   :  { %v6271_v51 = vcombine.high %v1365_v18, %v1369_v62  ;;  %v4801_v33 = vmax.f32 %v4793_v15, 0.0  ;;  %v7731_v2 = vcombine.high %v7493_v6, %v7495_v19  ;;  %v6273_v14 = vcombine.high %v1366_v30, %v1370_v7  ;;  %v1381_v19 = vld [vmem:[#allocation11 + $0xf90] sm:$0xff] }
 0x3b9   :  { %4633 = vmatpush1.bf16.msra.mxu1 %v7729_v38  ;;  %4470 = vmatprep.subr.bf16.mxu0 %v7730_v41  ;;  %v4800_v24 = vmax.f32 %v4792_v34, 0.0  ;;  %v4807_v53 = vadd.f32 1e-05, %v4799_v31  ;;  %v4802_v52 = vmax.f32 %v4794_v39, 0.0  ;;  %v6270_v23 = vcombine.low %v1365_v18, %v1369_v62  ;;  %v1390_v18 = vld [vmem:[#allocation11 + $0xfd8] sm:$0xff] }
 0x3ba   :  { %4634 = vmatprep.subr.bf16.mxu1 %v7731_v2  ;;  %v4809_v28 = vadd.f32 1e-05, %v4801_v33  ;;  %v6272_v42 = vcombine.low %v1366_v30, %v1370_v7  ;;  %v6279_v8 = vcombine.high %v1373_v4, %v1377_v56  ;;  %v6281_v6 = vcombine.high %v1374_v16, %v1378_v9  ;;  %v1394_v62 = vld [vmem:[#allocation11 + $0xff8] sm:$0xff] }
 0x3bb   :  { %4471 = vmatpush1.bf16.msra.mxu0 %v6262_v60  ;;  %v4808_v37 = vadd.f32 1e-05, %v4800_v24  ;;  %6605 = vrsqrt.f32 %v4807_v53  ;;  %v4810_v44 = vadd.f32 1e-05, %v4802_v52  ;;  %v6278_v63 = vcombine.low %v1373_v4, %v1377_v56  ;;  %v6526_v33 = vld [vmem:[#allocation17 + $0xc0] sm:$0xff]   ;;  %v6529_v4 = vld [vmem:[#allocation17 + $0x48] sm:$0xff]  }
 0x3bc   :  { %4472 = vmatprep.subr.bf16.mxu0 %v6271_v51  ;;  %6607 = vrsqrt.f32 %v4809_v28  ;;  %v6280_v21 = vcombine.low %v1374_v16, %v1378_v9  ;;  %v6287_v25 = vcombine.high %v1381_v19, %v1385_v11  ;;  %v6289_v10 = vcombine.high %v1382_v17, %v1386_v43  ;;  %v6525_v51 = vld [vmem:[#allocation17 + $0x40] sm:$0xff]   ;;  %v6530_v56 = vld [vmem:[#allocation17 + $0xc8] sm:$0xff]   ;;  %v6533_v52 = vld [vmem:[#allocation17 + $0x50] sm:$0xff]  }
 0x3bd   :  { %4635 = vmatpush1.bf16.msra.mxu1 %v6264_v46  ;;  %6609 = vrsqrt.f32 %v4810_v44  ;;  %v6286_v1 = vcombine.low %v1381_v19, %v1385_v11  ;;  %v6288_v59 = vcombine.low %v1382_v17, %v1386_v43  ;;  %v6295_v50 = vcombine.high %v1389_v61, %v1393_v26  ;;  %v6527_v2 = vld [vmem:[#allocation17] sm:$0xff]   ;;  %v6531_v24 = vld [vmem:[#allocation17 + $0x8] sm:$0xff]   ;;  %v6534_v16 = vld [vmem:[#allocation17 + $0xd0] sm:$0xff]  }
 0x3be   :  { %4636 = vmatprep.subr.bf16.mxu1 %v6273_v14  ;;  %6611 = vrsqrt.f32 %v4808_v37  ;;  %v6297_v3 = vcombine.high %v1390_v18, %v1394_v62  ;;  %v6294_v15 = vcombine.low %v1389_v61, %v1393_v26  ;;  %v6296_v60 = vcombine.low %v1390_v18, %v1394_v62  ;;  %v6528_v14 = vld [vmem:[#allocation17 + $0x80] sm:$0xff]   ;;  %v6532_v53 = vld [vmem:[#allocation17 + $0x88] sm:$0xff]   ;;  %v6535_v9 = vld [vmem:[#allocation17 + $0x10] sm:$0xff]  }
 0x3bf   :  { %4473 = vmatpush1.bf16.msra.mxu0 %v6270_v23  ;;  %v6537_v28 = vld [vmem:[#allocation17 + $0x58] sm:$0xff]   ;;  %v6544_v19 = vld [vmem:[#allocation17 + $0xa0] sm:$0xff]   ;;  %v6545_v11 = vld [vmem:[#allocation17 + $0x68] sm:$0xff]  }
 0x3c0   :  { %4474 = vmatprep.subr.bf16.mxu0 %v6279_v8  ;;  %v6538_v23 = vld [vmem:[#allocation17 + $0xd8] sm:$0xff]   ;;  %v6542_v8 = vld [vmem:[#allocation17 + $0xe0] sm:$0xff]   ;;  %v6546_v17 = vld [vmem:[#allocation17 + $0xe8] sm:$0xff]  }
 0x3c1   :  { %4637 = vmatpush1.bf16.msra.mxu1 %v6272_v42  ;;  %v6539_v37 = vld [vmem:[#allocation17 + $0x18] sm:$0xff]   ;;  %v6541_v42 = vld [vmem:[#allocation17 + $0x60] sm:$0xff]   ;;  %v6547_v43 = vld [vmem:[#allocation17 + $0x28] sm:$0xff]  }
 0x3c2   :  { %4638 = vmatprep.subr.bf16.mxu1 %v6281_v6  ;;  %v6540_v44 = vld [vmem:[#allocation17 + $0x98] sm:$0xff]   ;;  %v6543_v6 = vld [vmem:[#allocation17 + $0x20] sm:$0xff]   ;;  %v6552_v61 = vld [vmem:[#allocation17 + $0xb0] sm:$0xff]  }
 0x3c3   :  { %4475 = vmatpush1.bf16.msra.mxu0 %v6278_v63  ;;  %v6548_v63 = vld [vmem:[#allocation17 + $0xa8] sm:$0xff]   ;;  %v6553_v26 = vld [vmem:[#allocation17 + $0x78] sm:$0xff]  }
 0x3c4   :  { %4476 = vmatprep.subr.bf16.mxu0 %v6287_v25  ;;  %v6550_v25 = vld [vmem:[#allocation17 + $0xf0] sm:$0xff]   ;;  %v6554_v18 = vld [vmem:[#allocation17 + $0xf8] sm:$0xff]  }
 0x3c5   :  { %4639 = vmatpush1.bf16.msra.mxu1 %v6280_v21  ;;  %v6606_v30 = vpop.eup %6605  ;;  %v6549_v21 = vld [vmem:[#allocation17 + $0x70] sm:$0xff]   ;;  %v6555_v62 = vld [vmem:[#allocation17 + $0x38] sm:$0xff]  }
 0x3c6   :  { %4640 = vmatprep.subr.bf16.mxu1 %v6289_v10  ;;  %v6608_v7 = vpop.eup %6607  ;;  %v6551_v10 = vld [vmem:[#allocation17 + $0x30] sm:$0xff]  }
 0x3c7   :  { %4477 = vmatpush1.bf16.msra.mxu0 %v6286_v1  ;;  %v6610_v20 = vpop.eup %6609  ;;  %v6556_v1 = vld [vmem:[#allocation17 + $0xb8] sm:$0xff]  }
 0x3c8   :  { %4478 = vmatprep.subr.bf16.mxu0 %v6295_v50  ;;  %v6612_v34 = vpop.eup %6611  ;;  %v4832_v31 = vcombine.low %v6608_v7, %v6610_v20  ;;  %v6558_v50 = vld [vmem:[#allocation17 + $0x1c0] sm:$0xff]   ;;  %v1420_v7 = vrot.slane %v7389_v36, %v7170_v57 }
 0x3c9   :  { %4641 = vmatpush1.bf16.msra.mxu1 %v6288_v59  ;;  %v4831_v39 = vcombine.low %v6606_v30, %v6612_v34  ;;  %v6557_v59 = vld [vmem:[#allocation17 + $0x140] sm:$0xff]   ;;  %v1424_v30 = vrot.slane %v7389_v36, %v7167_v55 }
 0x3ca   :  { %4642 = vmatprep.subr.bf16.mxu1 %v6297_v3  ;;  %v7606_v38 = vrot.slane %v4832_v31, %v7261_v12  ;;  %v1416_v3 = vrot.slane %v7389_v36, %v7164_v54 }
 0x3cb   :  { %4479 = vmatpush1.bf16.msra.mxu0 %v6294_v15  ;;  %v7609_v41 = vrot.slane %v4831_v39, %v7261_v12  ;;  %v1428_v15 = vrot.slane %v7389_v36, %v7173_v58 }
 0x3cc   :  { %6363 = vmatprep.subr.bf16.mxu0 %v6525_v51 }
 0x3cd   :  { %4643 = vmatpush1.bf16.msra.mxu1 %v6296_v60  ;;  %v4863_v46 = vcombine.low %v7609_v41, %v7606_v38 }
 0x3ce   :  { %4481 = vmatmul.mubr.bf16.vlgmr.msra.gmra.mrb[12].mxu0 %v7371_v27  ;;  %6385 = vmatprep.subr.bf16.mxu1 %v6526_v33 }
 0x3cf   :  { %6364 = vmatpush3.bf16.msra.mxu0 %v6527_v2 }
 0x3d0   :  { %4645 = vmatmul.mubr.bf16.vlgmr.msra.gmra.mrb[12].mxu1 %v7371_v27  ;;  %6365 = vmatprep.subr.bf16.mxu0 %v6529_v4  ;;  %v6536_v27 = vld [vmem:[#allocation17 + $0x90] sm:$0xff]  }
 0x3d1   :  { %6386 = vmatpush3.bf16.msra.mxu1 %v6528_v14 }
 0x3d2   :  { %6387 = vmatprep.subr.bf16.mxu1 %v6530_v56 }
 0x3d3   :  { %6366 = vmatpush3.bf16.msra.mxu0 %v6531_v24 }
 0x3d4   :  { %6367 = vmatprep.subr.bf16.mxu0 %v6533_v52 }
 0x3d5   :  { %6388 = vmatpush3.bf16.msra.mxu1 %v6532_v53 }
 0x3d6   :  { %6389 = vmatprep.subr.bf16.mxu1 %v6534_v16 }
 0x3d7   :  { %6368 = vmatpush3.bf16.msra.mxu0 %v6535_v9 }
 0x3d8   :  { %6369 = vmatprep.subr.bf16.mxu0 %v6537_v28 }
 0x3d9   :  { %6390 = vmatpush3.bf16.msra.mxu1 %v6536_v27 }
 0x3da   :  { %6391 = vmatprep.subr.bf16.mxu1 %v6538_v23 }
 0x3db   :  { %6370 = vmatpush3.bf16.msra.mxu0 %v6539_v37 }
 0x3dc   :  { %6371 = vmatprep.subr.bf16.mxu0 %v6541_v42 }
 0x3dd   :  { %6392 = vmatpush3.bf16.msra.mxu1 %v6540_v44 }
 0x3de   :  { %6393 = vmatprep.subr.bf16.mxu1 %v6542_v8 }
 0x3df   :  { %6372 = vmatpush3.bf16.msra.mxu0 %v6543_v6 }
 0x3e0   :  { %6373 = vmatprep.subr.bf16.mxu0 %v6545_v11 }
 0x3e1   :  { %6394 = vmatpush3.bf16.msra.mxu1 %v6544_v19 }
 0x3e2   :  { %6395 = vmatprep.subr.bf16.mxu1 %v6546_v17 }
 0x3e3   :  { %6374 = vmatpush3.bf16.msra.mxu0 %v6547_v43 }
 0x3e4   :  { %6375 = vmatprep.subr.bf16.mxu0 %v6549_v21 }
 0x3e5   :  { %6396 = vmatpush3.bf16.msra.mxu1 %v6548_v63 }
 0x3e6   :  { %6397 = vmatprep.subr.bf16.mxu1 %v6550_v25 }
 0x3e7   :  { %6376 = vmatpush3.bf16.msra.mxu0 %v6551_v10 }
 0x3e8   :  { %6377 = vmatprep.subr.bf16.mxu0 %v6553_v26 }
 0x3e9   :  { %6398 = vmatpush3.bf16.msra.mxu1 %v6552_v61 }
 0x3ea   :  { %6399 = vmatprep.subr.bf16.mxu1 %v6554_v18 }
 0x3eb   :  { %6378 = vmatpush3.bf16.msra.mxu0 %v6555_v62 }
 0x3ec   :  { %6407 = vmatprep.subr.bf16.mxu0 %v6557_v59 }
 0x3ed   :  { %6400 = vmatpush3.bf16.msra.mxu1 %v6556_v1 }
 0x3ee   :  { %6429 = vmatprep.subr.bf16.mxu1 %v6558_v50 }
 0x4a1   :  { %v4482_v20 = vpop.f32.mrb[12].mxu0 }
 0x4a2   :  { %v6455_v60 = vadd.f32 %v4482_v20, %v1416_v3  ;;  %v4484_v31 = vpop.f32.mrb[13].mxu0 }
 0x4a3   :  { %v4646_v34 = vpop.f32.mrb[12].mxu1  ;;  %v6456_v51 = vadd.f32 %v4484_v31, %v1420_v7  ;;  %v4486_v2 = vpop.f32.mrb[14].mxu0 }
 0x4a4   :  { %v6457_v39 = vadd.f32 %v4646_v34, %v1424_v30  ;;  %v4648_v33 = vpop.f32.mrb[13].mxu1  ;;  %v7623_v14 = vmax.f32 %v6455_v60, 0.0  ;;  %v4487_v24 = vpop.f32.mrb[15].mxu0 }
 0x4a5   :  { %v6458_v4 = vadd.f32 %v4648_v33, %v1428_v15  ;;  %v4650_v56 = vpop.f32.mrb[14].mxu1  ;;  %v7627_v52 = vmax.f32 %v6456_v51, 0.0 }
 0x4a6   :  { %v7625_v53 = vmax.f32 %v6457_v39, 0.0  ;;  %v4651_v16 = vpop.f32.mrb[15].mxu1  ;;  %v4687_v36 = vrot.slane %v7623_v14, 4  ;;  %v4715_v9 = vmul.f32 %v7623_v14, %v7623_v14 }
 0x4a7   :  { %v7632_v27 = vmax.f32 %v6458_v4, 0.0  ;;  %v4693_v37 = vrot.slane %v7627_v52, 4  ;;  %v4716_v44 = vmul.f32 %v7627_v52, %v7627_v52 }
 0x4a8   :  { %v4699_v28 = vrot.slane %v7625_v53, 4  ;;  %v4717_v23 = vmul.f32 %v7625_v53, %v7625_v53  ;;  %v4688_v42 = vadd.f32 %v4687_v36, %v7623_v14  ;;  %v4743_v8 = vrot.slane %v4715_v9, 4 }
 0x4a9   :  { %v4705_v6 = vrot.slane %v7632_v27, 4  ;;  %v4718_v19 = vmul.f32 %v7632_v27, %v7632_v27  ;;  %v4694_v43 = vadd.f32 %v4693_v37, %v7627_v52  ;;  %v4749_v63 = vrot.slane %v4716_v44, 4 }
 0x4aa   :  { %v4700_v11 = vadd.f32 %v4699_v28, %v7625_v53  ;;  %v4755_v17 = vrot.slane %v4717_v23, 4  ;;  %v4689_v21 = vrot.slane %v4688_v42, 2  ;;  %v4744_v25 = vadd.f32 %v4743_v8, %v4715_v9 }
 0x4ab   :  { %v4706_v10 = vadd.f32 %v4705_v6, %v7632_v27  ;;  %v4761_v61 = vrot.slane %v4718_v19, 4  ;;  %v4695_v62 = vrot.slane %v4694_v43, 2  ;;  %v4750_v1 = vadd.f32 %v4749_v63, %v4716_v44 }
 0x4ac   :  { %v4701_v26 = vrot.slane %v4700_v11, 2  ;;  %v4756_v18 = vadd.f32 %v4755_v17, %v4717_v23  ;;  %v4690_v59 = vadd.f32 %v4689_v21, %v4688_v42  ;;  %v4745_v50 = vrot.slane %v4744_v25, 2 }
 0x4ad   :  { %v4707_v3 = vrot.slane %v4706_v10, 2  ;;  %v4762_v30 = vadd.f32 %v4761_v61, %v4718_v19  ;;  %v4696_v20 = vadd.f32 %v4695_v62, %v4694_v43  ;;  %v4751_v60 = vrot.slane %v4750_v1, 2 }
 0x4ae   :  { %v4702_v7 = vadd.f32 %v4701_v26, %v4700_v11  ;;  %v4757_v15 = vrot.slane %v4756_v18, 2  ;;  %v4691_v34 = vrot.slane %v4690_v59, 1  ;;  %v4746_v31 = vadd.f32 %v4745_v50, %v4744_v25 }
 0x4af   :  { %v4708_v39 = vadd.f32 %v4707_v3, %v4706_v10  ;;  %v4763_v51 = vrot.slane %v4762_v30, 2  ;;  %v4697_v4 = vrot.slane %v4696_v20, 1  ;;  %v4752_v56 = vadd.f32 %v4751_v60, %v4750_v1 }
 0x4b0   :  { %v4703_v33 = vrot.slane %v4702_v7, 1  ;;  %v4758_v2 = vadd.f32 %v4757_v15, %v4756_v18  ;;  %v4692_v24 = vadd.f32 %v4691_v34, %v4690_v59  ;;  %v4747_v16 = vrot.slane %v4746_v31, 1 }
 0x4b1   :  { %v4709_v36 = vrot.slane %v4708_v39, 1  ;;  %v4764_v9 = vadd.f32 %v4763_v51, %v4762_v30  ;;  %v4698_v37 = vadd.f32 %v4697_v4, %v4696_v20  ;;  %v4753_v44 = vrot.slane %v4752_v56, 1 }
 0x4b2   :  { %v4704_v28 = vadd.f32 %v4703_v33, %v4702_v7  ;;  %v4759_v23 = vrot.slane %v4758_v2, 1  ;;  %v4748_v42 = vadd.f32 %v4747_v16, %v4746_v31  ;;  %v4771_v8 = vmul.f32 0.125, %v4692_v24 }
 0x4b3   :  { %v4710_v6 = vadd.f32 %v4709_v36, %v4708_v39  ;;  %v4765_v19 = vrot.slane %v4764_v9, 1  ;;  %v4754_v43 = vadd.f32 %v4753_v44, %v4752_v56  ;;  %v4772_v63 = vmul.f32 0.125, %v4698_v37 }
 0x4b4   :  { %v4760_v11 = vadd.f32 %v4759_v23, %v4758_v2  ;;  %v4773_v17 = vmul.f32 0.125, %v4704_v28  ;;  %v4779_v21 = vmul.f32 0.125, %v4748_v42  ;;  %v4787_v25 = vmul.f32 %v4771_v8, %v4771_v8 }
 0x4b5   :  { %v4766_v10 = vadd.f32 %v4765_v19, %v4764_v9  ;;  %v4774_v61 = vmul.f32 0.125, %v4710_v6  ;;  %v4780_v62 = vmul.f32 0.125, %v4754_v43  ;;  %v4788_v1 = vmul.f32 %v4772_v63, %v4772_v63  ;;  %v4661_v6 = vld [vmem:[#allocation14] sm:$0xff] }
 0x4b6   :  { %v4781_v26 = vmul.f32 0.125, %v4760_v11  ;;  %v4789_v18 = vmul.f32 %v4773_v17, %v4773_v17  ;;  %v4795_v59 = vsub.f32 %v4779_v21, %v4787_v25  ;;  %v4871_v42 = vrot.slane %v4863_v46, %v7261_v12 }
 0x4b7   :  { %v4782_v50 = vmul.f32 0.125, %v4766_v10  ;;  %v4790_v3 = vmul.f32 %v4774_v61, %v4774_v61  ;;  %v4796_v7 = vsub.f32 %v4780_v62, %v4788_v1 }
 0x4b8   :  { %v4797_v30 = vsub.f32 %v4781_v26, %v4789_v18  ;;  %v4803_v15 = vmax.f32 %v4795_v59, 0.0 }
 0x4b9   :  { %v4798_v20 = vsub.f32 %v4782_v50, %v4790_v3  ;;  %v4804_v34 = vmax.f32 %v4796_v7, 0.0 }
 0x4ba   :  { %v4805_v60 = vmax.f32 %v4797_v30, 0.0  ;;  %v4811_v31 = vadd.f32 1e-05, %v4803_v15 }
 0x4bb   :  { %v4806_v39 = vmax.f32 %v4798_v20, 0.0  ;;  %v4812_v33 = vadd.f32 1e-05, %v4804_v34 }
 0x4bc   :  { %v4813_v51 = vadd.f32 1e-05, %v4805_v60  ;;  %6613 = vrsqrt.f32 %v4811_v31 }
 0x4bd   :  { %v4814_v2 = vadd.f32 1e-05, %v4806_v39 }
 0x4be   :  { %6615 = vrsqrt.f32 %v4813_v51 }
 0x4bf   :  { %6617 = vrsqrt.f32 %v4812_v33 }
 0x4c0   :  { %6619 = vrsqrt.f32 %v4814_v2  ;;  %v4662_v2 = vld [vmem:[#allocation16] sm:$0xff] }
 0x4c6   :  { %v6614_v4 = vpop.eup %6613 }
 0x4c8   :  { %v6616_v56 = vpop.eup %6615 }
 0x4c9   :  { %v6618_v24 = vpop.eup %6617 }
 0x4ca   :  { %v6620_v16 = vpop.eup %6619  ;;  %v4833_v36 = vcombine.low %v6614_v4, %v6618_v24 }
 0x4cb   :  { %v4834_v9 = vcombine.low %v6616_v56, %v6620_v16 }
 0x4cc   :  { %v4855_v28 = vrot.slane %v4833_v36, %v7261_v12 }
 0x4cd   :  { %v4862_v23 = vrot.slane %v4834_v9, %v7261_v12 }
 0x4cf   :  { %v4864_v37 = vcombine.low %v4855_v28, %v4862_v23 }
 0x4d1   :  { %v4878_v44 = vrot.slane %v4864_v37, %v7261_v12 }
 0x4d3   :  { %v4879_v19 = vcombine.low %v4871_v42, %v4878_v44 }
 0x4d5   :  { %v4881_v11 = vmul.f32 %v4879_v19, %v4661_v6  ;;  %v6559_v19 = vld [vmem:[#allocation17 + $0x100] sm:$0xff]  }
 0x4d7   :  { %v4886_v43 = vrot.slane %v4881_v11, %v7142_v45  ;;  %v4890_v21 = vrot.slane %v4881_v11, %v7150_v48  ;;  %v4894_v25 = vrot.slane %v4881_v11, %v7147_v47  ;;  %v4898_v10 = vrot.slane %v4881_v11, %v7153_v49 }
 0x4d8   :  { %v4902_v26 = vrot.slane %v4881_v11, %v7164_v54  ;;  %v4906_v18 = vrot.slane %v4881_v11, %v7170_v57  ;;  %v4910_v62 = vrot.slane %v4881_v11, %v7167_v55  ;;  %v4914_v38 = vrot.slane %v4881_v11, %v7173_v58 }
 0x4d9   :  { %v4923_v41 = vmul.f32 %v4886_v43, %v7561_v13  ;;  %v4924_v46 = vmul.f32 %v4890_v21, %v7568_v0  ;;  %v4925_v1 = vmul.f32 %v4894_v25, %v7563_v22  ;;  %v4926_v59 = vmul.f32 %v4898_v10, %v7572_v40 }
 0x4da   :  { %v4927_v50 = vmul.f32 %v4902_v26, %v4771_v8  ;;  %v4928_v3 = vmul.f32 %v4906_v18, %v4772_v63  ;;  %v4929_v30 = vmul.f32 %v4910_v62, %v4773_v17  ;;  %v4930_v7 = vmul.f32 %v4914_v38, %v4774_v61 }
 0x4db   :  { %v4939_v15 = vcombine.low %v4923_v41, %v4924_v46  ;;  %v4940_v20 = vcombine.low %v4925_v1, %v4926_v59  ;;  %v4991_v60 = vmul.f32 %v4890_v21, %v7505_v5  ;;  %v4993_v34 = vmul.f32 %v4898_v10, %v7514_v35  ;;  %v6563_v21 = vld [vmem:[#allocation17 + $0x108] sm:$0xff]   ;;  %v6565_v10 = vld [vmem:[#allocation17 + $0x150] sm:$0xff]   ;;  %v6570_v41 = vld [vmem:[#allocation17 + $0x1d8] sm:$0xff]  }
 0x4dc   :  { %v4941_v31 = vcombine.low %v4927_v50, %v4928_v3  ;;  %v4942_v39 = vcombine.low %v4929_v30, %v4930_v7  ;;  %v4990_v13 = vmul.f32 %v4886_v43, %v7497_v32  ;;  %v4992_v0 = vmul.f32 %v4894_v25, %v7503_v29  ;;  %v6564_v25 = vld [vmem:[#allocation17 + $0x188] sm:$0xff]   ;;  %v6571_v46 = vld [vmem:[#allocation17 + $0x118] sm:$0xff]   ;;  %v6573_v59 = vld [vmem:[#allocation17 + $0x160] sm:$0xff]  }
 0x4dd   :  { %v4949_v22 = vrot.slane %v4939_v15, %v7261_v12  ;;  %v4956_v40 = vrot.slane %v4940_v20, %v7261_v12  ;;  %v4995_v8 = vmul.f32 %v4906_v18, %v7627_v52  ;;  %v4997_v17 = vmul.f32 %v4914_v38, %v7632_v27  ;;  %v6567_v18 = vld [vmem:[#allocation17 + $0x110] sm:$0xff]   ;;  %v6569_v38 = vld [vmem:[#allocation17 + $0x158] sm:$0xff]   ;;  %v6574_v50 = vld [vmem:[#allocation17 + $0x1e0] sm:$0xff]  }
 0x4de   :  { %v4963_v63 = vrot.slane %v4941_v31, %v7261_v12  ;;  %v4970_v5 = vrot.slane %v4942_v39, %v7261_v12  ;;  %v4994_v35 = vmul.f32 %v4902_v26, %v7623_v14  ;;  %v4996_v61 = vmul.f32 %v4910_v62, %v7625_v53  ;;  %v6566_v26 = vld [vmem:[#allocation17 + $0x1d0] sm:$0xff]   ;;  %v6572_v1 = vld [vmem:[#allocation17 + $0x198] sm:$0xff]   ;;  %v6575_v3 = vld [vmem:[#allocation17 + $0x120] sm:$0xff]  }
 0x4df   :  { %v4971_v51 = vcombine.low %v4949_v22, %v4956_v40  ;;  %v6568_v62 = vld [vmem:[#allocation17 + $0x190] sm:$0xff]   ;;  %v6576_v30 = vld [vmem:[#allocation17 + $0x1a0] sm:$0xff]   ;;  %v6577_v7 = vld [vmem:[#allocation17 + $0x168] sm:$0xff]  }
 0x4e0   :  { %v4972_v32 = vcombine.low %v4963_v63, %v4970_v5  ;;  %v6578_v15 = vld [vmem:[#allocation17 + $0x1e8] sm:$0xff]   ;;  %v6582_v31 = vld [vmem:[#allocation17 + $0x1f0] sm:$0xff]   ;;  %v6586_v22 = vld [vmem:[#allocation17 + $0x1f8] sm:$0xff]  }
 0x4e1   :  { %v4979_v29 = vrot.slane %v4971_v51, %v7261_v12  ;;  %v6579_v20 = vld [vmem:[#allocation17 + $0x128] sm:$0xff]   ;;  %v6583_v39 = vld [vmem:[#allocation17 + $0x130] sm:$0xff]   ;;  %v6587_v40 = vld [vmem:[#allocation17 + $0x138] sm:$0xff]  }
 0x4e2   :  { %v4986_v33 = vrot.slane %v4972_v32, %v7261_v12 }
 0x4e4   :  { %v4987_v4 = vcombine.low %v4979_v29, %v4986_v33 }
 0x4e6   :  { %v4989_v56 = vsub.f32 %v4662_v2, %v4987_v4 }
 0x4e8   :  { %v5006_v52 = vrot.slane %v4989_v56, %v7150_v48  ;;  %v5014_v27 = vrot.slane %v4989_v56, %v7153_v49  ;;  %v5002_v24 = vrot.slane %v4989_v56, %v7142_v45  ;;  %v5010_v16 = vrot.slane %v4989_v56, %v7147_v47 }
 0x4e9   :  { %v5022_v14 = vrot.slane %v4989_v56, %v7170_v57  ;;  %v5030_v53 = vrot.slane %v4989_v56, %v7173_v58  ;;  %v5018_v36 = vrot.slane %v4989_v56, %v7164_v54  ;;  %v5026_v9 = vrot.slane %v4989_v56, %v7167_v55  ;;  %v6560_v58 = vld [vmem:[#allocation17 + $0x180] sm:$0xff]   ;;  %v6561_v54 = vld [vmem:[#allocation17 + $0x148] sm:$0xff]  }
 0x4ea   :  { %v5040_v12 = vadd.f32 %v5006_v52, %v4991_v60  ;;  %v5042_v28 = vadd.f32 %v5014_v27, %v4993_v34  ;;  %v5039_v23 = vadd.f32 %v5002_v24, %v4990_v13  ;;  %v5041_v37 = vadd.f32 %v5010_v16, %v4992_v0  ;;  %v6562_v55 = vld [vmem:[#allocation17 + $0x1c8] sm:$0xff]   ;;  %v6581_v34 = vld [vmem:[#allocation17 + $0x170] sm:$0xff]   ;;  %v6585_v0 = vld [vmem:[#allocation17 + $0x178] sm:$0xff]  }
 0x4eb   :  { %v5044_v44 = vadd.f32 %v5022_v14, %v4995_v8  ;;  %v5046_v48 = vadd.f32 %v5030_v53, %v4997_v17  ;;  %v7688_v42 = vadd.f32 %v5018_v36, %v4994_v35  ;;  %v7690_v49 = vadd.f32 %v5026_v9, %v4996_v61  ;;  %v6580_v60 = vld [vmem:[#allocation17 + $0x1a8] sm:$0xff]   ;;  %v6584_v13 = vld [vmem:[#allocation17 + $0x1b0] sm:$0xff]   ;;  %v6588_v8 = vld [vmem:[#allocation17 + $0x1b8] sm:$0xff]  }
 0x4ec   :  { %v5048_v45 = vpack.c.bf16 %v5040_v12, %v5040_v12  ;;  %v5050_v47 = vpack.c.bf16 %v5042_v28, %v5042_v28  ;;  %v5047_v6 = vpack.c.bf16 %v5039_v23, %v5039_v23  ;;  %v5049_v57 = vpack.c.bf16 %v5041_v37, %v5041_v37  ;;  %v6298_v61 = vld [vmem:[#allocation19] ss:$0 sm:$0xff] }
 0x4ed   :  { %v5052_v11 = vpack.c.bf16 %v5044_v44, %v5044_v44  ;;  %v5054_v43 = vpack.c.bf16 %v5046_v48, %v5046_v48  ;;  %v5051_v17 = vpack.c.bf16 %v7688_v42, %v7688_v42  ;;  %v5053_v63 = vpack.c.bf16 %v7690_v49, %v7690_v49 }
 0x4ee   :  { %5606 = vmatprep.mubr.bf16.mxu0 %v5048_v45  ;;  %5646 = vmatprep.mubr.bf16.mxu1 %v5050_v47 }
 0x4ef   :  { %5607 = vmatmul.mubr.bf16.vlgmr.msra.gmra.mrb[16].mxu0 %v5047_v6  ;;  %5647 = vmatmul.mubr.bf16.vlgmr.msra.gmra.mrb[16].mxu1 %v5049_v57 }
 0x4f0   :  { %6408 = vmatpush3.bf16.msra.mxu0 %v6559_v19  ;;  %6430 = vmatpush3.bf16.msra.mxu1 %v6560_v58 }
 0x4f1   :  { %5686 = vmatprep.mubr.bf16.mxu0 %v5052_v11  ;;  %5726 = vmatprep.mubr.bf16.mxu1 %v5054_v43 }
 0x4f2   :  { %6409 = vmatprep.subr.bf16.mxu0 %v6561_v54  ;;  %6431 = vmatprep.subr.bf16.mxu1 %v6562_v55 }
 0x4f4   :  { %6410 = vmatpush3.bf16.msra.mxu0 %v6563_v21  ;;  %6432 = vmatpush3.bf16.msra.mxu1 %v6564_v25 }
 0x4f5   :  { %6411 = vmatprep.subr.bf16.mxu0 %v6565_v10  ;;  %6433 = vmatprep.subr.bf16.mxu1 %v6566_v26 }
 0x4f8   :  { %6412 = vmatpush3.bf16.msra.mxu0 %v6567_v18  ;;  %6434 = vmatpush3.bf16.msra.mxu1 %v6568_v62 }
 0x4f9   :  { %6413 = vmatprep.subr.bf16.mxu0 %v6569_v38  ;;  %6435 = vmatprep.subr.bf16.mxu1 %v6570_v41 }
 0x4fc   :  { %6414 = vmatpush3.bf16.msra.mxu0 %v6571_v46  ;;  %6436 = vmatpush3.bf16.msra.mxu1 %v6572_v1 }
 0x4fd   :  { %6415 = vmatprep.subr.bf16.mxu0 %v6573_v59  ;;  %6437 = vmatprep.subr.bf16.mxu1 %v6574_v50 }
 0x500   :  { %6416 = vmatpush3.bf16.msra.mxu0 %v6575_v3  ;;  %6438 = vmatpush3.bf16.msra.mxu1 %v6576_v30 }
 0x501   :  { %6417 = vmatprep.subr.bf16.mxu0 %v6577_v7  ;;  %6439 = vmatprep.subr.bf16.mxu1 %v6578_v15 }
 0x504   :  { %6418 = vmatpush3.bf16.msra.mxu0 %v6579_v20  ;;  %6440 = vmatpush3.bf16.msra.mxu1 %v6580_v60 }
 0x505   :  { %6419 = vmatprep.subr.bf16.mxu0 %v6581_v34  ;;  %6441 = vmatprep.subr.bf16.mxu1 %v6582_v31 }
 0x508   :  { %6420 = vmatpush3.bf16.msra.mxu0 %v6583_v39  ;;  %6442 = vmatpush3.bf16.msra.mxu1 %v6584_v13 }
 0x509   :  { %6421 = vmatprep.subr.bf16.mxu0 %v6585_v0  ;;  %6443 = vmatprep.subr.bf16.mxu1 %v6586_v22 }
 0x50c   :  { %6422 = vmatpush3.bf16.msra.mxu0 %v6587_v40  ;;  %6444 = vmatpush3.bf16.msra.mxu1 %v6588_v8 }
 0x50f   :  { %5687 = vmatmul.mubr.bf16.vlgmr.msra.gmra.mrb[20].mxu0 %v5051_v17  ;;  %5727 = vmatmul.mubr.bf16.vlgmr.msra.gmra.mrb[20].mxu1 %v5053_v63 }
 0x5c2   :  { %v6379_v5 = vpop.f32.mrb[16].mxu0  ;;  %v6401_v35 = vpop.f32.mrb[16].mxu1 }
 0x5c3   :  { %v6380_v51 = vpop.f32.mrb[17].mxu0  ;;  %v6402_v32 = vpop.f32.mrb[17].mxu1 }
 0x5c4   :  { %v6381_v29 = vadd.f32 %v6380_v51, %v6379_v5  ;;  %v6403_v33 = vadd.f32 %v6402_v32, %v6401_v35  ;;  %v6382_v2 = vpop.f32.mrb[18].mxu0  ;;  %v6404_v4 = vpop.f32.mrb[18].mxu1 }
 0x5c5   :  { %v6383_v56 = vpop.f32.mrb[19].mxu0  ;;  %v6405_v52 = vpop.f32.mrb[19].mxu1 }
 0x5c6   :  { %v5609_v27 = vadd.f32 %v6381_v29, %v6298_v61 }
 0x5c8   :  { %v5649_v24 = vadd.f32 %v6403_v33, %v5609_v27 }
 0x5e2   :  { %v6423_v16 = vpop.f32.mrb[20].mxu0  ;;  %v6445_v14 = vpop.f32.mrb[20].mxu1 }
 0x5e3   :  { %v6424_v53 = vpop.f32.mrb[21].mxu0  ;;  %v6446_v36 = vpop.f32.mrb[21].mxu1 }
 0x5e4   :  { %v6425_v9 = vadd.f32 %v6424_v53, %v6423_v16  ;;  %v6447_v12 = vadd.f32 %v6446_v36, %v6445_v14  ;;  %v6426_v28 = vpop.f32.mrb[22].mxu0  ;;  %v6448_v23 = vpop.f32.mrb[22].mxu1 }
 0x5e5   :  { %v6427_v37 = vpop.f32.mrb[23].mxu0  ;;  %v6449_v44 = vpop.f32.mrb[23].mxu1 }
 0x5e6   :  { %v5689_v48 = vadd.f32 %v6425_v9, %v5649_v24 }
 0x5e8   :  { %v5729_v42 = vadd.f32 %v6447_v12, %v5689_v48 }
 0x5ea   :  { %5734 = vmax.xlane.f32.xlu0 %v5729_v42 }
 0x677   :  { %v5735_v49 = vpop.xlane.xlu0 %5734 }
 0x678   :  { %v5736_v45 = vsub.f32 %v5729_v42, %v5735_v49 }
 0x67a   :  { %v5737_v47 = vmul.f32 1.442695, %v5736_v45 }
 0x67c   :  { %6621 = vpow2.f32 %v5737_v47 }
 0x686   :  { %v6622_v6 = vpop.eup %6621 }
 0x687   :  { %5739 = vadd.xlane.f32.xlu0 %v6622_v6 }
 0x714   :  { %v5740_v57 = vpop.xlane.xlu0 %5739 }
 0x715   :  { %6623 = vlog2.f32 %v5740_v57 }
 0x71f   :  { %v6624_v19 = vpop.eup %6623 }
 0x720   :  { %v5742_v58 = vmul.f32 0.6931472, %v6624_v19 }
 0x722   :  { %v5743_v54 = vadd.f32 %v5742_v58, %v5735_v49 }
 0x724   :  { %v5744_v55 = vsub.f32 %v5729_v42, %v5743_v54 }
 0x726   :  { %5745 = vst [vmem:[#allocation20] sm:$0xff] %v5744_v55 }
 0x727   :  { %6878 = shalt.err (!%p6875_p8)
}
 0x728   :  { %s6879_s19 = scalar_lea.hbm %s7719_s11, 128 }
 0x729   :  { %p6880_p9 = scmp.ne.s32.totalorder %s7719_s11, %s6879_s19  ;;  %p6883_p10 = scmp.lt.u32.totalorder %s6879_s19, %s7719_s11 }
 0x72b   :  { %p6885_p11 = pnand %p6883_p10, %p6880_p9 }
 0x72d   :  { %6888 = shalt.err (!%p6885_p11)
}
 0x72e   :  { %5755 = dma.vmem_to_hbm [thread:$0]  %s5753_s3, 128, %s7719_s11, [#allocation4]  }
 0x72f   :  { %6901 = dma.done.wait [#allocation4], 128  }
 0x730   :  { %6902 = vsyncadd [#allocation4], 4294967168 }
 0x731   :  { %5759 = vsyncpa [#allocation3], 1 }
 0x732   :  { %5760 = vsyncpa [#allocation6], 1 }
 0x733   :  { %5761 = vsyncpa [#allocation9], 1 }
 0x734   :  { %5762 = vsyncpa [#allocation12], 1 }
 0x735   :  { %5763 = vsyncpa [#allocation15], 1 }
 0x736   :  { %5764 = vsyncpa [#allocation18], 1 }
 0x737   :  { %5765 = vsyncpa [#allocation4], 1 }

</bundles_post_ra>
